<compile_context>
chip_gen: v5e
topology: v5e:2x2
jax: 0.10.0
libtpu: 0.0.40
codegen_flags: <defaults>
</compile_context>

<pallas_src>
import functools

import jax
import jax.numpy as jnp
from jax import lax
from jax.experimental import pallas as pl
from jax.experimental.pallas import tpu as pltpu

_MiB = 1024 * 1024


def _maxout_kernel(x_ref, o_ref, *, pool_size: int, chunk_rows: int, unroll: int):
    """x_ref: (TM, W) VMEM tile, o_ref: (TM, C) with C = W // pool_size.

    out[r, c] = max_k x[r, c * pool_size + k]
    """
    tm, w = x_ref.shape
    c = w // pool_size
    nchunks = tm // chunk_rows

    def _reduce(rows, nrows):
        xc = x_ref[rows, :]
        return jnp.max(xc.reshape(nrows, c, pool_size), axis=-1)

    if nchunks <= 1:
        o_ref[...] = _reduce(slice(None), tm)
    else:
        def body(i, carry):
            r0 = pl.multiple_of(i * chunk_rows, chunk_rows)
            rows = pl.ds(r0, chunk_rows)
            o_ref[rows, :] = _reduce(rows, chunk_rows)
            return carry

        lax.fori_loop(0, nchunks, body, 0, unroll=unroll)


def _vmem_capacity_bytes() -> int:
    """Per-core VMEM capacity; conservative 64 MiB fallback (safe on v7x)."""
    try:
        info = pltpu.get_tpu_info()
        cap = getattr(info, "vmem_capacity_bytes", None)
        if cap:
            return int(min(max(int(cap), 32 * _MiB), 256 * _MiB))
    except Exception:
        pass
    return 64 * _MiB


def _sublane_multiple(itemsize: int) -> int:
    # f32 -> 8, bf16/f16 -> 16, int8/fp8 -> 32 (packed sublane tile heights).
    return {4: 8, 2: 16, 1: 32}.get(itemsize, 8)


def _choose_cols(f: int):
    """Output row width C (lanes). Returns (C, needs_col_pad)."""
    for c in (512, 384, 256, 128):          # lane-dense, widest first
        if f % c == 0:
            return c, False
    if f <= 512:
        return f, False                     # tiny problem: single full-extent row
    for c in range(512, 63, -1):            # largest divisor >= 64: zero-copy
        if f % c == 0:
            return c, False
    # Rare fallback (e.g. prime group count): pad flat input (one extra HBM pass).
    return 128, True


def _choose_row_tile(r: int, w: int, itemsize: int, vmem_cap: int, sub: int) -> int:
    if r <= sub:
        return r                            # single full-extent block
    budget = min(16 * _MiB, max(vmem_cap // 8, 2 * _MiB))   # input bytes / step
    cap = (budget // max(1, w * itemsize)) // sub * sub
    cap = max(sub, min(cap, r))
    # Keep >= ~4 grid steps when possible (DMA/compute overlap, megacore).
    if r >= 4 * sub:
        cap = min(cap, max(sub, (r // 4) // sub * sub))
    else:
        cap = min(cap, sub)
    t = cap
    while t >= sub:                          # prefer a tile that divides R exactly
        if r % t == 0:
            return t
        t -= sub
    return cap                               # partial last block (masked by Pallas)


def _choose_chunk_rows(tm: int, w: int, itemsize: int, sub: int) -> int:
    if tm <= sub:
        return tm
    target = (128 * 1024) // max(1, w * itemsize)   # ~32 input vregs per chunk
    target = max(sub, min(tm, (target // sub) * sub))
    t = target
    while t > sub and tm % t != 0:
        t -= sub
    return t


def maxout(x: jax.Array, pool_size: int) -> jax.Array:
    """Maxout over the last dim: (..., D) -> (..., D // pool_size)."""
    d = x.shape[-1]
    assert d % pool_size == 0, "last dim must be divisible by pool_size"
    if pool_size == 1:
        return x

    out_shape = (*x.shape[:-1], d // pool_size)
    n = x.size
    f = n // pool_size                       # total number of pooled outputs
    itemsize = jnp.dtype(x.dtype).itemsize
    sub = _sublane_multiple(itemsize)
    vmem_cap = _vmem_capacity_bytes()

    # ---- lane-dense 2-D re-chunk: x -> (R, W), out -> (R, C) ----------------
    c, needs_pad = _choose_cols(f)
    w = c * pool_size
    r = pl.cdiv(f, c) if needs_pad else f // c

    x_flat = x.reshape(-1)
    total = r * w
    if total != n:
        # Padding starts at a group boundary (pool | n), so padded groups map
        # to outputs >= f and are sliced off below.
        x_flat = jnp.pad(x_flat, (0, total - n))
    x2 = x_flat.reshape(r, w)

    tm = _choose_row_tile(r, w, itemsize, vmem_cap, sub)
    chunk_rows = _choose_chunk_rows(tm, w, itemsize, sub)
    nchunks = max(1, tm // chunk_rows)
    unroll = int(min(nchunks, 8)) if nchunks > 1 else 1

    grid = (pl.cdiv(r, tm),)

    # Double-buffered input + output tiles, plus headroom for compiler scratch.
    footprint = 2 * tm * (w + c) * itemsize
    vmem_limit = int(min(0.7 * vmem_cap, max(32 * _MiB, footprint + 8 * _MiB)))

    kernel = functools.partial(
        _maxout_kernel, pool_size=pool_size, chunk_rows=chunk_rows, unroll=unroll
    )

    cost = pl.CostEstimate(
        flops=int(r) * int(w),               # ~one compare per input element
        transcendentals=0,
        bytes_accessed=int((r * w + r * c) * itemsize),
    )

    out2 = pl.pallas_call(
        kernel,
        out_shape=jax.ShapeDtypeStruct((r, c), x.dtype),
        grid_spec=pltpu.PrefetchScalarGridSpec(
            num_scalar_prefetch=0,
            grid=grid,
            in_specs=[pl.BlockSpec((tm, w), lambda i: (i, 0))],
            out_specs=pl.BlockSpec((tm, c), lambda i: (i, 0)),
        ),
        compiler_params=pltpu.CompilerParams(
            dimension_semantics=("parallel",),
            vmem_limit_bytes=vmem_limit,
        ),
        cost_estimate=cost,
    )(x2)

    out_flat = out2.reshape(-1)
    if out_flat.shape[0] != f:
        out_flat = out_flat[:f]
    return out_flat.reshape(out_shape)


def _reference(x, pool_size):
    return jnp.max(
        x.reshape(*x.shape[:-1], x.shape[-1] // pool_size, pool_size), axis=-1
    )


if __name__ == "__main__":
    key = jax.random.PRNGKey(0)

    # Primary check: shape consistent with the module, pool_size = 4.
    x = jax.random.normal(key, (2, 4, 16, 16), dtype=jnp.float32)
    out = jax.block_until_ready(maxout(x, 4))
    ref = _reference(x, 4)
    assert out.shape == ref.shape and out.dtype == ref.dtype
    assert jnp.allclose(out, ref), "mismatch vs reference (primary)"

    # Multi-grid-step path (several row blocks, single in-kernel chunk).
    x2 = jax.random.normal(jax.random.PRNGKey(0), (64, 8, 256), dtype=jnp.float32)
    out2 = jax.block_until_ready(maxout(x2, 2))
    ref2 = _reference(x2, 2)
    assert out2.shape == ref2.shape and jnp.allclose(out2, ref2), "mismatch (multi-block)"

    # Multi-grid-step + unrolled in-kernel chunk-loop path.
    x3 = jax.random.normal(jax.random.PRNGKey(0), (128, 2048), dtype=jnp.float32)
    out3 = jax.block_until_ready(maxout(x3, 4))
    ref3 = _reference(x3, 4)
    assert out3.shape == ref3.shape and jnp.allclose(out3, ref3), "mismatch (chunk loop)"

    # Odd pool size / non-128 lane width, single-block path.
    x4 = jax.random.normal(jax.random.PRNGKey(0), (3, 4, 20), dtype=jnp.float32)
    out4 = jax.block_until_ready(maxout(x4, 5))
    ref4 = _reference(x4, 5)
    assert out4.shape == ref4.shape and jnp.allclose(out4, ref4), "mismatch (odd pool)"

    print("KERNEL_OK")
</pallas_src>

<mosaic_0001>
module attributes {stable_mosaic.version = 11 : i64} {
  func.func @_maxout_kernel(%arg0: i32, %arg1: memref<1x2048xf32, #tpu.memory_space<vmem>>, %arg2: memref<1x512xf32, #tpu.memory_space<vmem>>) attributes {dimension_semantics = [#tpu.dimension_semantics<parallel>], iteration_bounds = array<i64: 1>, scalar_prefetch = 0 : i64, scratch_operands = 0 : i64, tpu.core_type = #tpu.core_type<tc>, window_params = [{transform_indices = @transform_0, window_bounds = array<i64: 1, 2048>}, {transform_indices = @transform_1, window_bounds = array<i64: 1, 512>}]} {
    %c0 = arith.constant 0 : index
    %c0_0 = arith.constant 0 : index
    %0 = vector.load %arg1[%c0, %c0_0] : memref<1x2048xf32, #tpu.memory_space<vmem>>, vector<1x2048xf32>
    %1 = vector.shape_cast %0 : vector<1x2048xf32> to vector<1x512x4xf32>
    %cst = arith.constant dense<0xFF800000> : vector<1x512xf32>
    %2 = vector.multi_reduction <maximumf>, %1, %cst [2] : vector<1x512x4xf32> to vector<1x512xf32>
    %c0_1 = arith.constant 0 : index
    %c0_2 = arith.constant 0 : index
    %3 = vector.load %arg2[%c0_1, %c0_2] : memref<1x512xf32, #tpu.memory_space<vmem>>, vector<1x512xf32>
    tpu.vector_store %arg2[%c0_1, %c0_2], %2 {strides = array<i32>} : memref<1x512xf32, #tpu.memory_space<vmem>>, vector<1x512xf32>,
    return
  }
  func.func @transform_0(%arg0: i32) -> (i32, i32) {
    %c0_i32 = arith.constant 0 : i32
    %c0_i32_0 = arith.constant 0 : i32
    return %arg0, %c0_i32 : i32, i32
  }
  func.func @transform_1(%arg0: i32) -> (i32, i32) {
    %c0_i32 = arith.constant 0 : i32
    %c0_i32_0 = arith.constant 0 : i32
    return %arg0, %c0_i32 : i32, i32
  }
}

</mosaic_0001>

<bundles_post_ra>
// kernel: tpu_custom_call.1
= control target key start
LH: loop header
LB: loop body
LE: loop exit
PB: predicated region body
PF: predicated region fallthrough
CT: control target
= control target key end

     0   :  { %6 = vsyncpa [#allocation3], 0  ;;  %s4814_s0 = inlined_call_operand.hbm [shape: f32[1,2048], index: 0, kind: input, shape index: {}]   ;;  %s4815_s1 = inlined_call_operand.hbm [shape: f32[1,512], index: 1, kind: output, shape index: {}]  }
   0x1   :  { %7 = vsyncpa [#allocation4], 0  ;;  %s13_s8 = sshll.u32 %s4814_s0, 4  ;;  %s3067_s9 = smov [#allocation2]   ;;  %s14_s8 = int_to_ptr.hbm [resolvable:$true] %s13_s8 }
   0x2   :  { %s15_s10 = sshll.u32 %s3067_s9, 4  ;;  %s16_s10 = int_to_ptr.vmem [resolvable:$true] %s15_s10 }
   0x3   :  { %18 = dma.hbm_to_vmem [thread:$0]  %s14_s8, 256, %s16_s10, [#allocation3]  }
   0x4   :  { %3063 = dma.done.wait [#allocation3], 256  }
   0x5   :  { %3064 = vsyncadd [#allocation3], 4294967040  ;;  %v3114_v0 = vld [vmem:[#allocation2] sm:$0xff]  ;;  %s3068_s11 = smov 108   ;;  %s3069_s12 = smov 116   ;;  %v3177_v1 = vld [vmem:[#allocation2 + $0x8] sm:$0xff] }
   0x6   :  { %39 = vrot.lane.b32.xlu2 %v3114_v0, %s3068_s11  ;;  %599 = vst [vmem:[#allocation1] ss:$9 sm:$0xff] %v3114_v0  ;;  %33 = vrot.lane.b32.xlu1 %v3114_v0, %s3069_s12  ;;  %s3070_s0 = smov 124   ;;  %s3071_s13 = smov 104   ;;  %vm1246_vm0 = vcmask 31744   ;;  %v26_v37 = vrot.slane %v3114_v0, 1 }
   0x7   :  { %27 = vrot.lane.b32.xlu0 %v3114_v0, %s3070_s0  ;;  %s3072_s14 = smov 112   ;;  %s3073_s15 = smov 120   ;;  %vm2795_vm1 = vcmask 130112   ;;  %vm2799_vm2 = vcmask 195712   ;;  %vm2803_vm3 = vcmask 261312   ;;  %vm2807_vm4 = vcmask 326912  }
   0x8   :  { %s3074_s16 = smov 92   ;;  %s3075_s17 = smov 96   ;;  %vm2811_vm5 = vcmask 392512   ;;  %vm2815_vm6 = vcmask 458112   ;;  %vm2819_vm7 = vcmask 523712   ;;  %vm2823_vm8 = vcmask 589312  }
   0x9   :  { %s3076_s18 = smov 100   ;;  %s3077_s19 = smov 80   ;;  %vm2827_vm9 = vcmask 654912   ;;  %vm2831_vm10 = vcmask 720512   ;;  %vm2835_vm11 = vcmask 786112   ;;  %vm2839_vm12 = vcmask 851712  }
   0xa   :  { %s3078_s20 = smov 84   ;;  %s3079_s21 = smov 88   ;;  %vm2843_vm13 = vcmask 917312   ;;  %vm2847_vm14 = vcmask 982912   ;;  %vm2851_vm15 = vcmask 1048512  }
   0xb   :  { %s3080_s22 = smov 68   ;;  %s3081_s23 = smov 72  }
   0xc   :  { %s3082_s24 = smov 76   ;;  %s3083_s25 = smov 56  }
   0xd   :  { %s3084_s26 = smov 60   ;;  %s3085_s27 = smov 64  }
   0xe   :  { %42 = vrot.lane.b32.xlu2 %v3114_v0, %s3071_s13  ;;  %36 = vrot.lane.b32.xlu1 %v3114_v0, %s3072_s14  ;;  %s3086_s28 = smov 44   ;;  %s3087_s29 = smov 48  }
   0xf   :  { %30 = vrot.lane.b32.xlu0 %v3114_v0, %s3073_s15  ;;  %s3088_s30 = smov 52   ;;  %s3089_s2 = smov 32  }
  0x10   :  { %s3090_s3 = smov 36   ;;  %s3091_s4 = smov 40  }
  0x11   :  { %s4816_s5 = smov 20   ;;  %s3093_s6 = smov 24  }
  0x12   :  { %s3094_s7 = smov 28   ;;  %s3095_s8 = smov 8  }
  0x13   :  { %s3096_s9 = smov 12   ;;  %s3097_s10 = smov 16  }
  0x16   :  { %51 = vrot.lane.b32.xlu2 %v3114_v0, %s3074_s16  ;;  %48 = vrot.lane.b32.xlu1 %v3114_v0, %s3075_s17 }
  0x17   :  { %45 = vrot.lane.b32.xlu0 %v3114_v0, %s3076_s18 }
  0x1e   :  { %60 = vrot.lane.b32.xlu2 %v3114_v0, %s3077_s19  ;;  %57 = vrot.lane.b32.xlu1 %v3114_v0, %s3078_s20 }
  0x1f   :  { %54 = vrot.lane.b32.xlu0 %v3114_v0, %s3079_s21 }
  0x26   :  { %69 = vrot.lane.b32.xlu2 %v3114_v0, %s3080_s22  ;;  %66 = vrot.lane.b32.xlu1 %v3114_v0, %s3081_s23 }
  0x27   :  { %63 = vrot.lane.b32.xlu0 %v3114_v0, %s3082_s24 }
  0x2e   :  { %78 = vrot.lane.b32.xlu2 %v3114_v0, %s3083_s25  ;;  %75 = vrot.lane.b32.xlu1 %v3114_v0, %s3084_s26 }
  0x2f   :  { %72 = vrot.lane.b32.xlu0 %v3114_v0, %s3085_s27 }
  0x36   :  { %87 = vrot.lane.b32.xlu2 %v3114_v0, %s3086_s28  ;;  %84 = vrot.lane.b32.xlu1 %v3114_v0, %s3087_s29 }
  0x37   :  { %81 = vrot.lane.b32.xlu0 %v3114_v0, %s3088_s30 }
  0x3e   :  { %96 = vrot.lane.b32.xlu2 %v3114_v0, %s3089_s2  ;;  %93 = vrot.lane.b32.xlu1 %v3114_v0, %s3090_s3 }
  0x3f   :  { %90 = vrot.lane.b32.xlu0 %v3114_v0, %s3091_s4 }
  0x46   :  { %105 = vrot.lane.b32.xlu2 %v3114_v0, %s4816_s5  ;;  %102 = vrot.lane.b32.xlu1 %v3114_v0, %s3093_s6  ;;  %s3098_s5 = smov 4  }
  0x47   :  { %99 = vrot.lane.b32.xlu0 %v3114_v0, %s3094_s7 }
  0x4e   :  { %114 = vrot.lane.b32.xlu2 %v3114_v0, %s3095_s8  ;;  %111 = vrot.lane.b32.xlu1 %v3114_v0, %s3096_s9 }
  0x4f   :  { %108 = vrot.lane.b32.xlu0 %v3114_v0, %s3097_s10 }
  0x56   :  { %317 = vrot.lane.b32.xlu2 %v3177_v1, %s3073_s15  ;;  %314 = vrot.lane.b32.xlu1 %v3177_v1, %s3070_s0  ;;  %s2968_s15 = sshll.u32 %s4815_s1, 4  ;;  %s2969_s15 = int_to_ptr.hbm [resolvable:$true] %s2968_s15 }
  0x57   :  { %117 = vrot.lane.b32.xlu0 %v3114_v0, %s3098_s5 }
  0x5e   :  { %326 = vrot.lane.b32.xlu2 %v3177_v1, %s3068_s11  ;;  %323 = vrot.lane.b32.xlu1 %v3177_v1, %s3072_s14  ;;  %s4817_s11 = smov 20  }
  0x5f   :  { %320 = vrot.lane.b32.xlu0 %v3177_v1, %s3069_s12  ;;  %s3100_s12 = smov [#allocation5]  }
  0x60   :  { %v3191_v2 = vpop.permute.xlu2 %39  ;;  %s2966_s0 = sshll.u32 %s3100_s12, 4  ;;  %s2967_s0 = int_to_ptr.vmem [resolvable:$true] %s2966_s0 }
  0x61   :  { %609 = vst [vmem:[#allocation1 + $0x5] ss:$9 sm:$0xff] %v3191_v2  ;;  %v41_v43 = vrot.slane %v3191_v2, 1 }
  0x66   :  { %335 = vrot.lane.b32.xlu2 %v3177_v1, %s3075_s17  ;;  %332 = vrot.lane.b32.xlu1 %v3177_v1, %s3076_s18 }
  0x67   :  { %329 = vrot.lane.b32.xlu0 %v3177_v1, %s3071_s13 }
  0x68   :  { %v3200_v3 = vpop.permute.xlu2 %42 }
  0x69   :  { %611 = vst [vmem:[#allocation1 + $0x6] ss:$9 sm:$0xff] %v3200_v3  ;;  %v44_v44 = vrot.slane %v3200_v3, 1 }
  0x6e   :  { %344 = vrot.lane.b32.xlu2 %v3177_v1, %s3078_s20  ;;  %341 = vrot.lane.b32.xlu1 %v3177_v1, %s3079_s21 }
  0x6f   :  { %338 = vrot.lane.b32.xlu0 %v3177_v1, %s3074_s16 }
  0x70   :  { %v3215_v4 = vpop.permute.xlu2 %51 }
  0x71   :  { %v53_v47 = vrot.slane %v3215_v4, 1 }
  0x76   :  { %353 = vrot.lane.b32.xlu2 %v3177_v1, %s3081_s23  ;;  %350 = vrot.lane.b32.xlu1 %v3177_v1, %s3082_s24 }
  0x77   :  { %347 = vrot.lane.b32.xlu0 %v3177_v1, %s3077_s19 }
  0x78   :  { %v3217_v5 = vpop.permute.xlu1 %33  ;;  %v3234_v9 = vpop.permute.xlu2 %60 }
  0x79   :  { %605 = vst [vmem:[#allocation1 + $0x3] ss:$9 sm:$0xff] %v3217_v5  ;;  %v3220_v6 = vpop.permute.xlu0 %27  ;;  %v35_v41 = vrot.slane %v3217_v5, 1  ;;  %v62_v51 = vrot.slane %v3234_v9, 1 }
  0x7a   :  { %601 = vst [vmem:[#allocation1 + $0x1] ss:$9 sm:$0xff] %v3220_v6  ;;  %v29_v38 = vrot.slane %v3220_v6, 1 }
  0x7e   :  { %362 = vrot.lane.b32.xlu2 %v3177_v1, %s3084_s26  ;;  %359 = vrot.lane.b32.xlu1 %v3177_v1, %s3085_s27 }
  0x7f   :  { %356 = vrot.lane.b32.xlu0 %v3177_v1, %s3080_s22 }
  0x80   :  { %v3229_v7 = vpop.permute.xlu1 %36  ;;  %v3248_v12 = vpop.permute.xlu2 %69 }
  0x81   :  { %607 = vst [vmem:[#allocation1 + $0x4] ss:$9 sm:$0xff] %v3229_v7  ;;  %v3232_v8 = vpop.permute.xlu0 %30  ;;  %v38_v42 = vrot.slane %v3229_v7, 1  ;;  %v71_v54 = vrot.slane %v3248_v12, 1 }
  0x82   :  { %603 = vst [vmem:[#allocation1 + $0x2] ss:$9 sm:$0xff] %v3232_v8  ;;  %v32_v40 = vrot.slane %v3232_v8, 1 }
  0x86   :  { %371 = vrot.lane.b32.xlu2 %v3177_v1, %s3087_s29  ;;  %368 = vrot.lane.b32.xlu1 %v3177_v1, %s3088_s30 }
  0x87   :  { %365 = vrot.lane.b32.xlu0 %v3177_v1, %s3083_s25 }
  0x88   :  { %v3243_v10 = vpop.permute.xlu1 %48  ;;  %v3262_v16 = vpop.permute.xlu2 %78 }
  0x89   :  { %v3245_v11 = vpop.permute.xlu0 %45  ;;  %v50_v46 = vrot.slane %v3243_v10, 1  ;;  %v80_v58 = vrot.slane %v3262_v16, 1 }
  0x8a   :  { %613 = vst [vmem:[#allocation1 + $0x7] ss:$9 sm:$0xff] %v3245_v11  ;;  %v47_v45 = vrot.slane %v3245_v11, 1 }
  0x8e   :  { %380 = vrot.lane.b32.xlu2 %v3177_v1, %s3090_s3  ;;  %377 = vrot.lane.b32.xlu1 %v3177_v1, %s3091_s4 }
  0x8f   :  { %374 = vrot.lane.b32.xlu0 %v3177_v1, %s3086_s28 }
  0x90   :  { %v3256_v13 = vpop.permute.xlu1 %57  ;;  %v3280_v19 = vpop.permute.xlu2 %87 }
  0x91   :  { %v614_v14 = vld [vmem:[#allocation1] sm:$0xff]  ;;  %v3258_v15 = vpop.permute.xlu0 %54  ;;  %v59_v50 = vrot.slane %v3256_v13, 1  ;;  %v89_v61 = vrot.slane %v3280_v19, 1 }
  0x92   :  { %615 = vst [vmem:[#allocation1] ss:$9 sm:$0xff] %v3243_v10  ;;  %v1247_v35 = vsel %vm1246_vm0, %v614_v14, -inf  ;;  %v56_v49 = vrot.slane %v3258_v15, 1 }
  0x93   :  { %616 = vst [vmem:[#allocation1 + $0x1] ss:$9 sm:$0xff] %v3215_v4 }
  0x94   :  { %619 = vst [vmem:[#allocation1 + $0x4] ss:$9 sm:$0xff] %v3234_v9 }
  0x95   :  { %618 = vst [vmem:[#allocation1 + $0x3] ss:$9 sm:$0xff] %v3256_v13 }
  0x96   :  { %617 = vst [vmem:[#allocation1 + $0x2] ss:$9 sm:$0xff] %v3258_v15  ;;  %389 = vrot.lane.b32.xlu2 %v3177_v1, %s3093_s6  ;;  %386 = vrot.lane.b32.xlu1 %v3177_v1, %s3094_s7 }
  0x97   :  { %383 = vrot.lane.b32.xlu0 %v3177_v1, %s3089_s2  ;;  %622 = vst [vmem:[#allocation1 + $0x7] ss:$9 sm:$0xff] %v3248_v12 }
  0x98   :  { %v3274_v17 = vpop.permute.xlu1 %66  ;;  %v3302_v23 = vpop.permute.xlu2 %96 }
  0x99   :  { %621 = vst [vmem:[#allocation1 + $0x6] ss:$9 sm:$0xff] %v3274_v17  ;;  %v3277_v18 = vpop.permute.xlu0 %63  ;;  %v68_v53 = vrot.slane %v3274_v17, 1  ;;  %v98_v14 = vrot.slane %v3302_v23, 1 }
  0x9a   :  { %620 = vst [vmem:[#allocation1 + $0x5] ss:$9 sm:$0xff] %v3277_v18  ;;  %v65_v52 = vrot.slane %v3277_v18, 1 }
  0x9e   :  { %398 = vrot.lane.b32.xlu2 %v3177_v1, %s3096_s9  ;;  %395 = vrot.lane.b32.xlu1 %v3177_v1, %s3097_s10 }
  0x9f   :  { %392 = vrot.lane.b32.xlu0 %v3177_v1, %s4817_s11 }
  0xa0   :  { %v3288_v20 = vpop.permute.xlu1 %75  ;;  %v3315_v28 = vpop.permute.xlu2 %105 }
  0xa1   :  { %v3290_v21 = vld [vmem:[#allocation1] sm:$0xff]  ;;  %v3292_v22 = vpop.permute.xlu0 %72  ;;  %v77_v56 = vrot.slane %v3288_v20, 1 }
  0xa2   :  { %625 = vst [vmem:[#allocation1 + $0x1] ss:$9 sm:$0xff] %v3288_v20  ;;  %v74_v55 = vrot.slane %v3292_v22, 1 }
  0xa3   :  { %624 = vst [vmem:[#allocation1] ss:$9 sm:$0xff] %v3292_v22 }
  0xa4   :  { %626 = vst [vmem:[#allocation1 + $0x2] ss:$9 sm:$0xff] %v3262_v16 }
  0xa5   :  { %629 = vst [vmem:[#allocation1 + $0x5] ss:$9 sm:$0xff] %v3280_v19 }
  0xa6   :  { %404 = vrot.lane.b32.xlu1 %v3177_v1, %s3098_s5 }
  0xa7   :  { %401 = vrot.lane.b32.xlu0 %v3177_v1, %s3095_s8 }
  0xa8   :  { %v3304_v24 = vpop.permute.xlu1 %84  ;;  %v3326_v32 = vpop.permute.xlu2 %114 }
  0xa9   :  { %628 = vst [vmem:[#allocation1 + $0x4] ss:$9 sm:$0xff] %v3304_v24  ;;  %v3307_v25 = vpop.permute.xlu0 %81  ;;  %v86_v60 = vrot.slane %v3304_v24, 1 }
  0xaa   :  { %627 = vst [vmem:[#allocation1 + $0x3] ss:$9 sm:$0xff] %v3307_v25  ;;  %v83_v59 = vrot.slane %v3307_v25, 1 }
  0xb0   :  { %v3310_v26 = vpop.permute.xlu1 %93 }
  0xb1   :  { %631 = vst [vmem:[#allocation1 + $0x7] ss:$9 sm:$0xff] %v3310_v26  ;;  %v3313_v27 = vpop.permute.xlu0 %90  ;;  %v95_v63 = vrot.slane %v3310_v26, 1 }
  0xb2   :  { %630 = vst [vmem:[#allocation1 + $0x6] ss:$9 sm:$0xff] %v3313_v27  ;;  %v92_v62 = vrot.slane %v3313_v27, 1 }
  0xb8   :  { %v3318_v29 = vpop.permute.xlu1 %102 }
  0xb9   :  { %v3320_v30 = vld [vmem:[#allocation1] sm:$0xff]  ;;  %v3322_v31 = vpop.permute.xlu0 %99 }
  0xba   :  { %633 = vst [vmem:[#allocation1] ss:$9 sm:$0xff] %v3302_v23 }
  0xbb   :  { %634 = vst [vmem:[#allocation1 + $0x1] ss:$9 sm:$0xff] %v3322_v31 }
  0xbc   :  { %636 = vst [vmem:[#allocation1 + $0x3] ss:$9 sm:$0xff] %v3315_v28 }
  0xbd   :  { %635 = vst [vmem:[#allocation1 + $0x2] ss:$9 sm:$0xff] %v3318_v29 }
  0xbe   :  { %639 = vst [vmem:[#allocation1 + $0x6] ss:$9 sm:$0xff] %v3326_v32 }
  0xc0   :  { %v3331_v33 = vpop.permute.xlu1 %111 }
  0xc1   :  { %v3333_v34 = vpop.permute.xlu0 %108  ;;  %638 = vst [vmem:[#allocation1 + $0x5] ss:$9 sm:$0xff] %v3331_v33 }
  0xc2   :  { %637 = vst [vmem:[#allocation1 + $0x4] ss:$9 sm:$0xff] %v3333_v34 }
  0xc7   :  { %1248 = vmax.xlane.f32.xlu2 %v1247_v35  ;;  %v101_v35 = vrot.slane %v3322_v31, 1 }
  0xc9   :  { %v3338_v36 = vpop.permute.xlu0 %117 }
  0xca   :  { %640 = vst [vmem:[#allocation1 + $0x7] ss:$9 sm:$0xff] %v3338_v36 }
  0xd1   :  { %v3343_v39 = vld [vmem:[#allocation1] sm:$0xff] }
  0xd2   :  { %642 = vst [vmem:[#allocation1] ss:$9 sm:$0xff] %v26_v37 }
  0xd3   :  { %643 = vst [vmem:[#allocation1 + $0x1] ss:$9 sm:$0xff] %v29_v38  ;;  %v104_v38 = vrot.slane %v3318_v29, 1 }
  0xd4   :  { %644 = vst [vmem:[#allocation1 + $0x2] ss:$9 sm:$0xff] %v32_v40  ;;  %v107_v40 = vrot.slane %v3315_v28, 1 }
  0xd5   :  { %645 = vst [vmem:[#allocation1 + $0x3] ss:$9 sm:$0xff] %v35_v41  ;;  %v110_v41 = vrot.slane %v3333_v34, 1 }
  0xd6   :  { %646 = vst [vmem:[#allocation1 + $0x4] ss:$9 sm:$0xff] %v38_v42  ;;  %v113_v42 = vrot.slane %v3331_v33, 1 }
  0xd7   :  { %647 = vst [vmem:[#allocation1 + $0x5] ss:$9 sm:$0xff] %v41_v43  ;;  %v116_v43 = vrot.slane %v3326_v32, 1 }
  0xd8   :  { %648 = vst [vmem:[#allocation1 + $0x6] ss:$9 sm:$0xff] %v44_v44  ;;  %v119_v44 = vrot.slane %v3338_v36, 1 }
  0xd9   :  { %649 = vst [vmem:[#allocation1 + $0x7] ss:$9 sm:$0xff] %v47_v45  ;;  %v120_v45 = vrot.slane %v3114_v0, 2 }
  0xe0   :  { %v3353_v48 = vld [vmem:[#allocation1] sm:$0xff] }
  0xe1   :  { %651 = vst [vmem:[#allocation1] ss:$9 sm:$0xff] %v50_v46  ;;  %v121_v46 = vrot.slane %v3220_v6, 2 }
  0xe2   :  { %652 = vst [vmem:[#allocation1 + $0x1] ss:$9 sm:$0xff] %v53_v47 }
  0xe3   :  { %653 = vst [vmem:[#allocation1 + $0x2] ss:$9 sm:$0xff] %v56_v49  ;;  %v122_v49 = vrot.slane %v3232_v8, 2 }
  0xe4   :  { %654 = vst [vmem:[#allocation1 + $0x3] ss:$9 sm:$0xff] %v59_v50  ;;  %v123_v50 = vrot.slane %v3217_v5, 2 }
  0xe5   :  { %655 = vst [vmem:[#allocation1 + $0x4] ss:$9 sm:$0xff] %v62_v51  ;;  %v124_v51 = vrot.slane %v3229_v7, 2 }
  0xe6   :  { %656 = vst [vmem:[#allocation1 + $0x5] ss:$9 sm:$0xff] %v65_v52  ;;  %v125_v52 = vrot.slane %v3191_v2, 2 }
  0xe7   :  { %657 = vst [vmem:[#allocation1 + $0x6] ss:$9 sm:$0xff] %v68_v53  ;;  %v126_v53 = vrot.slane %v3200_v3, 2 }
  0xe8   :  { %658 = vst [vmem:[#allocation1 + $0x7] ss:$9 sm:$0xff] %v71_v54  ;;  %v127_v54 = vrot.slane %v3245_v11, 2 }
  0xef   :  { %v3363_v57 = vld [vmem:[#allocation1] sm:$0xff] }
  0xf0   :  { %660 = vst [vmem:[#allocation1] ss:$9 sm:$0xff] %v74_v55  ;;  %v128_v55 = vrot.slane %v3243_v10, 2 }
  0xf1   :  { %661 = vst [vmem:[#allocation1 + $0x1] ss:$9 sm:$0xff] %v77_v56  ;;  %v129_v56 = vrot.slane %v3215_v4, 2 }
  0xf2   :  { %662 = vst [vmem:[#allocation1 + $0x2] ss:$9 sm:$0xff] %v80_v58 }
  0xf3   :  { %663 = vst [vmem:[#allocation1 + $0x3] ss:$9 sm:$0xff] %v83_v59  ;;  %v130_v59 = vrot.slane %v3258_v15, 2 }
  0xf4   :  { %664 = vst [vmem:[#allocation1 + $0x4] ss:$9 sm:$0xff] %v86_v60  ;;  %v131_v60 = vrot.slane %v3256_v13, 2 }
  0xf5   :  { %665 = vst [vmem:[#allocation1 + $0x5] ss:$9 sm:$0xff] %v89_v61  ;;  %v132_v61 = vrot.slane %v3234_v9, 2 }
  0xf6   :  { %666 = vst [vmem:[#allocation1 + $0x6] ss:$9 sm:$0xff] %v92_v62  ;;  %v133_v62 = vrot.slane %v3277_v18, 2 }
  0xf7   :  { %667 = vst [vmem:[#allocation1 + $0x7] ss:$9 sm:$0xff] %v95_v63  ;;  %v134_v63 = vrot.slane %v3274_v17, 2 }
  0xfe   :  { %v3373_v37 = vld [vmem:[#allocation1] sm:$0xff] }
  0xff   :  { %669 = vst [vmem:[#allocation1] ss:$9 sm:$0xff] %v98_v14  ;;  %v135_v14 = vrot.slane %v3248_v12, 2 }
 0x100   :  { %670 = vst [vmem:[#allocation1 + $0x1] ss:$9 sm:$0xff] %v101_v35  ;;  %v136_v35 = vrot.slane %v3292_v22, 2 }
 0x101   :  { %671 = vst [vmem:[#allocation1 + $0x2] ss:$9 sm:$0xff] %v104_v38  ;;  %v137_v38 = vrot.slane %v3288_v20, 2 }
 0x102   :  { %672 = vst [vmem:[#allocation1 + $0x3] ss:$9 sm:$0xff] %v107_v40 }
 0x103   :  { %673 = vst [vmem:[#allocation1 + $0x4] ss:$9 sm:$0xff] %v110_v41  ;;  %v138_v41 = vrot.slane %v3262_v16, 2 }
 0x104   :  { %674 = vst [vmem:[#allocation1 + $0x5] ss:$9 sm:$0xff] %v113_v42  ;;  %v139_v42 = vrot.slane %v3307_v25, 2 }
 0x105   :  { %675 = vst [vmem:[#allocation1 + $0x6] ss:$9 sm:$0xff] %v116_v43  ;;  %v140_v43 = vrot.slane %v3304_v24, 2 }
 0x106   :  { %676 = vst [vmem:[#allocation1 + $0x7] ss:$9 sm:$0xff] %v119_v44  ;;  %v141_v44 = vrot.slane %v3280_v19, 2 }
 0x10d   :  { %v3383_v47 = vld [vmem:[#allocation1] sm:$0xff] }
 0x10e   :  { %678 = vst [vmem:[#allocation1] ss:$9 sm:$0xff] %v120_v45  ;;  %v142_v45 = vrot.slane %v3313_v27, 2 }
 0x10f   :  { %679 = vst [vmem:[#allocation1 + $0x1] ss:$9 sm:$0xff] %v121_v46  ;;  %v143_v46 = vrot.slane %v3310_v26, 2 }
 0x110   :  { %680 = vst [vmem:[#allocation1 + $0x2] ss:$9 sm:$0xff] %v122_v49  ;;  %v144_v49 = vrot.slane %v3302_v23, 2 }
 0x111   :  { %681 = vst [vmem:[#allocation1 + $0x3] ss:$9 sm:$0xff] %v123_v50  ;;  %v145_v50 = vrot.slane %v3322_v31, 2 }
 0x112   :  { %682 = vst [vmem:[#allocation1 + $0x4] ss:$9 sm:$0xff] %v124_v51 }
 0x113   :  { %683 = vst [vmem:[#allocation1 + $0x5] ss:$9 sm:$0xff] %v125_v52  ;;  %v146_v52 = vrot.slane %v3318_v29, 2 }
 0x114   :  { %684 = vst [vmem:[#allocation1 + $0x6] ss:$9 sm:$0xff] %v126_v53  ;;  %v147_v53 = vrot.slane %v3315_v28, 2 }
 0x115   :  { %685 = vst [vmem:[#allocation1 + $0x7] ss:$9 sm:$0xff] %v127_v54  ;;  %v148_v54 = vrot.slane %v3333_v34, 2 }
 0x11c   :  { %v3393_v58 = vld [vmem:[#allocation1] sm:$0xff] }
 0x11d   :  { %687 = vst [vmem:[#allocation1] ss:$9 sm:$0xff] %v128_v55  ;;  %v149_v55 = vrot.slane %v3331_v33, 2 }
 0x11e   :  { %688 = vst [vmem:[#allocation1 + $0x1] ss:$9 sm:$0xff] %v129_v56  ;;  %v150_v56 = vrot.slane %v3326_v32, 2 }
 0x11f   :  { %689 = vst [vmem:[#allocation1 + $0x2] ss:$9 sm:$0xff] %v130_v59  ;;  %v151_v59 = vrot.slane %v3338_v36, 2 }
 0x120   :  { %690 = vst [vmem:[#allocation1 + $0x3] ss:$9 sm:$0xff] %v131_v60  ;;  %v152_v60 = vrot.slane %v3114_v0, 3 }
 0x121   :  { %691 = vst [vmem:[#allocation1 + $0x4] ss:$9 sm:$0xff] %v132_v61  ;;  %v1250_v61 = vsel %vm1246_vm0, %v3290_v21, -inf  ;;  %v159_v21 = vrot.slane %v3245_v11, 3 }
 0x122   :  { %692 = vst [vmem:[#allocation1 + $0x5] ss:$9 sm:$0xff] %v133_v62  ;;  %1251 = vmax.xlane.f32.xlu0 %v1250_v61  ;;  %v153_v62 = vrot.slane %v3220_v6, 3  ;;  %v170_v61 = vrot.slane %v3262_v16, 3 }
 0x123   :  { %693 = vst [vmem:[#allocation1 + $0x6] ss:$9 sm:$0xff] %v134_v63 }
 0x124   :  { %694 = vst [vmem:[#allocation1 + $0x7] ss:$9 sm:$0xff] %v135_v14  ;;  %v154_v14 = vrot.slane %v3232_v8, 3 }
 0x12b   :  { %v3403_v40 = vld [vmem:[#allocation1] sm:$0xff] }
 0x12c   :  { %696 = vst [vmem:[#allocation1] ss:$9 sm:$0xff] %v136_v35  ;;  %v155_v35 = vrot.slane %v3217_v5, 3 }
 0x12d   :  { %697 = vst [vmem:[#allocation1 + $0x1] ss:$9 sm:$0xff] %v137_v38  ;;  %v156_v38 = vrot.slane %v3229_v7, 3 }
 0x12e   :  { %698 = vst [vmem:[#allocation1 + $0x2] ss:$9 sm:$0xff] %v138_v41  ;;  %v157_v41 = vrot.slane %v3191_v2, 3 }
 0x12f   :  { %699 = vst [vmem:[#allocation1 + $0x3] ss:$9 sm:$0xff] %v139_v42  ;;  %v158_v42 = vrot.slane %v3200_v3, 3 }
 0x130   :  { %700 = vst [vmem:[#allocation1 + $0x4] ss:$9 sm:$0xff] %v140_v43  ;;  %v160_v43 = vrot.slane %v3243_v10, 3 }
 0x131   :  { %701 = vst [vmem:[#allocation1 + $0x5] ss:$9 sm:$0xff] %v141_v44  ;;  %v161_v44 = vrot.slane %v3215_v4, 3 }
 0x132   :  { %702 = vst [vmem:[#allocation1 + $0x6] ss:$9 sm:$0xff] %v142_v45 }
 0x133   :  { %703 = vst [vmem:[#allocation1 + $0x7] ss:$9 sm:$0xff] %v143_v46  ;;  %v162_v46 = vrot.slane %v3258_v15, 3 }
 0x13a   :  { %v3413_v51 = vld [vmem:[#allocation1] sm:$0xff] }
 0x13b   :  { %705 = vst [vmem:[#allocation1] ss:$9 sm:$0xff] %v144_v49  ;;  %v163_v49 = vrot.slane %v3256_v13, 3 }
 0x13c   :  { %706 = vst [vmem:[#allocation1 + $0x1] ss:$9 sm:$0xff] %v145_v50  ;;  %v164_v50 = vrot.slane %v3234_v9, 3 }
 0x13d   :  { %707 = vst [vmem:[#allocation1 + $0x2] ss:$9 sm:$0xff] %v146_v52  ;;  %v165_v52 = vrot.slane %v3277_v18, 3 }
 0x13e   :  { %708 = vst [vmem:[#allocation1 + $0x3] ss:$9 sm:$0xff] %v147_v53  ;;  %v166_v53 = vrot.slane %v3274_v17, 3 }
 0x13f   :  { %709 = vst [vmem:[#allocation1 + $0x4] ss:$9 sm:$0xff] %v148_v54  ;;  %v167_v54 = vrot.slane %v3248_v12, 3 }
 0x140   :  { %710 = vst [vmem:[#allocation1 + $0x5] ss:$9 sm:$0xff] %v149_v55  ;;  %v1253_v55 = vsel %vm1246_vm0, %v3320_v30, -inf  ;;  %v173_v30 = vrot.slane %v3280_v19, 3 }
 0x141   :  { %711 = vst [vmem:[#allocation1 + $0x6] ss:$9 sm:$0xff] %v150_v56  ;;  %1254 = vmax.xlane.f32.xlu1 %v1253_v55  ;;  %v168_v56 = vrot.slane %v3292_v22, 3  ;;  %v185_v55 = vrot.slane %v3220_v6, 4 }
 0x142   :  { %712 = vst [vmem:[#allocation1 + $0x7] ss:$9 sm:$0xff] %v151_v59  ;;  %v169_v59 = vrot.slane %v3288_v20, 3 }
 0x149   :  { %v3425_v63 = vld [vmem:[#allocation1] sm:$0xff] }
 0x14a   :  { %714 = vst [vmem:[#allocation1] ss:$9 sm:$0xff] %v152_v60 }
 0x14b   :  { %715 = vst [vmem:[#allocation1 + $0x1] ss:$9 sm:$0xff] %v153_v62  ;;  %v171_v62 = vrot.slane %v3307_v25, 3 }
 0x14c   :  { %716 = vst [vmem:[#allocation1 + $0x2] ss:$9 sm:$0xff] %v154_v14  ;;  %v172_v14 = vrot.slane %v3304_v24, 3 }
 0x14d   :  { %717 = vst [vmem:[#allocation1 + $0x3] ss:$9 sm:$0xff] %v155_v35  ;;  %v174_v35 = vrot.slane %v3313_v27, 3 }
 0x14e   :  { %718 = vst [vmem:[#allocation1 + $0x4] ss:$9 sm:$0xff] %v156_v38  ;;  %v175_v38 = vrot.slane %v3310_v26, 3 }
 0x14f   :  { %719 = vst [vmem:[#allocation1 + $0x5] ss:$9 sm:$0xff] %v157_v41  ;;  %v176_v41 = vrot.slane %v3302_v23, 3 }
 0x150   :  { %720 = vst [vmem:[#allocation1 + $0x6] ss:$9 sm:$0xff] %v158_v42  ;;  %v177_v42 = vrot.slane %v3322_v31, 3 }
 0x151   :  { %721 = vst [vmem:[#allocation1 + $0x7] ss:$9 sm:$0xff] %v159_v21 }
 0x158   :  { %v3435_v45 = vld [vmem:[#allocation1] sm:$0xff] }
 0x159   :  { %723 = vst [vmem:[#allocation1] ss:$9 sm:$0xff] %v160_v43  ;;  %v1256_v43 = vsel %vm1246_vm0, %v3343_v39, -inf  ;;  %v1259_v39 = vsel %vm1246_vm0, %v3353_v48, -inf  ;;  %v189_v48 = vrot.slane %v3191_v2, 4 }
 0x15a   :  { %724 = vst [vmem:[#allocation1 + $0x1] ss:$9 sm:$0xff] %v161_v44  ;;  %v178_v44 = vrot.slane %v3318_v29, 3  ;;  %1257 = vmax.xlane.f32.xlu2 %v1256_v43  ;;  %v194_v43 = vrot.slane %v3258_v15, 4 }
 0x15b   :  { %725 = vst [vmem:[#allocation1 + $0x2] ss:$9 sm:$0xff] %v162_v46  ;;  %v179_v46 = vrot.slane %v3315_v28, 3 }
 0x15c   :  { %726 = vst [vmem:[#allocation1 + $0x3] ss:$9 sm:$0xff] %v163_v49  ;;  %v180_v49 = vrot.slane %v3333_v34, 3 }
 0x15d   :  { %727 = vst [vmem:[#allocation1 + $0x4] ss:$9 sm:$0xff] %v164_v50  ;;  %v181_v50 = vrot.slane %v3331_v33, 3 }
 0x15e   :  { %728 = vst [vmem:[#allocation1 + $0x5] ss:$9 sm:$0xff] %v165_v52  ;;  %v182_v52 = vrot.slane %v3326_v32, 3 }
 0x15f   :  { %729 = vst [vmem:[#allocation1 + $0x6] ss:$9 sm:$0xff] %v166_v53  ;;  %v183_v53 = vrot.slane %v3338_v36, 3 }
 0x160   :  { %730 = vst [vmem:[#allocation1 + $0x7] ss:$9 sm:$0xff] %v167_v54  ;;  %v184_v54 = vrot.slane %v3114_v0, 4 }
 0x162   :  { %1260 = vmax.xlane.f32.xlu2 %v1259_v39  ;;  %v201_v39 = vrot.slane %v3288_v20, 4 }
 0x167   :  { %v3447_v60 = vld [vmem:[#allocation1] sm:$0xff] }
 0x168   :  { %732 = vst [vmem:[#allocation1] ss:$9 sm:$0xff] %v168_v56 }
 0x169   :  { %733 = vst [vmem:[#allocation1 + $0x1] ss:$9 sm:$0xff] %v169_v59  ;;  %v186_v59 = vrot.slane %v3232_v8, 4 }
 0x16a   :  { %734 = vst [vmem:[#allocation1 + $0x2] ss:$9 sm:$0xff] %v170_v61  ;;  %v1262_v61 = vsel %vm1246_vm0, %v3363_v57, -inf  ;;  %v1265_v57 = vsel %vm1246_vm0, %v3373_v37, -inf  ;;  %v198_v37 = vrot.slane %v3274_v17, 4 }
 0x16b   :  { %735 = vst [vmem:[#allocation1 + $0x3] ss:$9 sm:$0xff] %v171_v62  ;;  %v187_v62 = vrot.slane %v3217_v5, 4  ;;  %1263 = vmax.xlane.f32.xlu0 %v1262_v61  ;;  %1266 = vmax.xlane.f32.xlu1 %v1265_v57  ;;  %v204_v61 = vrot.slane %v3304_v24, 4 }
 0x16c   :  { %736 = vst [vmem:[#allocation1 + $0x4] ss:$9 sm:$0xff] %v172_v14  ;;  %v188_v14 = vrot.slane %v3229_v7, 4 }
 0x16d   :  { %737 = vst [vmem:[#allocation1 + $0x5] ss:$9 sm:$0xff] %v173_v30  ;;  %v190_v30 = vrot.slane %v3200_v3, 4 }
 0x16e   :  { %738 = vst [vmem:[#allocation1 + $0x6] ss:$9 sm:$0xff] %v174_v35  ;;  %v191_v35 = vrot.slane %v3245_v11, 4 }
 0x16f   :  { %739 = vst [vmem:[#allocation1 + $0x7] ss:$9 sm:$0xff] %v175_v38  ;;  %v192_v38 = vrot.slane %v3243_v10, 4 }
 0x176   :  { %v3457_v21 = vld [vmem:[#allocation1] sm:$0xff] }
 0x177   :  { %741 = vst [vmem:[#allocation1] ss:$9 sm:$0xff] %v176_v41  ;;  %v193_v41 = vrot.slane %v3215_v4, 4 }
 0x178   :  { %742 = vst [vmem:[#allocation1 + $0x1] ss:$9 sm:$0xff] %v177_v42 }
 0x179   :  { %743 = vst [vmem:[#allocation1 + $0x2] ss:$9 sm:$0xff] %v178_v44  ;;  %v195_v44 = vrot.slane %v3256_v13, 4 }
 0x17a   :  { %744 = vst [vmem:[#allocation1 + $0x3] ss:$9 sm:$0xff] %v179_v46  ;;  %v196_v46 = vrot.slane %v3234_v9, 4 }
 0x17b   :  { %745 = vst [vmem:[#allocation1 + $0x4] ss:$9 sm:$0xff] %v180_v49  ;;  %v197_v49 = vrot.slane %v3277_v18, 4 }
 0x17c   :  { %746 = vst [vmem:[#allocation1 + $0x5] ss:$9 sm:$0xff] %v181_v50  ;;  %v1268_v50 = vsel %vm1246_vm0, %v3383_v47, -inf  ;;  %v203_v47 = vrot.slane %v3307_v25, 4 }
 0x17d   :  { %747 = vst [vmem:[#allocation1 + $0x6] ss:$9 sm:$0xff] %v182_v52  ;;  %v199_v52 = vrot.slane %v3248_v12, 4  ;;  %1269 = vmax.xlane.f32.xlu2 %v1268_v50  ;;  %v217_v50 = vrot.slane %v3220_v6, 5 }
 0x17e   :  { %748 = vst [vmem:[#allocation1 + $0x7] ss:$9 sm:$0xff] %v183_v53  ;;  %v200_v53 = vrot.slane %v3292_v22, 4 }
 0x185   :  { %v3471_v56 = vld [vmem:[#allocation1] sm:$0xff] }
 0x186   :  { %750 = vst [vmem:[#allocation1] ss:$9 sm:$0xff] %v184_v54 }
 0x187   :  { %751 = vst [vmem:[#allocation1 + $0x1] ss:$9 sm:$0xff] %v185_v55  ;;  %v1271_v55 = vsel %vm1246_vm0, %v3393_v58, -inf  ;;  %v1274_v58 = vsel %vm1246_vm0, %v3403_v40, -inf  ;;  %v214_v40 = vrot.slane %v3326_v32, 4 }
 0x188   :  { %752 = vst [vmem:[#allocation1 + $0x2] ss:$9 sm:$0xff] %v186_v59  ;;  %v202_v59 = vrot.slane %v3262_v16, 4  ;;  %1272 = vmax.xlane.f32.xlu0 %v1271_v55  ;;  %1275 = vmax.xlane.f32.xlu1 %v1274_v58  ;;  %v1280_v55 = vsel %vm1246_vm0, %v3425_v63, -inf  ;;  %v224_v63 = vrot.slane %v3243_v10, 5  ;;  %v226_v58 = vrot.slane %v3258_v15, 5 }
 0x189   :  { %753 = vst [vmem:[#allocation1 + $0x3] ss:$9 sm:$0xff] %v187_v62  ;;  %v205_v62 = vrot.slane %v3280_v19, 4 }
 0x18a   :  { %754 = vst [vmem:[#allocation1 + $0x4] ss:$9 sm:$0xff] %v188_v14  ;;  %v206_v14 = vrot.slane %v3313_v27, 4 }
 0x18b   :  { %755 = vst [vmem:[#allocation1 + $0x5] ss:$9 sm:$0xff] %v189_v48  ;;  %v207_v48 = vrot.slane %v3310_v26, 4 }
 0x18c   :  { %756 = vst [vmem:[#allocation1 + $0x6] ss:$9 sm:$0xff] %v190_v30  ;;  %v208_v30 = vrot.slane %v3302_v23, 4 }
 0x18d   :  { %757 = vst [vmem:[#allocation1 + $0x7] ss:$9 sm:$0xff] %v191_v35  ;;  %v209_v35 = vrot.slane %v3322_v31, 4 }
 0x190   :  { %1281 = vmax.xlane.f32.xlu0 %v1280_v55  ;;  %v239_v55 = vrot.slane %v3310_v26, 5 }
 0x194   :  { %v3485_v42 = vld [vmem:[#allocation1] sm:$0xff] }
 0x195   :  { %759 = vst [vmem:[#allocation1] ss:$9 sm:$0xff] %v192_v38  ;;  %v210_v38 = vrot.slane %v3318_v29, 4 }
 0x196   :  { %760 = vst [vmem:[#allocation1 + $0x1] ss:$9 sm:$0xff] %v193_v41  ;;  %v211_v41 = vrot.slane %v3315_v28, 4 }
 0x197   :  { %761 = vst [vmem:[#allocation1 + $0x2] ss:$9 sm:$0xff] %v194_v43  ;;  %v212_v43 = vrot.slane %v3333_v34, 4 }
 0x198   :  { %762 = vst [vmem:[#allocation1 + $0x3] ss:$9 sm:$0xff] %v195_v44  ;;  %v213_v44 = vrot.slane %v3331_v33, 4 }
 0x199   :  { %763 = vst [vmem:[#allocation1 + $0x4] ss:$9 sm:$0xff] %v196_v46  ;;  %v215_v46 = vrot.slane %v3338_v36, 4 }
 0x19a   :  { %764 = vst [vmem:[#allocation1 + $0x5] ss:$9 sm:$0xff] %v197_v49  ;;  %v1277_v49 = vsel %vm1246_vm0, %v3413_v51, -inf  ;;  %v221_v51 = vrot.slane %v3191_v2, 5 }
 0x19b   :  { %765 = vst [vmem:[#allocation1 + $0x6] ss:$9 sm:$0xff] %v198_v37  ;;  %1278 = vmax.xlane.f32.xlu2 %v1277_v49  ;;  %v216_v37 = vrot.slane %v3114_v0, 5  ;;  %v234_v49 = vrot.slane %v3262_v16, 5 }
 0x19c   :  { %766 = vst [vmem:[#allocation1 + $0x7] ss:$9 sm:$0xff] %v199_v52 }
 0x1a3   :  { %v3497_v54 = vld [vmem:[#allocation1] sm:$0xff] }
 0x1a4   :  { %768 = vst [vmem:[#allocation1] ss:$9 sm:$0xff] %v200_v53  ;;  %v218_v53 = vrot.slane %v3232_v8, 5 }
 0x1a5   :  { %769 = vst [vmem:[#allocation1 + $0x1] ss:$9 sm:$0xff] %v201_v39  ;;  %v219_v39 = vrot.slane %v3217_v5, 5 }
 0x1a6   :  { %770 = vst [vmem:[#allocation1 + $0x2] ss:$9 sm:$0xff] %v202_v59  ;;  %v220_v59 = vrot.slane %v3229_v7, 5 }
 0x1a7   :  { %771 = vst [vmem:[#allocation1 + $0x3] ss:$9 sm:$0xff] %v203_v47  ;;  %v222_v47 = vrot.slane %v3200_v3, 5 }
 0x1a8   :  { %772 = vst [vmem:[#allocation1 + $0x4] ss:$9 sm:$0xff] %v204_v61  ;;  %v223_v61 = vrot.slane %v3245_v11, 5 }
 0x1a9   :  { %773 = vst [vmem:[#allocation1 + $0x5] ss:$9 sm:$0xff] %v205_v62  ;;  %v1283_v62 = vsel %vm1246_vm0, %v3435_v45, -inf  ;;  %v230_v45 = vrot.slane %v3274_v17, 5 }
 0x1aa   :  { %774 = vst [vmem:[#allocation1 + $0x6] ss:$9 sm:$0xff] %v206_v14  ;;  %1284 = vmax.xlane.f32.xlu1 %v1283_v62  ;;  %v225_v14 = vrot.slane %v3215_v4, 5  ;;  %v243_v62 = vrot.slane %v3315_v28, 5 }
 0x1ab   :  { %775 = vst [vmem:[#allocation1 + $0x7] ss:$9 sm:$0xff] %v207_v48 }
 0x1b2   :  { %v3511_v57 = vld [vmem:[#allocation1] sm:$0xff] }
 0x1b3   :  { %777 = vst [vmem:[#allocation1] ss:$9 sm:$0xff] %v208_v30  ;;  %v227_v30 = vrot.slane %v3256_v13, 5 }
 0x1b4   :  { %778 = vst [vmem:[#allocation1 + $0x1] ss:$9 sm:$0xff] %v209_v35  ;;  %v228_v35 = vrot.slane %v3234_v9, 5 }
 0x1b5   :  { %779 = vst [vmem:[#allocation1 + $0x2] ss:$9 sm:$0xff] %v210_v38  ;;  %v229_v38 = vrot.slane %v3277_v18, 5 }
 0x1b6   :  { %780 = vst [vmem:[#allocation1 + $0x3] ss:$9 sm:$0xff] %v211_v41  ;;  %v231_v41 = vrot.slane %v3248_v12, 5 }
 0x1b7   :  { %781 = vst [vmem:[#allocation1 + $0x4] ss:$9 sm:$0xff] %v212_v43  ;;  %v1286_v43 = vsel %vm1246_vm0, %v3447_v60, -inf  ;;  %v1289_v60 = vsel %vm1246_vm0, %v3457_v21, -inf  ;;  %v242_v21 = vrot.slane %v3318_v29, 5 }
 0x1b8   :  { %782 = vst [vmem:[#allocation1 + $0x5] ss:$9 sm:$0xff] %v213_v44  ;;  %1287 = vmax.xlane.f32.xlu2 %v1286_v43  ;;  %v232_v44 = vrot.slane %v3292_v22, 5  ;;  %1290 = vmax.xlane.f32.xlu0 %v1289_v60  ;;  %v251_v43 = vrot.slane %v3217_v5, 6  ;;  %v258_v60 = vrot.slane %v3258_v15, 6 }
 0x1b9   :  { %783 = vst [vmem:[#allocation1 + $0x6] ss:$9 sm:$0xff] %v214_v40  ;;  %v233_v40 = vrot.slane %v3288_v20, 5 }
 0x1ba   :  { %784 = vst [vmem:[#allocation1 + $0x7] ss:$9 sm:$0xff] %v215_v46 }
 0x1c1   :  { %v3523_v52 = vld [vmem:[#allocation1] sm:$0xff] }
 0x1c2   :  { %786 = vst [vmem:[#allocation1] ss:$9 sm:$0xff] %v216_v37  ;;  %v235_v37 = vrot.slane %v3307_v25, 5 }
 0x1c3   :  { %787 = vst [vmem:[#allocation1 + $0x1] ss:$9 sm:$0xff] %v217_v50  ;;  %v236_v50 = vrot.slane %v3304_v24, 5 }
 0x1c4   :  { %788 = vst [vmem:[#allocation1 + $0x2] ss:$9 sm:$0xff] %v218_v53  ;;  %v237_v53 = vrot.slane %v3280_v19, 5 }
 0x1c5   :  { %789 = vst [vmem:[#allocation1 + $0x3] ss:$9 sm:$0xff] %v219_v39  ;;  %v238_v39 = vrot.slane %v3313_v27, 5 }
 0x1c6   :  { %790 = vst [vmem:[#allocation1 + $0x4] ss:$9 sm:$0xff] %v220_v59  ;;  %v240_v59 = vrot.slane %v3302_v23, 5 }
 0x1c7   :  { %791 = vst [vmem:[#allocation1 + $0x5] ss:$9 sm:$0xff] %v221_v51  ;;  %v241_v51 = vrot.slane %v3322_v31, 5 }
 0x1c8   :  { %792 = vst [vmem:[#allocation1 + $0x6] ss:$9 sm:$0xff] %v222_v47 }
 0x1c9   :  { %793 = vst [vmem:[#allocation1 + $0x7] ss:$9 sm:$0xff] %v223_v61  ;;  %v1292_v61 = vsel %vm1246_vm0, %v3471_v56, -inf  ;;  %v1295_v56 = vsel %vm1246_vm0, %v3485_v42, -inf  ;;  %v254_v42 = vrot.slane %v3200_v3, 6 }
 0x1ca   :  { %1293 = vmax.xlane.f32.xlu1 %v1292_v61  ;;  %1296 = vmax.xlane.f32.xlu2 %v1295_v56  ;;  %v263_v61 = vrot.slane %v3248_v12, 6  ;;  %v269_v56 = vrot.slane %v3280_v19, 6 }
 0x1d0   :  { %v3537_v48 = vld [vmem:[#allocation1] sm:$0xff] }
 0x1d1   :  { %795 = vst [vmem:[#allocation1] ss:$9 sm:$0xff] %v224_v63  ;;  %v244_v63 = vrot.slane %v3333_v34, 5 }
 0x1d2   :  { %796 = vst [vmem:[#allocation1 + $0x1] ss:$9 sm:$0xff] %v225_v14  ;;  %v245_v14 = vrot.slane %v3331_v33, 5 }
 0x1d3   :  { %797 = vst [vmem:[#allocation1 + $0x2] ss:$9 sm:$0xff] %v226_v58  ;;  %v246_v58 = vrot.slane %v3326_v32, 5 }
 0x1d4   :  { %798 = vst [vmem:[#allocation1 + $0x3] ss:$9 sm:$0xff] %v227_v30  ;;  %v247_v30 = vrot.slane %v3338_v36, 5 }
 0x1d5   :  { %799 = vst [vmem:[#allocation1 + $0x4] ss:$9 sm:$0xff] %v228_v35  ;;  %v248_v35 = vrot.slane %v3114_v0, 6 }
 0x1d6   :  { %800 = vst [vmem:[#allocation1 + $0x5] ss:$9 sm:$0xff] %v229_v38  ;;  %v249_v38 = vrot.slane %v3220_v6, 6 }
 0x1d7   :  { %801 = vst [vmem:[#allocation1 + $0x6] ss:$9 sm:$0xff] %v230_v45 }
 0x1d8   :  { %802 = vst [vmem:[#allocation1 + $0x7] ss:$9 sm:$0xff] %v231_v41  ;;  %v250_v41 = vrot.slane %v3232_v8, 6 }
 0x1df   :  { %v3549_v46 = vld [vmem:[#allocation1] sm:$0xff] }
 0x1e0   :  { %804 = vst [vmem:[#allocation1] ss:$9 sm:$0xff] %v232_v44  ;;  %v252_v44 = vrot.slane %v3229_v7, 6 }
 0x1e1   :  { %805 = vst [vmem:[#allocation1 + $0x1] ss:$9 sm:$0xff] %v233_v40  ;;  %v253_v40 = vrot.slane %v3191_v2, 6 }
 0x1e2   :  { %806 = vst [vmem:[#allocation1 + $0x2] ss:$9 sm:$0xff] %v234_v49  ;;  %v255_v49 = vrot.slane %v3245_v11, 6 }
 0x1e3   :  { %807 = vst [vmem:[#allocation1 + $0x3] ss:$9 sm:$0xff] %v235_v37  ;;  %v256_v37 = vrot.slane %v3243_v10, 6 }
 0x1e4   :  { %808 = vst [vmem:[#allocation1 + $0x4] ss:$9 sm:$0xff] %v236_v50  ;;  %v257_v50 = vrot.slane %v3215_v4, 6 }
 0x1e5   :  { %809 = vst [vmem:[#allocation1 + $0x5] ss:$9 sm:$0xff] %v237_v53 }
 0x1e6   :  { %810 = vst [vmem:[#allocation1 + $0x6] ss:$9 sm:$0xff] %v238_v39  ;;  %v259_v39 = vrot.slane %v3256_v13, 6 }
 0x1e7   :  { %811 = vst [vmem:[#allocation1 + $0x7] ss:$9 sm:$0xff] %v239_v55  ;;  %v260_v55 = vrot.slane %v3234_v9, 6 }
 0x1ee   :  { %v3561_v47 = vld [vmem:[#allocation1] sm:$0xff] }
 0x1ef   :  { %813 = vst [vmem:[#allocation1] ss:$9 sm:$0xff] %v240_v59  ;;  %v261_v59 = vrot.slane %v3277_v18, 6 }
 0x1f0   :  { %814 = vst [vmem:[#allocation1 + $0x1] ss:$9 sm:$0xff] %v241_v51  ;;  %v262_v51 = vrot.slane %v3274_v17, 6 }
 0x1f1   :  { %815 = vst [vmem:[#allocation1 + $0x2] ss:$9 sm:$0xff] %v242_v21  ;;  %v264_v21 = vrot.slane %v3292_v22, 6 }
 0x1f2   :  { %816 = vst [vmem:[#allocation1 + $0x3] ss:$9 sm:$0xff] %v243_v62  ;;  %v265_v62 = vrot.slane %v3288_v20, 6 }
 0x1f3   :  { %817 = vst [vmem:[#allocation1 + $0x4] ss:$9 sm:$0xff] %v244_v63 }
 0x1f4   :  { %818 = vst [vmem:[#allocation1 + $0x5] ss:$9 sm:$0xff] %v245_v14  ;;  %v266_v14 = vrot.slane %v3262_v16, 6 }
 0x1f5   :  { %819 = vst [vmem:[#allocation1 + $0x6] ss:$9 sm:$0xff] %v246_v58  ;;  %v267_v58 = vrot.slane %v3307_v25, 6 }
 0x1f6   :  { %820 = vst [vmem:[#allocation1 + $0x7] ss:$9 sm:$0xff] %v247_v30  ;;  %v268_v30 = vrot.slane %v3304_v24, 6 }
 0x1fd   :  { %v3575_v45 = vld [vmem:[#allocation1] sm:$0xff] }
 0x1fe   :  { %822 = vst [vmem:[#allocation1] ss:$9 sm:$0xff] %v248_v35  ;;  %v270_v35 = vrot.slane %v3313_v27, 6 }
 0x1ff   :  { %823 = vst [vmem:[#allocation1 + $0x1] ss:$9 sm:$0xff] %v249_v38  ;;  %v271_v38 = vrot.slane %v3310_v26, 6 }
 0x200   :  { %824 = vst [vmem:[#allocation1 + $0x2] ss:$9 sm:$0xff] %v250_v41  ;;  %v272_v41 = vrot.slane %v3302_v23, 6 }
 0x201   :  { %825 = vst [vmem:[#allocation1 + $0x3] ss:$9 sm:$0xff] %v251_v43  ;;  %v273_v43 = vrot.slane %v3322_v31, 6 }
 0x202   :  { %826 = vst [vmem:[#allocation1 + $0x4] ss:$9 sm:$0xff] %v252_v44 }
 0x203   :  { %827 = vst [vmem:[#allocation1 + $0x5] ss:$9 sm:$0xff] %v253_v40  ;;  %v274_v40 = vrot.slane %v3318_v29, 6 }
 0x204   :  { %828 = vst [vmem:[#allocation1 + $0x6] ss:$9 sm:$0xff] %v254_v42  ;;  %v275_v42 = vrot.slane %v3315_v28, 6 }
 0x205   :  { %829 = vst [vmem:[#allocation1 + $0x7] ss:$9 sm:$0xff] %v255_v49  ;;  %v276_v49 = vrot.slane %v3333_v34, 6 }
 0x20c   :  { %v3585_v53 = vld [vmem:[#allocation1] sm:$0xff] }
 0x20d   :  { %831 = vst [vmem:[#allocation1] ss:$9 sm:$0xff] %v256_v37  ;;  %v277_v37 = vrot.slane %v3331_v33, 6 }
 0x20e   :  { %832 = vst [vmem:[#allocation1 + $0x1] ss:$9 sm:$0xff] %v257_v50  ;;  %v278_v50 = vrot.slane %v3326_v32, 6 }
 0x20f   :  { %833 = vst [vmem:[#allocation1 + $0x2] ss:$9 sm:$0xff] %v258_v60  ;;  %v279_v60 = vrot.slane %v3338_v36, 6 }
 0x210   :  { %834 = vst [vmem:[#allocation1 + $0x3] ss:$9 sm:$0xff] %v259_v39  ;;  %v280_v39 = vrot.slane %v3114_v0, 7  ;;  %v287_v0 = vrot.slane %v3245_v11, 7  ;;  %v3632_v11 = vpop.permute.xlu2 %317 }
 0x211   :  { %835 = vst [vmem:[#allocation1 + $0x4] ss:$9 sm:$0xff] %v260_v55  ;;  %v281_v55 = vrot.slane %v3220_v6, 7  ;;  %v3623_v6 = vpop.permute.xlu1 %314 }
 0x212   :  { %836 = vst [vmem:[#allocation1 + $0x5] ss:$9 sm:$0xff] %v261_v59 }
 0x213   :  { %837 = vst [vmem:[#allocation1 + $0x6] ss:$9 sm:$0xff] %v262_v51  ;;  %v282_v51 = vrot.slane %v3232_v8, 7  ;;  %v288_v8 = vrot.slane %v3243_v10, 7  ;;  %v294_v10 = vrot.slane %v3274_v17, 7  ;;  %v298_v17 = vrot.slane %v3262_v16, 7 }
 0x214   :  { %838 = vst [vmem:[#allocation1 + $0x7] ss:$9 sm:$0xff] %v263_v61  ;;  %v283_v61 = vrot.slane %v3217_v5, 7  ;;  %v289_v5 = vrot.slane %v3215_v4, 7  ;;  %v295_v4 = vrot.slane %v3248_v12, 7  ;;  %v299_v12 = vrot.slane %v3307_v25, 7 }
 0x21b   :  { %v3595_v63 = vld [vmem:[#allocation1] sm:$0xff] }
 0x21c   :  { %840 = vst [vmem:[#allocation1] ss:$9 sm:$0xff] %v264_v21  ;;  %v284_v21 = vrot.slane %v3229_v7, 7  ;;  %v290_v7 = vrot.slane %v3258_v15, 7  ;;  %v3639_v15 = vpop.permute.xlu0 %320 }
 0x21d   :  { %841 = vst [vmem:[#allocation1 + $0x1] ss:$9 sm:$0xff] %v265_v62  ;;  %v285_v62 = vrot.slane %v3191_v2, 7  ;;  %v291_v2 = vrot.slane %v3256_v13, 7  ;;  %v3641_v13 = vpop.permute.xlu2 %326 }
 0x21e   :  { %842 = vst [vmem:[#allocation1 + $0x2] ss:$9 sm:$0xff] %v266_v14  ;;  %v286_v14 = vrot.slane %v3200_v3, 7  ;;  %v292_v3 = vrot.slane %v3234_v9, 7  ;;  %v296_v9 = vrot.slane %v3292_v22, 7  ;;  %v303_v22 = vrot.slane %v3310_v26, 7 }
 0x21f   :  { %843 = vst [vmem:[#allocation1 + $0x3] ss:$9 sm:$0xff] %v267_v58  ;;  %v307_v26 = vrot.slane %v3315_v28, 7 }
 0x220   :  { %844 = vst [vmem:[#allocation1 + $0x4] ss:$9 sm:$0xff] %v268_v30  ;;  %v293_v30 = vrot.slane %v3277_v18, 7 }
 0x221   :  { %845 = vst [vmem:[#allocation1 + $0x5] ss:$9 sm:$0xff] %v269_v56  ;;  %v3637_v56 = vpop.permute.xlu1 %323 }
 0x222   :  { %846 = vst [vmem:[#allocation1 + $0x6] ss:$9 sm:$0xff] %v270_v35  ;;  %v297_v35 = vrot.slane %v3288_v20, 7  ;;  %v302_v20 = vrot.slane %v3313_v27, 7  ;;  %v306_v27 = vrot.slane %v3318_v29, 7 }
 0x223   :  { %847 = vst [vmem:[#allocation1 + $0x7] ss:$9 sm:$0xff] %v271_v38 }
 0x225   :  { %v3657_v16 = vpop.permute.xlu2 %335 }
 0x229   :  { %v3648_v38 = vpop.permute.xlu1 %332 }
 0x22a   :  { %v3605_v44 = vld [vmem:[#allocation1] sm:$0xff] }
 0x22b   :  { %849 = vst [vmem:[#allocation1] ss:$9 sm:$0xff] %v272_v41  ;;  %v3651_v41 = vpop.permute.xlu0 %329 }
 0x22c   :  { %850 = vst [vmem:[#allocation1 + $0x1] ss:$9 sm:$0xff] %v273_v43  ;;  %v300_v43 = vrot.slane %v3304_v24, 7  ;;  %v304_v24 = vrot.slane %v3302_v23, 7  ;;  %v310_v23 = vrot.slane %v3326_v32, 7 }
 0x22d   :  { %851 = vst [vmem:[#allocation1 + $0x2] ss:$9 sm:$0xff] %v274_v40  ;;  %v301_v40 = vrot.slane %v3280_v19, 7 }
 0x22e   :  { %852 = vst [vmem:[#allocation1 + $0x3] ss:$9 sm:$0xff] %v275_v42 }
 0x22f   :  { %853 = vst [vmem:[#allocation1 + $0x4] ss:$9 sm:$0xff] %v276_v49  ;;  %v305_v49 = vrot.slane %v3322_v31, 7  ;;  %v311_v31 = vrot.slane %v3338_v36, 7 }
 0x230   :  { %854 = vst [vmem:[#allocation1 + $0x5] ss:$9 sm:$0xff] %v277_v37  ;;  %v308_v37 = vrot.slane %v3333_v34, 7 }
 0x231   :  { %855 = vst [vmem:[#allocation1 + $0x6] ss:$9 sm:$0xff] %v278_v50  ;;  %v3659_v25 = vpop.permute.xlu1 %341  ;;  %v3670_v50 = vpop.permute.xlu2 %344 }
 0x232   :  { %856 = vst [vmem:[#allocation1 + $0x7] ss:$9 sm:$0xff] %v279_v60  ;;  %v309_v60 = vrot.slane %v3331_v33, 7 }
 0x233   :  { %v3661_v42 = vpop.permute.xlu0 %338 }
 0x239   :  { %v3615_v59 = vld [vmem:[#allocation1] sm:$0xff]  ;;  %v3679_v28 = vpop.permute.xlu2 %353 }
 0x23a   :  { %858 = vst [vmem:[#allocation1] ss:$9 sm:$0xff] %v280_v39  ;;  %v3675_v39 = vpop.permute.xlu1 %350 }
 0x23b   :  { %859 = vst [vmem:[#allocation1 + $0x1] ss:$9 sm:$0xff] %v281_v55  ;;  %v3677_v29 = vpop.permute.xlu0 %347 }
 0x23c   :  { %860 = vst [vmem:[#allocation1 + $0x2] ss:$9 sm:$0xff] %v282_v51 }
 0x23d   :  { %861 = vst [vmem:[#allocation1 + $0x3] ss:$9 sm:$0xff] %v283_v61 }
 0x23e   :  { %862 = vst [vmem:[#allocation1 + $0x4] ss:$9 sm:$0xff] %v284_v21 }
 0x23f   :  { %863 = vst [vmem:[#allocation1 + $0x5] ss:$9 sm:$0xff] %v285_v62 }
 0x240   :  { %864 = vst [vmem:[#allocation1 + $0x6] ss:$9 sm:$0xff] %v286_v14 }
 0x241   :  { %865 = vst [vmem:[#allocation1 + $0x7] ss:$9 sm:$0xff] %v287_v0  ;;  %v3695_v36 = vpop.permute.xlu2 %362 }
 0x242   :  { %v3684_v33 = vpop.permute.xlu1 %359 }
 0x243   :  { %v3687_v32 = vpop.permute.xlu0 %356 }
 0x248   :  { %v3627_v58 = vld [vmem:[#allocation1] sm:$0xff] }
 0x249   :  { %867 = vst [vmem:[#allocation1] ss:$9 sm:$0xff] %v288_v8  ;;  %v3706_v21 = vpop.permute.xlu2 %371 }
 0x24a   :  { %868 = vst [vmem:[#allocation1 + $0x1] ss:$9 sm:$0xff] %v289_v5  ;;  %v3697_v55 = vpop.permute.xlu1 %368 }
 0x24b   :  { %869 = vst [vmem:[#allocation1 + $0x2] ss:$9 sm:$0xff] %v290_v7  ;;  %v3699_v51 = vpop.permute.xlu0 %365 }
 0x24c   :  { %870 = vst [vmem:[#allocation1 + $0x3] ss:$9 sm:$0xff] %v291_v2 }
 0x24d   :  { %871 = vst [vmem:[#allocation1 + $0x4] ss:$9 sm:$0xff] %v292_v3 }
 0x24e   :  { %872 = vst [vmem:[#allocation1 + $0x5] ss:$9 sm:$0xff] %v293_v30 }
 0x24f   :  { %873 = vst [vmem:[#allocation1 + $0x6] ss:$9 sm:$0xff] %v294_v10 }
 0x250   :  { %874 = vst [vmem:[#allocation1 + $0x7] ss:$9 sm:$0xff] %v295_v4 }
 0x251   :  { %v3717_v0 = vpop.permute.xlu2 %380 }
 0x252   :  { %v3711_v62 = vpop.permute.xlu1 %377 }
 0x253   :  { %v3714_v14 = vpop.permute.xlu0 %374 }
 0x257   :  { %v3645_v18 = vld [vmem:[#allocation1] sm:$0xff] }
 0x258   :  { %876 = vst [vmem:[#allocation1] ss:$9 sm:$0xff] %v296_v9 }
 0x259   :  { %877 = vst [vmem:[#allocation1 + $0x1] ss:$9 sm:$0xff] %v297_v35  ;;  %v3733_v2 = vpop.permute.xlu2 %389 }
 0x25a   :  { %878 = vst [vmem:[#allocation1 + $0x2] ss:$9 sm:$0xff] %v298_v17  ;;  %v3722_v5 = vpop.permute.xlu1 %386  ;;  %v313_v17 = vrot.slane %v3177_v1, 1 }
 0x25b   :  { %879 = vst [vmem:[#allocation1 + $0x3] ss:$9 sm:$0xff] %v299_v12  ;;  %v3725_v7 = vpop.permute.xlu0 %383  ;;  %v316_v12 = vrot.slane %v3623_v6, 1 }
 0x25c   :  { %880 = vst [vmem:[#allocation1 + $0x4] ss:$9 sm:$0xff] %v300_v43 }
 0x25d   :  { %881 = vst [vmem:[#allocation1 + $0x5] ss:$9 sm:$0xff] %v301_v40  ;;  %v319_v40 = vrot.slane %v3632_v11, 1 }
 0x25e   :  { %882 = vst [vmem:[#allocation1 + $0x6] ss:$9 sm:$0xff] %v302_v20  ;;  %v322_v20 = vrot.slane %v3639_v15, 1 }
 0x25f   :  { %883 = vst [vmem:[#allocation1 + $0x7] ss:$9 sm:$0xff] %v303_v22  ;;  %v325_v22 = vrot.slane %v3637_v56, 1 }
 0x261   :  { %v3744_v4 = vpop.permute.xlu2 %398 }
 0x262   :  { %v3735_v3 = vpop.permute.xlu1 %395 }
 0x263   :  { %v3737_v30 = vpop.permute.xlu0 %392 }
 0x266   :  { %v3665_v19 = vld [vmem:[#allocation1] sm:$0xff] }
 0x267   :  { %885 = vst [vmem:[#allocation1] ss:$9 sm:$0xff] %v304_v24  ;;  %v328_v24 = vrot.slane %v3641_v13, 1 }
 0x268   :  { %886 = vst [vmem:[#allocation1 + $0x1] ss:$9 sm:$0xff] %v305_v49  ;;  %v331_v49 = vrot.slane %v3651_v41, 1 }
 0x269   :  { %887 = vst [vmem:[#allocation1 + $0x2] ss:$9 sm:$0xff] %v306_v27  ;;  %v334_v27 = vrot.slane %v3648_v38, 1 }
 0x26a   :  { %888 = vst [vmem:[#allocation1 + $0x3] ss:$9 sm:$0xff] %v307_v26  ;;  %v3749_v9 = vpop.permute.xlu1 %404  ;;  %v337_v26 = vrot.slane %v3657_v16, 1 }
 0x26b   :  { %889 = vst [vmem:[#allocation1 + $0x4] ss:$9 sm:$0xff] %v308_v37  ;;  %v3752_v35 = vpop.permute.xlu0 %401  ;;  %v340_v37 = vrot.slane %v3661_v42, 1 }
 0x26c   :  { %890 = vst [vmem:[#allocation1 + $0x5] ss:$9 sm:$0xff] %v309_v60 }
 0x26d   :  { %891 = vst [vmem:[#allocation1 + $0x6] ss:$9 sm:$0xff] %v310_v23  ;;  %v343_v23 = vrot.slane %v3659_v25, 1 }
 0x26e   :  { %892 = vst [vmem:[#allocation1 + $0x7] ss:$9 sm:$0xff] %v311_v31  ;;  %v346_v31 = vrot.slane %v3670_v50, 1 }
 0x275   :  { %v3681_v34 = vld [vmem:[#allocation1] sm:$0xff] }
 0x276   :  { %894 = vst [vmem:[#allocation1] ss:$9 sm:$0xff] %v3177_v1 }
 0x277   :  { %896 = vst [vmem:[#allocation1 + $0x2] ss:$9 sm:$0xff] %v3632_v11 }
 0x278   :  { %895 = vst [vmem:[#allocation1 + $0x1] ss:$9 sm:$0xff] %v3623_v6 }
 0x279   :  { %899 = vst [vmem:[#allocation1 + $0x5] ss:$9 sm:$0xff] %v3641_v13 }
 0x27a   :  { %898 = vst [vmem:[#allocation1 + $0x4] ss:$9 sm:$0xff] %v3637_v56 }
 0x27b   :  { %897 = vst [vmem:[#allocation1 + $0x3] ss:$9 sm:$0xff] %v3639_v15 }
 0x27c   :  { %901 = vst [vmem:[#allocation1 + $0x7] ss:$9 sm:$0xff] %v3648_v38 }
 0x27d   :  { %900 = vst [vmem:[#allocation1 + $0x6] ss:$9 sm:$0xff] %v3651_v41 }
 0x284   :  { %v3701_v61 = vld [vmem:[#allocation1] sm:$0xff] }
 0x285   :  { %903 = vst [vmem:[#allocation1] ss:$9 sm:$0xff] %v3657_v16 }
 0x286   :  { %906 = vst [vmem:[#allocation1 + $0x3] ss:$9 sm:$0xff] %v3670_v50 }
 0x287   :  { %905 = vst [vmem:[#allocation1 + $0x2] ss:$9 sm:$0xff] %v3659_v25 }
 0x288   :  { %904 = vst [vmem:[#allocation1 + $0x1] ss:$9 sm:$0xff] %v3661_v42 }
 0x289   :  { %909 = vst [vmem:[#allocation1 + $0x6] ss:$9 sm:$0xff] %v3679_v28 }
 0x28a   :  { %908 = vst [vmem:[#allocation1 + $0x5] ss:$9 sm:$0xff] %v3675_v39 }
 0x28b   :  { %907 = vst [vmem:[#allocation1 + $0x4] ss:$9 sm:$0xff] %v3677_v29 }
 0x28c   :  { %910 = vst [vmem:[#allocation1 + $0x7] ss:$9 sm:$0xff] %v3687_v32 }
 0x293   :  { %v3719_v8 = vld [vmem:[#allocation1] sm:$0xff] }
 0x294   :  { %912 = vst [vmem:[#allocation1] ss:$9 sm:$0xff] %v3684_v33 }
 0x295   :  { %913 = vst [vmem:[#allocation1 + $0x1] ss:$9 sm:$0xff] %v3695_v36 }
 0x296   :  { %916 = vst [vmem:[#allocation1 + $0x4] ss:$9 sm:$0xff] %v3706_v21 }
 0x297   :  { %915 = vst [vmem:[#allocation1 + $0x3] ss:$9 sm:$0xff] %v3697_v55 }
 0x298   :  { %914 = vst [vmem:[#allocation1 + $0x2] ss:$9 sm:$0xff] %v3699_v51 }
 0x299   :  { %919 = vst [vmem:[#allocation1 + $0x7] ss:$9 sm:$0xff] %v3717_v0 }
 0x29a   :  { %918 = vst [vmem:[#allocation1 + $0x6] ss:$9 sm:$0xff] %v3711_v62 }
 0x29b   :  { %917 = vst [vmem:[#allocation1 + $0x5] ss:$9 sm:$0xff] %v3714_v14 }
 0x2a2   :  { %v3739_v10 = vld [vmem:[#allocation1] sm:$0xff] }
 0x2a3   :  { %923 = vst [vmem:[#allocation1 + $0x2] ss:$9 sm:$0xff] %v3733_v2 }
 0x2a4   :  { %922 = vst [vmem:[#allocation1 + $0x1] ss:$9 sm:$0xff] %v3722_v5 }
 0x2a5   :  { %921 = vst [vmem:[#allocation1] ss:$9 sm:$0xff] %v3725_v7 }
 0x2a6   :  { %926 = vst [vmem:[#allocation1 + $0x5] ss:$9 sm:$0xff] %v3744_v4 }
 0x2a7   :  { %925 = vst [vmem:[#allocation1 + $0x4] ss:$9 sm:$0xff] %v3735_v3 }
 0x2a8   :  { %924 = vst [vmem:[#allocation1 + $0x3] ss:$9 sm:$0xff] %v3737_v30 }
 0x2a9   :  { %928 = vst [vmem:[#allocation1 + $0x7] ss:$9 sm:$0xff] %v3749_v9 }
 0x2aa   :  { %927 = vst [vmem:[#allocation1 + $0x6] ss:$9 sm:$0xff] %v3752_v35 }
 0x2b1   :  { %v3757_v43 = vld [vmem:[#allocation1] sm:$0xff] }
 0x2b2   :  { %930 = vst [vmem:[#allocation1] ss:$9 sm:$0xff] %v313_v17  ;;  %v349_v17 = vrot.slane %v3677_v29, 1 }
 0x2b3   :  { %931 = vst [vmem:[#allocation1 + $0x1] ss:$9 sm:$0xff] %v316_v12  ;;  %v352_v12 = vrot.slane %v3675_v39, 1 }
 0x2b4   :  { %932 = vst [vmem:[#allocation1 + $0x2] ss:$9 sm:$0xff] %v319_v40  ;;  %v355_v40 = vrot.slane %v3679_v28, 1 }
 0x2b5   :  { %933 = vst [vmem:[#allocation1 + $0x3] ss:$9 sm:$0xff] %v322_v20  ;;  %v358_v20 = vrot.slane %v3687_v32, 1 }
 0x2b6   :  { %934 = vst [vmem:[#allocation1 + $0x4] ss:$9 sm:$0xff] %v325_v22  ;;  %v1298_v22 = vsel %vm1246_vm0, %v3497_v54, -inf  ;;  %v379_v54 = vrot.slane %v3711_v62, 1 }
 0x2b7   :  { %935 = vst [vmem:[#allocation1 + $0x5] ss:$9 sm:$0xff] %v328_v24  ;;  %v361_v24 = vrot.slane %v3684_v33, 1  ;;  %1299 = vmax.xlane.f32.xlu0 %v1298_v22  ;;  %v391_v22 = vrot.slane %v3733_v2, 1 }
 0x2b8   :  { %936 = vst [vmem:[#allocation1 + $0x6] ss:$9 sm:$0xff] %v331_v49  ;;  %v364_v49 = vrot.slane %v3695_v36, 1 }
 0x2b9   :  { %937 = vst [vmem:[#allocation1 + $0x7] ss:$9 sm:$0xff] %v334_v27 }
 0x2c0   :  { %v3767_v60 = vld [vmem:[#allocation1] sm:$0xff] }
 0x2c1   :  { %939 = vst [vmem:[#allocation1] ss:$9 sm:$0xff] %v337_v26  ;;  %v367_v26 = vrot.slane %v3699_v51, 1 }
 0x2c2   :  { %940 = vst [vmem:[#allocation1 + $0x1] ss:$9 sm:$0xff] %v340_v37  ;;  %v370_v37 = vrot.slane %v3697_v55, 1 }
 0x2c3   :  { %941 = vst [vmem:[#allocation1 + $0x2] ss:$9 sm:$0xff] %v343_v23  ;;  %v373_v23 = vrot.slane %v3706_v21, 1 }
 0x2c4   :  { %942 = vst [vmem:[#allocation1 + $0x3] ss:$9 sm:$0xff] %v346_v31  ;;  %v376_v31 = vrot.slane %v3714_v14, 1 }
 0x2c5   :  { %943 = vst [vmem:[#allocation1 + $0x4] ss:$9 sm:$0xff] %v349_v17  ;;  %v382_v17 = vrot.slane %v3717_v0, 1 }
 0x2c6   :  { %944 = vst [vmem:[#allocation1 + $0x5] ss:$9 sm:$0xff] %v352_v12  ;;  %v385_v12 = vrot.slane %v3725_v7, 1 }
 0x2c7   :  { %945 = vst [vmem:[#allocation1 + $0x6] ss:$9 sm:$0xff] %v355_v40  ;;  %v388_v40 = vrot.slane %v3722_v5, 1 }
 0x2c8   :  { %946 = vst [vmem:[#allocation1 + $0x7] ss:$9 sm:$0xff] %v358_v20 }
 0x2cf   :  { %v3779_v27 = vld [vmem:[#allocation1] sm:$0xff] }
 0x2d0   :  { %948 = vst [vmem:[#allocation1] ss:$9 sm:$0xff] %v361_v24  ;;  %v394_v24 = vrot.slane %v3737_v30, 1 }
 0x2d1   :  { %949 = vst [vmem:[#allocation1 + $0x1] ss:$9 sm:$0xff] %v364_v49  ;;  %v397_v49 = vrot.slane %v3735_v3, 1 }
 0x2d2   :  { %950 = vst [vmem:[#allocation1 + $0x2] ss:$9 sm:$0xff] %v367_v26  ;;  %v400_v26 = vrot.slane %v3744_v4, 1 }
 0x2d3   :  { %951 = vst [vmem:[#allocation1 + $0x3] ss:$9 sm:$0xff] %v370_v37  ;;  %v403_v37 = vrot.slane %v3752_v35, 1 }
 0x2d4   :  { %952 = vst [vmem:[#allocation1 + $0x4] ss:$9 sm:$0xff] %v373_v23  ;;  %v406_v23 = vrot.slane %v3749_v9, 1 }
 0x2d5   :  { %953 = vst [vmem:[#allocation1 + $0x5] ss:$9 sm:$0xff] %v376_v31  ;;  %v407_v31 = vrot.slane %v3177_v1, 2 }
 0x2d6   :  { %954 = vst [vmem:[#allocation1 + $0x6] ss:$9 sm:$0xff] %v379_v54  ;;  %v1301_v54 = vsel %vm1246_vm0, %v3511_v57, -inf  ;;  %v414_v57 = vrot.slane %v3648_v38, 2 }
 0x2d7   :  { %955 = vst [vmem:[#allocation1 + $0x7] ss:$9 sm:$0xff] %v382_v17  ;;  %1302 = vmax.xlane.f32.xlu1 %v1301_v54  ;;  %v408_v17 = vrot.slane %v3623_v6, 2 }
 0x2de   :  { %v3789_v20 = vld [vmem:[#allocation1] sm:$0xff] }
 0x2df   :  { %957 = vst [vmem:[#allocation1] ss:$9 sm:$0xff] %v385_v12 }
 0x2e0   :  { %958 = vst [vmem:[#allocation1 + $0x1] ss:$9 sm:$0xff] %v388_v40  ;;  %v409_v40 = vrot.slane %v3632_v11, 2 }
 0x2e1   :  { %959 = vst [vmem:[#allocation1 + $0x2] ss:$9 sm:$0xff] %v391_v22  ;;  %v410_v22 = vrot.slane %v3639_v15, 2 }
 0x2e2   :  { %960 = vst [vmem:[#allocation1 + $0x3] ss:$9 sm:$0xff] %v394_v24  ;;  %v411_v24 = vrot.slane %v3637_v56, 2 }
 0x2e3   :  { %961 = vst [vmem:[#allocation1 + $0x4] ss:$9 sm:$0xff] %v397_v49  ;;  %v412_v49 = vrot.slane %v3641_v13, 2 }
 0x2e4   :  { %962 = vst [vmem:[#allocation1 + $0x5] ss:$9 sm:$0xff] %v400_v26  ;;  %v413_v26 = vrot.slane %v3651_v41, 2 }
 0x2e5   :  { %963 = vst [vmem:[#allocation1 + $0x6] ss:$9 sm:$0xff] %v403_v37  ;;  %v1304_v37 = vsel %vm1246_vm0, %v3523_v52, -inf  ;;  %v421_v52 = vrot.slane %v3679_v28, 2 }
 0x2e6   :  { %964 = vst [vmem:[#allocation1 + $0x7] ss:$9 sm:$0xff] %v406_v23  ;;  %1305 = vmax.xlane.f32.xlu2 %v1304_v37  ;;  %v415_v23 = vrot.slane %v3657_v16, 2  ;;  %v424_v37 = vrot.slane %v3695_v36, 2 }
 0x2ed   :  { %v3801_v12 = vld [vmem:[#allocation1] sm:$0xff] }
 0x2ee   :  { %966 = vst [vmem:[#allocation1] ss:$9 sm:$0xff] %v407_v31  ;;  %v416_v31 = vrot.slane %v3661_v42, 2 }
 0x2ef   :  { %967 = vst [vmem:[#allocation1 + $0x1] ss:$9 sm:$0xff] %v408_v17  ;;  %v417_v17 = vrot.slane %v3659_v25, 2 }
 0x2f0   :  { %968 = vst [vmem:[#allocation1 + $0x2] ss:$9 sm:$0xff] %v409_v40  ;;  %v418_v40 = vrot.slane %v3670_v50, 2 }
 0x2f1   :  { %969 = vst [vmem:[#allocation1 + $0x3] ss:$9 sm:$0xff] %v410_v22  ;;  %v419_v22 = vrot.slane %v3677_v29, 2 }
 0x2f2   :  { %970 = vst [vmem:[#allocation1 + $0x4] ss:$9 sm:$0xff] %v411_v24  ;;  %v420_v24 = vrot.slane %v3675_v39, 2 }
 0x2f3   :  { %971 = vst [vmem:[#allocation1 + $0x5] ss:$9 sm:$0xff] %v412_v49  ;;  %v422_v49 = vrot.slane %v3687_v32, 2 }
 0x2f4   :  { %972 = vst [vmem:[#allocation1 + $0x6] ss:$9 sm:$0xff] %v413_v26  ;;  %v1307_v26 = vsel %vm1246_vm0, %v3537_v48, -inf  ;;  %v429_v48 = vrot.slane %v3711_v62, 2 }
 0x2f5   :  { %973 = vst [vmem:[#allocation1 + $0x7] ss:$9 sm:$0xff] %v414_v57  ;;  %1308 = vmax.xlane.f32.xlu0 %v1307_v26  ;;  %v423_v57 = vrot.slane %v3684_v33, 2  ;;  %v432_v26 = vrot.slane %v3722_v5, 2 }
 0x2fc   :  { %v3813_v54 = vld [vmem:[#allocation1] sm:$0xff] }
 0x2fd   :  { %975 = vst [vmem:[#allocation1] ss:$9 sm:$0xff] %v415_v23 }
 0x2fe   :  { %976 = vst [vmem:[#allocation1 + $0x1] ss:$9 sm:$0xff] %v416_v31  ;;  %v425_v31 = vrot.slane %v3699_v51, 2 }
 0x2ff   :  { %977 = vst [vmem:[#allocation1 + $0x2] ss:$9 sm:$0xff] %v417_v17  ;;  %v426_v17 = vrot.slane %v3697_v55, 2 }
 0x300   :  { %978 = vst [vmem:[#allocation1 + $0x3] ss:$9 sm:$0xff] %v418_v40  ;;  %v427_v40 = vrot.slane %v3706_v21, 2 }
 0x301   :  { %979 = vst [vmem:[#allocation1 + $0x4] ss:$9 sm:$0xff] %v419_v22  ;;  %v428_v22 = vrot.slane %v3714_v14, 2 }
 0x302   :  { %980 = vst [vmem:[#allocation1 + $0x5] ss:$9 sm:$0xff] %v420_v24  ;;  %v430_v24 = vrot.slane %v3717_v0, 2 }
 0x303   :  { %981 = vst [vmem:[#allocation1 + $0x6] ss:$9 sm:$0xff] %v421_v52  ;;  %v1310_v52 = vsel %vm1246_vm0, %v3549_v46, -inf  ;;  %v437_v46 = vrot.slane %v3752_v35, 2 }
 0x304   :  { %982 = vst [vmem:[#allocation1 + $0x7] ss:$9 sm:$0xff] %v422_v49  ;;  %1311 = vmax.xlane.f32.xlu1 %v1310_v52  ;;  %v431_v49 = vrot.slane %v3725_v7, 2  ;;  %v440_v52 = vrot.slane %v3623_v6, 3 }
 0x30b   :  { %v3825_v23 = vld [vmem:[#allocation1] sm:$0xff] }
 0x30c   :  { %984 = vst [vmem:[#allocation1] ss:$9 sm:$0xff] %v423_v57 }
 0x30d   :  { %985 = vst [vmem:[#allocation1 + $0x1] ss:$9 sm:$0xff] %v424_v37  ;;  %v433_v37 = vrot.slane %v3733_v2, 2 }
 0x30e   :  { %986 = vst [vmem:[#allocation1 + $0x2] ss:$9 sm:$0xff] %v425_v31  ;;  %v434_v31 = vrot.slane %v3737_v30, 2 }
 0x30f   :  { %987 = vst [vmem:[#allocation1 + $0x3] ss:$9 sm:$0xff] %v426_v17  ;;  %v435_v17 = vrot.slane %v3735_v3, 2 }
 0x310   :  { %988 = vst [vmem:[#allocation1 + $0x4] ss:$9 sm:$0xff] %v427_v40  ;;  %v436_v40 = vrot.slane %v3744_v4, 2 }
 0x311   :  { %989 = vst [vmem:[#allocation1 + $0x5] ss:$9 sm:$0xff] %v428_v22  ;;  %v438_v22 = vrot.slane %v3749_v9, 2 }
 0x312   :  { %990 = vst [vmem:[#allocation1 + $0x6] ss:$9 sm:$0xff] %v429_v48  ;;  %v439_v48 = vrot.slane %v3177_v1, 3 }
 0x313   :  { %991 = vst [vmem:[#allocation1 + $0x7] ss:$9 sm:$0xff] %v430_v24  ;;  %v1313_v24 = vsel %vm1246_vm0, %v3561_v47, -inf  ;;  %v446_v47 = vrot.slane %v3648_v38, 3 }
 0x314   :  { %1314 = vmax.xlane.f32.xlu2 %v1313_v24 }
 0x31a   :  { %v3837_v57 = vld [vmem:[#allocation1] sm:$0xff] }
 0x31b   :  { %993 = vst [vmem:[#allocation1] ss:$9 sm:$0xff] %v431_v49 }
 0x31c   :  { %994 = vst [vmem:[#allocation1 + $0x1] ss:$9 sm:$0xff] %v432_v26  ;;  %v441_v26 = vrot.slane %v3632_v11, 3 }
 0x31d   :  { %995 = vst [vmem:[#allocation1 + $0x2] ss:$9 sm:$0xff] %v433_v37  ;;  %v442_v37 = vrot.slane %v3639_v15, 3 }
 0x31e   :  { %996 = vst [vmem:[#allocation1 + $0x3] ss:$9 sm:$0xff] %v434_v31  ;;  %v443_v31 = vrot.slane %v3637_v56, 3 }
 0x31f   :  { %997 = vst [vmem:[#allocation1 + $0x4] ss:$9 sm:$0xff] %v435_v17  ;;  %v444_v17 = vrot.slane %v3641_v13, 3 }
 0x320   :  { %998 = vst [vmem:[#allocation1 + $0x5] ss:$9 sm:$0xff] %v436_v40  ;;  %v445_v40 = vrot.slane %v3651_v41, 3 }
 0x321   :  { %999 = vst [vmem:[#allocation1 + $0x6] ss:$9 sm:$0xff] %v437_v46  ;;  %v1316_v46 = vsel %vm1246_vm0, %v3575_v45, -inf  ;;  %v453_v45 = vrot.slane %v3679_v28, 3 }
 0x322   :  { %1000 = vst [vmem:[#allocation1 + $0x7] ss:$9 sm:$0xff] %v438_v22  ;;  %1317 = vmax.xlane.f32.xlu0 %v1316_v46  ;;  %v447_v22 = vrot.slane %v3657_v16, 3  ;;  %v456_v46 = vrot.slane %v3695_v36, 3 }
 0x329   :  { %v3849_v49 = vld [vmem:[#allocation1] sm:$0xff] }
 0x32a   :  { %1002 = vst [vmem:[#allocation1] ss:$9 sm:$0xff] %v439_v48  ;;  %v448_v48 = vrot.slane %v3661_v42, 3 }
 0x32b   :  { %1003 = vst [vmem:[#allocation1 + $0x1] ss:$9 sm:$0xff] %v440_v52  ;;  %v449_v52 = vrot.slane %v3659_v25, 3 }
 0x32c   :  { %1004 = vst [vmem:[#allocation1 + $0x2] ss:$9 sm:$0xff] %v441_v26  ;;  %v450_v26 = vrot.slane %v3670_v50, 3 }
 0x32d   :  { %1005 = vst [vmem:[#allocation1 + $0x3] ss:$9 sm:$0xff] %v442_v37  ;;  %v451_v37 = vrot.slane %v3677_v29, 3 }
 0x32e   :  { %1006 = vst [vmem:[#allocation1 + $0x4] ss:$9 sm:$0xff] %v443_v31  ;;  %v452_v31 = vrot.slane %v3675_v39, 3 }
 0x32f   :  { %1007 = vst [vmem:[#allocation1 + $0x5] ss:$9 sm:$0xff] %v444_v17  ;;  %v454_v17 = vrot.slane %v3687_v32, 3 }
 0x330   :  { %1008 = vst [vmem:[#allocation1 + $0x6] ss:$9 sm:$0xff] %v445_v40  ;;  %v1319_v40 = vsel %vm1246_vm0, %v3585_v53, -inf  ;;  %v461_v53 = vrot.slane %v3711_v62, 3 }
 0x331   :  { %1009 = vst [vmem:[#allocation1 + $0x7] ss:$9 sm:$0xff] %v446_v47  ;;  %1320 = vmax.xlane.f32.xlu1 %v1319_v40  ;;  %v455_v47 = vrot.slane %v3684_v33, 3  ;;  %v464_v40 = vrot.slane %v3722_v5, 3 }
 0x338   :  { %v3861_v24 = vld [vmem:[#allocation1] sm:$0xff] }
 0x339   :  { %1011 = vst [vmem:[#allocation1] ss:$9 sm:$0xff] %v447_v22 }
 0x33a   :  { %1012 = vst [vmem:[#allocation1 + $0x1] ss:$9 sm:$0xff] %v448_v48  ;;  %v457_v48 = vrot.slane %v3699_v51, 3 }
 0x33b   :  { %1013 = vst [vmem:[#allocation1 + $0x2] ss:$9 sm:$0xff] %v449_v52  ;;  %v458_v52 = vrot.slane %v3697_v55, 3 }
 0x33c   :  { %1014 = vst [vmem:[#allocation1 + $0x3] ss:$9 sm:$0xff] %v450_v26  ;;  %v459_v26 = vrot.slane %v3706_v21, 3 }
 0x33d   :  { %1015 = vst [vmem:[#allocation1 + $0x4] ss:$9 sm:$0xff] %v451_v37  ;;  %v460_v37 = vrot.slane %v3714_v14, 3 }
 0x33e   :  { %1016 = vst [vmem:[#allocation1 + $0x5] ss:$9 sm:$0xff] %v452_v31  ;;  %v462_v31 = vrot.slane %v3717_v0, 3 }
 0x33f   :  { %1017 = vst [vmem:[#allocation1 + $0x6] ss:$9 sm:$0xff] %v453_v45  ;;  %v1322_v45 = vsel %vm1246_vm0, %v3595_v63, -inf  ;;  %v469_v63 = vrot.slane %v3752_v35, 3 }
 0x340   :  { %1018 = vst [vmem:[#allocation1 + $0x7] ss:$9 sm:$0xff] %v454_v17  ;;  %1323 = vmax.xlane.f32.xlu2 %v1322_v45  ;;  %v463_v17 = vrot.slane %v3725_v7, 3  ;;  %v472_v45 = vrot.slane %v3623_v6, 4 }
 0x347   :  { %v3873_v22 = vld [vmem:[#allocation1] sm:$0xff] }
 0x348   :  { %1020 = vst [vmem:[#allocation1] ss:$9 sm:$0xff] %v455_v47 }
 0x349   :  { %1021 = vst [vmem:[#allocation1 + $0x1] ss:$9 sm:$0xff] %v456_v46  ;;  %v465_v46 = vrot.slane %v3733_v2, 3 }
 0x34a   :  { %1022 = vst [vmem:[#allocation1 + $0x2] ss:$9 sm:$0xff] %v457_v48  ;;  %v466_v48 = vrot.slane %v3737_v30, 3 }
 0x34b   :  { %1023 = vst [vmem:[#allocation1 + $0x3] ss:$9 sm:$0xff] %v458_v52  ;;  %v467_v52 = vrot.slane %v3735_v3, 3 }
 0x34c   :  { %1024 = vst [vmem:[#allocation1 + $0x4] ss:$9 sm:$0xff] %v459_v26  ;;  %v468_v26 = vrot.slane %v3744_v4, 3 }
 0x34d   :  { %1025 = vst [vmem:[#allocation1 + $0x5] ss:$9 sm:$0xff] %v460_v37  ;;  %v470_v37 = vrot.slane %v3749_v9, 3 }
 0x34e   :  { %1026 = vst [vmem:[#allocation1 + $0x6] ss:$9 sm:$0xff] %v461_v53  ;;  %v471_v53 = vrot.slane %v3177_v1, 4 }
 0x34f   :  { %1027 = vst [vmem:[#allocation1 + $0x7] ss:$9 sm:$0xff] %v462_v31  ;;  %v1325_v31 = vsel %vm1246_vm0, %v3605_v44, -inf  ;;  %v478_v44 = vrot.slane %v3648_v38, 4 }
 0x350   :  { %1326 = vmax.xlane.f32.xlu0 %v1325_v31 }
 0x356   :  { %v3885_v47 = vld [vmem:[#allocation1] sm:$0xff] }
 0x357   :  { %1029 = vst [vmem:[#allocation1] ss:$9 sm:$0xff] %v463_v17 }
 0x358   :  { %1030 = vst [vmem:[#allocation1 + $0x1] ss:$9 sm:$0xff] %v464_v40  ;;  %v473_v40 = vrot.slane %v3632_v11, 4 }
 0x359   :  { %1031 = vst [vmem:[#allocation1 + $0x2] ss:$9 sm:$0xff] %v465_v46  ;;  %v474_v46 = vrot.slane %v3639_v15, 4 }
 0x35a   :  { %1032 = vst [vmem:[#allocation1 + $0x3] ss:$9 sm:$0xff] %v466_v48  ;;  %v475_v48 = vrot.slane %v3637_v56, 4 }
 0x35b   :  { %1033 = vst [vmem:[#allocation1 + $0x4] ss:$9 sm:$0xff] %v467_v52  ;;  %v476_v52 = vrot.slane %v3641_v13, 4 }
 0x35c   :  { %1034 = vst [vmem:[#allocation1 + $0x5] ss:$9 sm:$0xff] %v468_v26  ;;  %v477_v26 = vrot.slane %v3651_v41, 4 }
 0x35d   :  { %1035 = vst [vmem:[#allocation1 + $0x6] ss:$9 sm:$0xff] %v469_v63  ;;  %v1328_v63 = vsel %vm1246_vm0, %v3615_v59, -inf  ;;  %v485_v59 = vrot.slane %v3679_v28, 4 }
 0x35e   :  { %1036 = vst [vmem:[#allocation1 + $0x7] ss:$9 sm:$0xff] %v470_v37  ;;  %1329 = vmax.xlane.f32.xlu1 %v1328_v63  ;;  %v479_v37 = vrot.slane %v3657_v16, 4  ;;  %v488_v63 = vrot.slane %v3695_v36, 4 }
 0x365   :  { %v3897_v17 = vld [vmem:[#allocation1] sm:$0xff] }
 0x366   :  { %1038 = vst [vmem:[#allocation1] ss:$9 sm:$0xff] %v471_v53  ;;  %v480_v53 = vrot.slane %v3661_v42, 4 }
 0x367   :  { %1039 = vst [vmem:[#allocation1 + $0x1] ss:$9 sm:$0xff] %v472_v45  ;;  %v481_v45 = vrot.slane %v3659_v25, 4 }
 0x368   :  { %1040 = vst [vmem:[#allocation1 + $0x2] ss:$9 sm:$0xff] %v473_v40  ;;  %v482_v40 = vrot.slane %v3670_v50, 4 }
 0x369   :  { %1041 = vst [vmem:[#allocation1 + $0x3] ss:$9 sm:$0xff] %v474_v46  ;;  %v483_v46 = vrot.slane %v3677_v29, 4 }
 0x36a   :  { %1042 = vst [vmem:[#allocation1 + $0x4] ss:$9 sm:$0xff] %v475_v48  ;;  %v484_v48 = vrot.slane %v3675_v39, 4 }
 0x36b   :  { %1043 = vst [vmem:[#allocation1 + $0x5] ss:$9 sm:$0xff] %v476_v52  ;;  %v486_v52 = vrot.slane %v3687_v32, 4 }
 0x36c   :  { %1044 = vst [vmem:[#allocation1 + $0x6] ss:$9 sm:$0xff] %v477_v26  ;;  %v1331_v26 = vsel %vm1246_vm0, %v3627_v58, -inf  ;;  %v493_v58 = vrot.slane %v3711_v62, 4 }
 0x36d   :  { %1045 = vst [vmem:[#allocation1 + $0x7] ss:$9 sm:$0xff] %v478_v44  ;;  %1332 = vmax.xlane.f32.xlu2 %v1331_v26  ;;  %v487_v44 = vrot.slane %v3684_v33, 4  ;;  %v496_v26 = vrot.slane %v3722_v5, 4 }
 0x374   :  { %v3909_v31 = vld [vmem:[#allocation1] sm:$0xff] }
 0x375   :  { %1047 = vst [vmem:[#allocation1] ss:$9 sm:$0xff] %v479_v37 }
 0x376   :  { %1048 = vst [vmem:[#allocation1 + $0x1] ss:$9 sm:$0xff] %v480_v53  ;;  %v489_v53 = vrot.slane %v3699_v51, 4 }
 0x377   :  { %1049 = vst [vmem:[#allocation1 + $0x2] ss:$9 sm:$0xff] %v481_v45  ;;  %v490_v45 = vrot.slane %v3697_v55, 4 }
 0x378   :  { %1050 = vst [vmem:[#allocation1 + $0x3] ss:$9 sm:$0xff] %v482_v40  ;;  %v491_v40 = vrot.slane %v3706_v21, 4 }
 0x379   :  { %1051 = vst [vmem:[#allocation1 + $0x4] ss:$9 sm:$0xff] %v483_v46  ;;  %v492_v46 = vrot.slane %v3714_v14, 4 }
 0x37a   :  { %1052 = vst [vmem:[#allocation1 + $0x5] ss:$9 sm:$0xff] %v484_v48  ;;  %v494_v48 = vrot.slane %v3717_v0, 4 }
 0x37b   :  { %1053 = vst [vmem:[#allocation1 + $0x6] ss:$9 sm:$0xff] %v485_v59  ;;  %v1334_v59 = vsel %vm1246_vm0, %v3645_v18, -inf  ;;  %v501_v18 = vrot.slane %v3752_v35, 4 }
 0x37c   :  { %1054 = vst [vmem:[#allocation1 + $0x7] ss:$9 sm:$0xff] %v486_v52  ;;  %1335 = vmax.xlane.f32.xlu0 %v1334_v59  ;;  %v495_v52 = vrot.slane %v3725_v7, 4  ;;  %v504_v59 = vrot.slane %v3623_v6, 5 }
 0x383   :  { %v3921_v37 = vld [vmem:[#allocation1] sm:$0xff] }
 0x384   :  { %1056 = vst [vmem:[#allocation1] ss:$9 sm:$0xff] %v487_v44 }
 0x385   :  { %1057 = vst [vmem:[#allocation1 + $0x1] ss:$9 sm:$0xff] %v488_v63  ;;  %v497_v63 = vrot.slane %v3733_v2, 4 }
 0x386   :  { %1058 = vst [vmem:[#allocation1 + $0x2] ss:$9 sm:$0xff] %v489_v53  ;;  %v498_v53 = vrot.slane %v3737_v30, 4 }
 0x387   :  { %1059 = vst [vmem:[#allocation1 + $0x3] ss:$9 sm:$0xff] %v490_v45  ;;  %v499_v45 = vrot.slane %v3735_v3, 4 }
 0x388   :  { %1060 = vst [vmem:[#allocation1 + $0x4] ss:$9 sm:$0xff] %v491_v40  ;;  %v500_v40 = vrot.slane %v3744_v4, 4 }
 0x389   :  { %1061 = vst [vmem:[#allocation1 + $0x5] ss:$9 sm:$0xff] %v492_v46  ;;  %v502_v46 = vrot.slane %v3749_v9, 4 }
 0x38a   :  { %1062 = vst [vmem:[#allocation1 + $0x6] ss:$9 sm:$0xff] %v493_v58  ;;  %v503_v58 = vrot.slane %v3177_v1, 5 }
 0x38b   :  { %1063 = vst [vmem:[#allocation1 + $0x7] ss:$9 sm:$0xff] %v494_v48  ;;  %v1337_v48 = vsel %vm1246_vm0, %v3665_v19, -inf  ;;  %v510_v19 = vrot.slane %v3648_v38, 5 }
 0x38c   :  { %1338 = vmax.xlane.f32.xlu1 %v1337_v48 }
 0x392   :  { %v3933_v44 = vld [vmem:[#allocation1] sm:$0xff] }
 0x393   :  { %1065 = vst [vmem:[#allocation1] ss:$9 sm:$0xff] %v495_v52 }
 0x394   :  { %1066 = vst [vmem:[#allocation1 + $0x1] ss:$9 sm:$0xff] %v496_v26  ;;  %v505_v26 = vrot.slane %v3632_v11, 5 }
 0x395   :  { %1067 = vst [vmem:[#allocation1 + $0x2] ss:$9 sm:$0xff] %v497_v63  ;;  %v506_v63 = vrot.slane %v3639_v15, 5 }
 0x396   :  { %1068 = vst [vmem:[#allocation1 + $0x3] ss:$9 sm:$0xff] %v498_v53  ;;  %v507_v53 = vrot.slane %v3637_v56, 5 }
 0x397   :  { %1069 = vst [vmem:[#allocation1 + $0x4] ss:$9 sm:$0xff] %v499_v45  ;;  %v508_v45 = vrot.slane %v3641_v13, 5 }
 0x398   :  { %1070 = vst [vmem:[#allocation1 + $0x5] ss:$9 sm:$0xff] %v500_v40  ;;  %v509_v40 = vrot.slane %v3651_v41, 5 }
 0x399   :  { %1071 = vst [vmem:[#allocation1 + $0x6] ss:$9 sm:$0xff] %v501_v18  ;;  %v1340_v18 = vsel %vm1246_vm0, %v3681_v34, -inf  ;;  %v517_v34 = vrot.slane %v3679_v28, 5 }
 0x39a   :  { %1072 = vst [vmem:[#allocation1 + $0x7] ss:$9 sm:$0xff] %v502_v46  ;;  %1341 = vmax.xlane.f32.xlu2 %v1340_v18  ;;  %v511_v46 = vrot.slane %v3657_v16, 5  ;;  %v520_v18 = vrot.slane %v3695_v36, 5 }
 0x3a1   :  { %v3945_v52 = vld [vmem:[#allocation1] sm:$0xff] }
 0x3a2   :  { %1074 = vst [vmem:[#allocation1] ss:$9 sm:$0xff] %v503_v58  ;;  %v512_v58 = vrot.slane %v3661_v42, 5 }
 0x3a3   :  { %1075 = vst [vmem:[#allocation1 + $0x1] ss:$9 sm:$0xff] %v504_v59  ;;  %v513_v59 = vrot.slane %v3659_v25, 5 }
 0x3a4   :  { %1076 = vst [vmem:[#allocation1 + $0x2] ss:$9 sm:$0xff] %v505_v26  ;;  %v514_v26 = vrot.slane %v3670_v50, 5 }
 0x3a5   :  { %1077 = vst [vmem:[#allocation1 + $0x3] ss:$9 sm:$0xff] %v506_v63  ;;  %v515_v63 = vrot.slane %v3677_v29, 5 }
 0x3a6   :  { %1078 = vst [vmem:[#allocation1 + $0x4] ss:$9 sm:$0xff] %v507_v53  ;;  %v516_v53 = vrot.slane %v3675_v39, 5 }
 0x3a7   :  { %1079 = vst [vmem:[#allocation1 + $0x5] ss:$9 sm:$0xff] %v508_v45  ;;  %v518_v45 = vrot.slane %v3687_v32, 5 }
 0x3a8   :  { %1080 = vst [vmem:[#allocation1 + $0x6] ss:$9 sm:$0xff] %v509_v40  ;;  %v1343_v40 = vsel %vm1246_vm0, %v3701_v61, -inf  ;;  %v525_v61 = vrot.slane %v3711_v62, 5 }
 0x3a9   :  { %1081 = vst [vmem:[#allocation1 + $0x7] ss:$9 sm:$0xff] %v510_v19  ;;  %1344 = vmax.xlane.f32.xlu0 %v1343_v40  ;;  %v519_v19 = vrot.slane %v3684_v33, 5  ;;  %v528_v40 = vrot.slane %v3722_v5, 5 }
 0x3b0   :  { %v3957_v48 = vld [vmem:[#allocation1] sm:$0xff] }
 0x3b1   :  { %1083 = vst [vmem:[#allocation1] ss:$9 sm:$0xff] %v511_v46 }
 0x3b2   :  { %1084 = vst [vmem:[#allocation1 + $0x1] ss:$9 sm:$0xff] %v512_v58  ;;  %v521_v58 = vrot.slane %v3699_v51, 5 }
 0x3b3   :  { %1085 = vst [vmem:[#allocation1 + $0x2] ss:$9 sm:$0xff] %v513_v59  ;;  %v522_v59 = vrot.slane %v3697_v55, 5 }
 0x3b4   :  { %1086 = vst [vmem:[#allocation1 + $0x3] ss:$9 sm:$0xff] %v514_v26  ;;  %v523_v26 = vrot.slane %v3706_v21, 5 }
 0x3b5   :  { %1087 = vst [vmem:[#allocation1 + $0x4] ss:$9 sm:$0xff] %v515_v63  ;;  %v524_v63 = vrot.slane %v3714_v14, 5 }
 0x3b6   :  { %1088 = vst [vmem:[#allocation1 + $0x5] ss:$9 sm:$0xff] %v516_v53  ;;  %v526_v53 = vrot.slane %v3717_v0, 5 }
 0x3b7   :  { %1089 = vst [vmem:[#allocation1 + $0x6] ss:$9 sm:$0xff] %v517_v34  ;;  %v1346_v34 = vsel %vm1246_vm0, %v3719_v8, -inf  ;;  %v533_v8 = vrot.slane %v3752_v35, 5 }
 0x3b8   :  { %1090 = vst [vmem:[#allocation1 + $0x7] ss:$9 sm:$0xff] %v518_v45  ;;  %1347 = vmax.xlane.f32.xlu1 %v1346_v34  ;;  %v527_v45 = vrot.slane %v3725_v7, 5  ;;  %v536_v34 = vrot.slane %v3623_v6, 6 }
 0x3bf   :  { %v3969_v46 = vld [vmem:[#allocation1] sm:$0xff] }
 0x3c0   :  { %1092 = vst [vmem:[#allocation1] ss:$9 sm:$0xff] %v519_v19 }
 0x3c1   :  { %1093 = vst [vmem:[#allocation1 + $0x1] ss:$9 sm:$0xff] %v520_v18  ;;  %v529_v18 = vrot.slane %v3733_v2, 5 }
 0x3c2   :  { %1094 = vst [vmem:[#allocation1 + $0x2] ss:$9 sm:$0xff] %v521_v58  ;;  %v530_v58 = vrot.slane %v3737_v30, 5 }
 0x3c3   :  { %1095 = vst [vmem:[#allocation1 + $0x3] ss:$9 sm:$0xff] %v522_v59  ;;  %v531_v59 = vrot.slane %v3735_v3, 5 }
 0x3c4   :  { %1096 = vst [vmem:[#allocation1 + $0x4] ss:$9 sm:$0xff] %v523_v26  ;;  %v532_v26 = vrot.slane %v3744_v4, 5 }
 0x3c5   :  { %1097 = vst [vmem:[#allocation1 + $0x5] ss:$9 sm:$0xff] %v524_v63  ;;  %v534_v63 = vrot.slane %v3749_v9, 5 }
 0x3c6   :  { %1098 = vst [vmem:[#allocation1 + $0x6] ss:$9 sm:$0xff] %v525_v61  ;;  %v535_v61 = vrot.slane %v3177_v1, 6 }
 0x3c7   :  { %1099 = vst [vmem:[#allocation1 + $0x7] ss:$9 sm:$0xff] %v526_v53  ;;  %v1349_v53 = vsel %vm1246_vm0, %v3739_v10, -inf  ;;  %v542_v10 = vrot.slane %v3648_v38, 6 }
 0x3c8   :  { %1350 = vmax.xlane.f32.xlu2 %v1349_v53 }
 0x3ce   :  { %v3981_v19 = vld [vmem:[#allocation1] sm:$0xff] }
 0x3cf   :  { %1101 = vst [vmem:[#allocation1] ss:$9 sm:$0xff] %v527_v45 }
 0x3d0   :  { %1102 = vst [vmem:[#allocation1 + $0x1] ss:$9 sm:$0xff] %v528_v40  ;;  %v537_v40 = vrot.slane %v3632_v11, 6 }
 0x3d1   :  { %1103 = vst [vmem:[#allocation1 + $0x2] ss:$9 sm:$0xff] %v529_v18  ;;  %v538_v18 = vrot.slane %v3639_v15, 6 }
 0x3d2   :  { %1104 = vst [vmem:[#allocation1 + $0x3] ss:$9 sm:$0xff] %v530_v58  ;;  %v539_v58 = vrot.slane %v3637_v56, 6 }
 0x3d3   :  { %1105 = vst [vmem:[#allocation1 + $0x4] ss:$9 sm:$0xff] %v531_v59  ;;  %v540_v59 = vrot.slane %v3641_v13, 6 }
 0x3d4   :  { %1106 = vst [vmem:[#allocation1 + $0x5] ss:$9 sm:$0xff] %v532_v26  ;;  %v541_v26 = vrot.slane %v3651_v41, 6 }
 0x3d5   :  { %1107 = vst [vmem:[#allocation1 + $0x6] ss:$9 sm:$0xff] %v533_v8  ;;  %v1352_v8 = vsel %vm1246_vm0, %v3757_v43, -inf  ;;  %v549_v43 = vrot.slane %v3679_v28, 6 }
 0x3d6   :  { %1108 = vst [vmem:[#allocation1 + $0x7] ss:$9 sm:$0xff] %v534_v63  ;;  %1353 = vmax.xlane.f32.xlu0 %v1352_v8  ;;  %v543_v63 = vrot.slane %v3657_v16, 6  ;;  %v552_v8 = vrot.slane %v3695_v36, 6 }
 0x3dd   :  { %v3993_v45 = vld [vmem:[#allocation1] sm:$0xff] }
 0x3de   :  { %1110 = vst [vmem:[#allocation1] ss:$9 sm:$0xff] %v535_v61  ;;  %v544_v61 = vrot.slane %v3661_v42, 6 }
 0x3df   :  { %1111 = vst [vmem:[#allocation1 + $0x1] ss:$9 sm:$0xff] %v536_v34  ;;  %v545_v34 = vrot.slane %v3659_v25, 6 }
 0x3e0   :  { %1112 = vst [vmem:[#allocation1 + $0x2] ss:$9 sm:$0xff] %v537_v40  ;;  %v546_v40 = vrot.slane %v3670_v50, 6 }
 0x3e1   :  { %1113 = vst [vmem:[#allocation1 + $0x3] ss:$9 sm:$0xff] %v538_v18  ;;  %v547_v18 = vrot.slane %v3677_v29, 6 }
 0x3e2   :  { %1114 = vst [vmem:[#allocation1 + $0x4] ss:$9 sm:$0xff] %v539_v58  ;;  %v548_v58 = vrot.slane %v3675_v39, 6 }
 0x3e3   :  { %1115 = vst [vmem:[#allocation1 + $0x5] ss:$9 sm:$0xff] %v540_v59  ;;  %v550_v59 = vrot.slane %v3687_v32, 6 }
 0x3e4   :  { %1116 = vst [vmem:[#allocation1 + $0x6] ss:$9 sm:$0xff] %v541_v26  ;;  %v1355_v26 = vsel %vm1246_vm0, %v3767_v60, -inf  ;;  %v557_v60 = vrot.slane %v3711_v62, 6 }
 0x3e5   :  { %1117 = vst [vmem:[#allocation1 + $0x7] ss:$9 sm:$0xff] %v542_v10  ;;  %1356 = vmax.xlane.f32.xlu1 %v1355_v26  ;;  %v551_v10 = vrot.slane %v3684_v33, 6  ;;  %v560_v26 = vrot.slane %v3722_v5, 6 }
 0x3ec   :  { %v4005_v53 = vld [vmem:[#allocation1] sm:$0xff] }
 0x3ed   :  { %1119 = vst [vmem:[#allocation1] ss:$9 sm:$0xff] %v543_v63 }
 0x3ee   :  { %1120 = vst [vmem:[#allocation1 + $0x1] ss:$9 sm:$0xff] %v544_v61  ;;  %v553_v61 = vrot.slane %v3699_v51, 6 }
 0x3ef   :  { %1121 = vst [vmem:[#allocation1 + $0x2] ss:$9 sm:$0xff] %v545_v34  ;;  %v554_v34 = vrot.slane %v3697_v55, 6 }
 0x3f0   :  { %1122 = vst [vmem:[#allocation1 + $0x3] ss:$9 sm:$0xff] %v546_v40  ;;  %v555_v40 = vrot.slane %v3706_v21, 6 }
 0x3f1   :  { %1123 = vst [vmem:[#allocation1 + $0x4] ss:$9 sm:$0xff] %v547_v18  ;;  %v556_v18 = vrot.slane %v3714_v14, 6 }
 0x3f2   :  { %1124 = vst [vmem:[#allocation1 + $0x5] ss:$9 sm:$0xff] %v548_v58  ;;  %v558_v58 = vrot.slane %v3717_v0, 6 }
 0x3f3   :  { %1125 = vst [vmem:[#allocation1 + $0x6] ss:$9 sm:$0xff] %v549_v43  ;;  %v1358_v43 = vsel %vm1246_vm0, %v3779_v27, -inf  ;;  %v565_v27 = vrot.slane %v3752_v35, 6 }
 0x3f4   :  { %1126 = vst [vmem:[#allocation1 + $0x7] ss:$9 sm:$0xff] %v550_v59  ;;  %1359 = vmax.xlane.f32.xlu2 %v1358_v43  ;;  %v559_v59 = vrot.slane %v3725_v7, 6  ;;  %v568_v43 = vrot.slane %v3623_v6, 7  ;;  %v1364_v6 = vsel %vm1246_vm0, %v3801_v12, -inf  ;;  %v581_v12 = vrot.slane %v3679_v28, 7 }
 0x3f5   :  { %1365 = vmax.xlane.f32.xlu1 %v1364_v6  ;;  %v586_v28 = vrot.slane %v3697_v55, 7  ;;  %v591_v55 = vrot.slane %v3725_v7, 7  ;;  %v598_v7 = vrot.slane %v3749_v9, 7 }
 0x3fb   :  { %v4017_v63 = vld [vmem:[#allocation1] sm:$0xff] }
 0x3fc   :  { %1128 = vst [vmem:[#allocation1] ss:$9 sm:$0xff] %v551_v10 }
 0x3fd   :  { %1129 = vst [vmem:[#allocation1 + $0x1] ss:$9 sm:$0xff] %v552_v8  ;;  %v561_v8 = vrot.slane %v3733_v2, 6 }
 0x3fe   :  { %1130 = vst [vmem:[#allocation1 + $0x2] ss:$9 sm:$0xff] %v553_v61  ;;  %v562_v61 = vrot.slane %v3737_v30, 6 }
 0x3ff   :  { %1131 = vst [vmem:[#allocation1 + $0x3] ss:$9 sm:$0xff] %v554_v34  ;;  %v563_v34 = vrot.slane %v3735_v3, 6 }
 0x400   :  { %1132 = vst [vmem:[#allocation1 + $0x4] ss:$9 sm:$0xff] %v555_v40  ;;  %v564_v40 = vrot.slane %v3744_v4, 6 }
 0x401   :  { %1133 = vst [vmem:[#allocation1 + $0x5] ss:$9 sm:$0xff] %v556_v18  ;;  %v566_v18 = vrot.slane %v3749_v9, 6 }
 0x402   :  { %1134 = vst [vmem:[#allocation1 + $0x6] ss:$9 sm:$0xff] %v557_v60  ;;  %v567_v60 = vrot.slane %v3177_v1, 7  ;;  %v573_v1 = vrot.slane %v3651_v41, 7  ;;  %v578_v41 = vrot.slane %v3670_v50, 7  ;;  %v584_v50 = vrot.slane %v3695_v36, 7 }
 0x403   :  { %1135 = vst [vmem:[#allocation1 + $0x7] ss:$9 sm:$0xff] %v558_v58  ;;  %v1361_v58 = vsel %vm1246_vm0, %v3789_v20, -inf  ;;  %v574_v20 = vrot.slane %v3648_v38, 7  ;;  %v579_v38 = vrot.slane %v3677_v29, 7  ;;  %v1370_v36 = vsel %vm1246_vm0, %v3825_v23, -inf }
 0x404   :  { %1362 = vmax.xlane.f32.xlu0 %v1361_v58  ;;  %v597_v23 = vrot.slane %v3752_v35, 7 }
 0x40a   :  { %v4029_v10 = vld [vmem:[#allocation1] sm:$0xff] }
 0x40b   :  { %1137 = vst [vmem:[#allocation1] ss:$9 sm:$0xff] %v559_v59 }
 0x40c   :  { %1138 = vst [vmem:[#allocation1 + $0x1] ss:$9 sm:$0xff] %v560_v26  ;;  %v569_v26 = vrot.slane %v3632_v11, 7  ;;  %v575_v11 = vrot.slane %v3657_v16, 7  ;;  %v582_v16 = vrot.slane %v3687_v32, 7  ;;  %v587_v32 = vrot.slane %v3706_v21, 7  ;;  %1371 = vmax.xlane.f32.xlu0 %v1370_v36 }
 0x40d   :  { %1139 = vst [vmem:[#allocation1 + $0x2] ss:$9 sm:$0xff] %v561_v8  ;;  %v570_v8 = vrot.slane %v3639_v15, 7 }
 0x40e   :  { %1140 = vst [vmem:[#allocation1 + $0x3] ss:$9 sm:$0xff] %v562_v61  ;;  %v571_v61 = vrot.slane %v3637_v56, 7  ;;  %v576_v56 = vrot.slane %v3661_v42, 7  ;;  %v583_v42 = vrot.slane %v3684_v33, 7  ;;  %v590_v33 = vrot.slane %v3717_v0, 7 }
 0x40f   :  { %1141 = vst [vmem:[#allocation1 + $0x4] ss:$9 sm:$0xff] %v563_v34  ;;  %v572_v34 = vrot.slane %v3641_v13, 7  ;;  %v577_v13 = vrot.slane %v3659_v25, 7  ;;  %v1367_v25 = vsel %vm1246_vm0, %v3813_v54, -inf  ;;  %v589_v54 = vrot.slane %v3711_v62, 7 }
 0x410   :  { %1142 = vst [vmem:[#allocation1 + $0x5] ss:$9 sm:$0xff] %v564_v40  ;;  %v580_v40 = vrot.slane %v3675_v39, 7  ;;  %1368 = vmax.xlane.f32.xlu2 %v1367_v25  ;;  %v585_v39 = vrot.slane %v3699_v51, 7  ;;  %v592_v51 = vrot.slane %v3722_v5, 7  ;;  %v594_v62 = vrot.slane %v3737_v30, 7  ;;  %v1249_v5 = vpop.xlane.xlu2 %1248 }
 0x411   :  { %1143 = vst [vmem:[#allocation1 + $0x6] ss:$9 sm:$0xff] %v565_v27  ;;  %v588_v27 = vrot.slane %v3714_v14, 7  ;;  %v593_v14 = vrot.slane %v3733_v2, 7  ;;  %v595_v0 = vrot.slane %v3735_v3, 7  ;;  %v1373_v2 = vsel %vm1246_vm0, %v3837_v57, -inf  ;;  %v1252_v57 = vpop.xlane.xlu0 %1251 }
 0x412   :  { %1144 = vst [vmem:[#allocation1 + $0x7] ss:$9 sm:$0xff] %v566_v18  ;;  %v596_v18 = vrot.slane %v3744_v4, 7  ;;  %1374 = vmax.xlane.f32.xlu1 %v1373_v2  ;;  %v1503_v30 = vperm.slane %v1249_v5, 0  ;;  %v1505_v58 = vperm.slane %v1249_v5, 2  ;;  %v1506_v4 = vperm.slane %v1249_v5, 3 }
 0x413   :  { %v1507_v35 = vperm.slane %v1249_v5, 4  ;;  %v1509_v9 = vperm.slane %v1249_v5, 6  ;;  %v1514_v6 = vperm.slane %v1252_v57, 3 }
 0x419   :  { %v4041_v59 = vld [vmem:[#allocation1] sm:$0xff] }
 0x41a   :  { %1146 = vst [vmem:[#allocation1] ss:$9 sm:$0xff] %v567_v60  ;;  %v1504_v60 = vperm.slane %v1249_v5, 1 }
 0x41b   :  { %1147 = vst [vmem:[#allocation1 + $0x1] ss:$9 sm:$0xff] %v568_v43  ;;  %v1508_v43 = vperm.slane %v1249_v5, 5 }
 0x41c   :  { %1148 = vst [vmem:[#allocation1 + $0x2] ss:$9 sm:$0xff] %v569_v26  ;;  %v1510_v26 = vperm.slane %v1249_v5, 7 }
 0x41d   :  { %1149 = vst [vmem:[#allocation1 + $0x3] ss:$9 sm:$0xff] %v570_v8  ;;  %v1376_v8 = vsel %vm1246_vm0, %v3849_v49, -inf  ;;  %v1255_v49 = vpop.xlane.xlu1 %1254 }
 0x41e   :  { %1150 = vst [vmem:[#allocation1 + $0x4] ss:$9 sm:$0xff] %v571_v61  ;;  %1377 = vmax.xlane.f32.xlu2 %v1376_v8  ;;  %v1511_v61 = vperm.slane %v1252_v57, 0  ;;  %v1521_v25 = vperm.slane %v1255_v49, 2 }
 0x41f   :  { %1151 = vst [vmem:[#allocation1 + $0x5] ss:$9 sm:$0xff] %v572_v34 }
 0x420   :  { %1152 = vst [vmem:[#allocation1 + $0x6] ss:$9 sm:$0xff] %v573_v1  ;;  %v1512_v1 = vperm.slane %v1252_v57, 1 }
 0x421   :  { %1153 = vst [vmem:[#allocation1 + $0x7] ss:$9 sm:$0xff] %v574_v20  ;;  %v1513_v20 = vperm.slane %v1252_v57, 2 }
 0x428   :  { %v4053_v15 = vld [vmem:[#allocation1] sm:$0xff] }
 0x429   :  { %1155 = vst [vmem:[#allocation1] ss:$9 sm:$0xff] %v575_v11  ;;  %v1515_v11 = vperm.slane %v1252_v57, 4 }
 0x42a   :  { %1156 = vst [vmem:[#allocation1 + $0x1] ss:$9 sm:$0xff] %v576_v56  ;;  %v1516_v56 = vperm.slane %v1252_v57, 5 }
 0x42b   :  { %1157 = vst [vmem:[#allocation1 + $0x2] ss:$9 sm:$0xff] %v577_v13  ;;  %v1517_v13 = vperm.slane %v1252_v57, 6 }
 0x42c   :  { %1158 = vst [vmem:[#allocation1 + $0x3] ss:$9 sm:$0xff] %v578_v41  ;;  %v1518_v41 = vperm.slane %v1252_v57, 7 }
 0x42d   :  { %1159 = vst [vmem:[#allocation1 + $0x4] ss:$9 sm:$0xff] %v579_v38  ;;  %v1379_v38 = vsel %vm1246_vm0, %v3861_v24, -inf  ;;  %v1258_v24 = vpop.xlane.xlu2 %1257 }
 0x42e   :  { %1160 = vst [vmem:[#allocation1 + $0x5] ss:$9 sm:$0xff] %v580_v40  ;;  %1380 = vmax.xlane.f32.xlu0 %v1379_v38  ;;  %v1519_v40 = vperm.slane %v1255_v49, 0  ;;  %v1528_v36 = vperm.slane %v1258_v24, 1 }
 0x42f   :  { %1161 = vst [vmem:[#allocation1 + $0x6] ss:$9 sm:$0xff] %v581_v12 }
 0x430   :  { %1162 = vst [vmem:[#allocation1 + $0x7] ss:$9 sm:$0xff] %v582_v16  ;;  %v1520_v16 = vperm.slane %v1255_v49, 1 }
 0x437   :  { %v4065_v29 = vld [vmem:[#allocation1] sm:$0xff] }
 0x438   :  { %1164 = vst [vmem:[#allocation1] ss:$9 sm:$0xff] %v583_v42  ;;  %v1522_v42 = vperm.slane %v1255_v49, 3 }
 0x439   :  { %1165 = vst [vmem:[#allocation1 + $0x1] ss:$9 sm:$0xff] %v584_v50  ;;  %v1523_v50 = vperm.slane %v1255_v49, 4 }
 0x43a   :  { %1166 = vst [vmem:[#allocation1 + $0x2] ss:$9 sm:$0xff] %v585_v39  ;;  %v1524_v39 = vperm.slane %v1255_v49, 5 }
 0x43b   :  { %1167 = vst [vmem:[#allocation1 + $0x3] ss:$9 sm:$0xff] %v586_v28  ;;  %v1525_v28 = vperm.slane %v1255_v49, 6 }
 0x43c   :  { %1168 = vst [vmem:[#allocation1 + $0x4] ss:$9 sm:$0xff] %v587_v32  ;;  %v1526_v32 = vperm.slane %v1255_v49, 7 }
 0x43d   :  { %1169 = vst [vmem:[#allocation1 + $0x5] ss:$9 sm:$0xff] %v588_v27  ;;  %v1382_v27 = vsel %vm1246_vm0, %v3873_v22, -inf  ;;  %v1261_v22 = vpop.xlane.xlu2 %1260 }
 0x43e   :  { %1170 = vst [vmem:[#allocation1 + $0x6] ss:$9 sm:$0xff] %v589_v54  ;;  %1383 = vmax.xlane.f32.xlu1 %v1382_v27  ;;  %v1527_v54 = vperm.slane %v1258_v24, 0  ;;  %v1536_v2 = vperm.slane %v1261_v22, 1 }
 0x43f   :  { %1171 = vst [vmem:[#allocation1 + $0x7] ss:$9 sm:$0xff] %v590_v33 }
 0x446   :  { %v4077_v21 = vld [vmem:[#allocation1] sm:$0xff] }
 0x447   :  { %1173 = vst [vmem:[#allocation1] ss:$9 sm:$0xff] %v591_v55  ;;  %v1529_v55 = vperm.slane %v1258_v24, 2 }
 0x448   :  { %1174 = vst [vmem:[#allocation1 + $0x1] ss:$9 sm:$0xff] %v592_v51  ;;  %v1530_v51 = vperm.slane %v1258_v24, 3 }
 0x449   :  { %1175 = vst [vmem:[#allocation1 + $0x2] ss:$9 sm:$0xff] %v593_v14  ;;  %v1531_v14 = vperm.slane %v1258_v24, 4 }
 0x44a   :  { %1176 = vst [vmem:[#allocation1 + $0x3] ss:$9 sm:$0xff] %v594_v62  ;;  %v1532_v62 = vperm.slane %v1258_v24, 5 }
 0x44b   :  { %1177 = vst [vmem:[#allocation1 + $0x4] ss:$9 sm:$0xff] %v595_v0  ;;  %v1533_v0 = vperm.slane %v1258_v24, 6 }
 0x44c   :  { %1178 = vst [vmem:[#allocation1 + $0x5] ss:$9 sm:$0xff] %v596_v18  ;;  %v1534_v18 = vperm.slane %v1258_v24, 7 }
 0x44d   :  { %1179 = vst [vmem:[#allocation1 + $0x6] ss:$9 sm:$0xff] %v597_v23  ;;  %v1385_v23 = vsel %vm1246_vm0, %v3885_v47, -inf  ;;  %v1264_v47 = vpop.xlane.xlu0 %1263 }
 0x44e   :  { %1180 = vst [vmem:[#allocation1 + $0x7] ss:$9 sm:$0xff] %v598_v7  ;;  %1386 = vmax.xlane.f32.xlu2 %v1385_v23  ;;  %v1535_v7 = vperm.slane %v1261_v22, 0  ;;  %v1544_v8 = vperm.slane %v1264_v47, 1 }
 0x455   :  { %v4087_v3 = vld [vmem:[#allocation1] sm:$0xff] }
 0x456   :  { %2015 = vst [vmem:[#allocation1] ss:$9 sm:$0xff] %v1503_v30  ;;  %v1537_v30 = vperm.slane %v1261_v22, 2 }
 0x457   :  { %2017 = vst [vmem:[#allocation1 + $0x1] ss:$9 sm:$0xff] %v1504_v60  ;;  %v1538_v60 = vperm.slane %v1261_v22, 3 }
 0x458   :  { %2019 = vst [vmem:[#allocation1 + $0x2] ss:$9 sm:$0xff] %v1505_v58  ;;  %v1539_v58 = vperm.slane %v1261_v22, 4 }
 0x459   :  { %2021 = vst [vmem:[#allocation1 + $0x3] ss:$9 sm:$0xff] %v1506_v4  ;;  %v1540_v4 = vperm.slane %v1261_v22, 5 }
 0x45a   :  { %2023 = vst [vmem:[#allocation1 + $0x4] ss:$9 sm:$0xff] %v1507_v35  ;;  %v1541_v35 = vperm.slane %v1261_v22, 6 }
 0x45b   :  { %2025 = vst [vmem:[#allocation1 + $0x5] ss:$9 sm:$0xff] %v1508_v43  ;;  %v1542_v43 = vperm.slane %v1261_v22, 7 }
 0x45c   :  { %2027 = vst [vmem:[#allocation1 + $0x6] ss:$9 sm:$0xff] %v1509_v9  ;;  %v1388_v9 = vsel %vm1246_vm0, %v3897_v17, -inf  ;;  %v1267_v17 = vpop.xlane.xlu1 %1266 }
 0x45d   :  { %2029 = vst [vmem:[#allocation1 + $0x7] ss:$9 sm:$0xff] %v1510_v26  ;;  %1389 = vmax.xlane.f32.xlu0 %v1388_v9  ;;  %v1543_v26 = vperm.slane %v1264_v47, 0  ;;  %v1552_v38 = vperm.slane %v1267_v17, 1 }
 0x464   :  { %v4091_v34 = vld [vmem:[#allocation1] sm:$0xff] }
 0x465   :  { %2031 = vst [vmem:[#allocation1] ss:$9 sm:$0xff] %v1511_v61  ;;  %v1545_v61 = vperm.slane %v1264_v47, 2 }
 0x466   :  { %2032 = vst [vmem:[#allocation1 + $0x1] ss:$9 sm:$0xff] %v1512_v1  ;;  %v1546_v1 = vperm.slane %v1264_v47, 3 }
 0x467   :  { %2033 = vst [vmem:[#allocation1 + $0x2] ss:$9 sm:$0xff] %v1513_v20  ;;  %v1547_v20 = vperm.slane %v1264_v47, 4 }
 0x468   :  { %2034 = vst [vmem:[#allocation1 + $0x3] ss:$9 sm:$0xff] %v1514_v6  ;;  %v1548_v6 = vperm.slane %v1264_v47, 5 }
 0x469   :  { %2035 = vst [vmem:[#allocation1 + $0x4] ss:$9 sm:$0xff] %v1515_v11  ;;  %v1549_v11 = vperm.slane %v1264_v47, 6 }
 0x46a   :  { %2036 = vst [vmem:[#allocation1 + $0x5] ss:$9 sm:$0xff] %v1516_v56  ;;  %v1550_v56 = vperm.slane %v1264_v47, 7 }
 0x46b   :  { %2037 = vst [vmem:[#allocation1 + $0x6] ss:$9 sm:$0xff] %v1517_v13  ;;  %v1391_v13 = vsel %vm1246_vm0, %v3909_v31, -inf  ;;  %v1270_v31 = vpop.xlane.xlu2 %1269 }
 0x46c   :  { %2038 = vst [vmem:[#allocation1 + $0x7] ss:$9 sm:$0xff] %v1518_v41  ;;  %1392 = vmax.xlane.f32.xlu1 %v1391_v13  ;;  %v1551_v41 = vperm.slane %v1267_v17, 0  ;;  %v1560_v27 = vperm.slane %v1270_v31, 1 }
 0x473   :  { %v4095_v12 = vld [vmem:[#allocation1] sm:$0xff] }
 0x474   :  { %2040 = vst [vmem:[#allocation1] ss:$9 sm:$0xff] %v1519_v40  ;;  %v1553_v40 = vperm.slane %v1267_v17, 2 }
 0x475   :  { %2041 = vst [vmem:[#allocation1 + $0x1] ss:$9 sm:$0xff] %v1520_v16  ;;  %v1554_v16 = vperm.slane %v1267_v17, 3 }
 0x476   :  { %2042 = vst [vmem:[#allocation1 + $0x2] ss:$9 sm:$0xff] %v1521_v25  ;;  %v1555_v25 = vperm.slane %v1267_v17, 4 }
 0x477   :  { %2043 = vst [vmem:[#allocation1 + $0x3] ss:$9 sm:$0xff] %v1522_v42  ;;  %v1556_v42 = vperm.slane %v1267_v17, 5 }
 0x478   :  { %2044 = vst [vmem:[#allocation1 + $0x4] ss:$9 sm:$0xff] %v1523_v50  ;;  %v1557_v50 = vperm.slane %v1267_v17, 6 }
 0x479   :  { %2045 = vst [vmem:[#allocation1 + $0x5] ss:$9 sm:$0xff] %v1524_v39  ;;  %v1558_v39 = vperm.slane %v1267_v17, 7 }
 0x47a   :  { %2046 = vst [vmem:[#allocation1 + $0x6] ss:$9 sm:$0xff] %v1525_v28  ;;  %v1394_v28 = vsel %vm1246_vm0, %v3921_v37, -inf  ;;  %v1273_v37 = vpop.xlane.xlu0 %1272 }
 0x47b   :  { %2047 = vst [vmem:[#allocation1 + $0x7] ss:$9 sm:$0xff] %v1526_v32  ;;  %1395 = vmax.xlane.f32.xlu2 %v1394_v28  ;;  %v1559_v32 = vperm.slane %v1270_v31, 0  ;;  %v1568_v23 = vperm.slane %v1273_v37, 1 }
 0x482   :  { %v4099_v33 = vld [vmem:[#allocation1] sm:$0xff] }
 0x483   :  { %2049 = vst [vmem:[#allocation1] ss:$9 sm:$0xff] %v1527_v54  ;;  %v1561_v54 = vperm.slane %v1270_v31, 2 }
 0x484   :  { %2050 = vst [vmem:[#allocation1 + $0x1] ss:$9 sm:$0xff] %v1528_v36  ;;  %v1562_v36 = vperm.slane %v1270_v31, 3 }
 0x485   :  { %2051 = vst [vmem:[#allocation1 + $0x2] ss:$9 sm:$0xff] %v1529_v55  ;;  %v1563_v55 = vperm.slane %v1270_v31, 4 }
 0x486   :  { %2052 = vst [vmem:[#allocation1 + $0x3] ss:$9 sm:$0xff] %v1530_v51  ;;  %v1564_v51 = vperm.slane %v1270_v31, 5 }
 0x487   :  { %2053 = vst [vmem:[#allocation1 + $0x4] ss:$9 sm:$0xff] %v1531_v14  ;;  %v1565_v14 = vperm.slane %v1270_v31, 6 }
 0x488   :  { %2054 = vst [vmem:[#allocation1 + $0x5] ss:$9 sm:$0xff] %v1532_v62  ;;  %v1566_v62 = vperm.slane %v1270_v31, 7 }
 0x489   :  { %2055 = vst [vmem:[#allocation1 + $0x6] ss:$9 sm:$0xff] %v1533_v0  ;;  %v1397_v0 = vsel %vm1246_vm0, %v3933_v44, -inf  ;;  %v1276_v44 = vpop.xlane.xlu1 %1275 }
 0x48a   :  { %2056 = vst [vmem:[#allocation1 + $0x7] ss:$9 sm:$0xff] %v1534_v18  ;;  %1398 = vmax.xlane.f32.xlu0 %v1397_v0  ;;  %v1567_v18 = vperm.slane %v1273_v37, 0  ;;  %v1576_v9 = vperm.slane %v1276_v44, 1 }
 0x491   :  { %v4103_v5 = vld [vmem:[#allocation1] sm:$0xff] }
 0x492   :  { %2058 = vst [vmem:[#allocation1] ss:$9 sm:$0xff] %v1535_v7  ;;  %v1569_v7 = vperm.slane %v1273_v37, 2 }
 0x493   :  { %2059 = vst [vmem:[#allocation1 + $0x1] ss:$9 sm:$0xff] %v1536_v2  ;;  %v1570_v2 = vperm.slane %v1273_v37, 3 }
 0x494   :  { %2060 = vst [vmem:[#allocation1 + $0x2] ss:$9 sm:$0xff] %v1537_v30  ;;  %v1571_v30 = vperm.slane %v1273_v37, 4 }
 0x495   :  { %2061 = vst [vmem:[#allocation1 + $0x3] ss:$9 sm:$0xff] %v1538_v60  ;;  %v1572_v60 = vperm.slane %v1273_v37, 5 }
 0x496   :  { %2062 = vst [vmem:[#allocation1 + $0x4] ss:$9 sm:$0xff] %v1539_v58  ;;  %v1573_v58 = vperm.slane %v1273_v37, 6 }
 0x497   :  { %2063 = vst [vmem:[#allocation1 + $0x5] ss:$9 sm:$0xff] %v1540_v4  ;;  %v1574_v4 = vperm.slane %v1273_v37, 7 }
 0x498   :  { %2064 = vst [vmem:[#allocation1 + $0x6] ss:$9 sm:$0xff] %v1541_v35  ;;  %v1400_v35 = vsel %vm1246_vm0, %v3945_v52, -inf  ;;  %v1279_v52 = vpop.xlane.xlu2 %1278 }
 0x499   :  { %2065 = vst [vmem:[#allocation1 + $0x7] ss:$9 sm:$0xff] %v1542_v43  ;;  %1401 = vmax.xlane.f32.xlu1 %v1400_v35  ;;  %v1575_v43 = vperm.slane %v1276_v44, 0  ;;  %v1584_v13 = vperm.slane %v1279_v52, 1 }
 0x4a0   :  { %v4107_v57 = vld [vmem:[#allocation1] sm:$0xff] }
 0x4a1   :  { %2067 = vst [vmem:[#allocation1] ss:$9 sm:$0xff] %v1543_v26  ;;  %v1577_v26 = vperm.slane %v1276_v44, 2 }
 0x4a2   :  { %2068 = vst [vmem:[#allocation1 + $0x1] ss:$9 sm:$0xff] %v1544_v8  ;;  %v1578_v8 = vperm.slane %v1276_v44, 3 }
 0x4a3   :  { %2069 = vst [vmem:[#allocation1 + $0x2] ss:$9 sm:$0xff] %v1545_v61  ;;  %v1579_v61 = vperm.slane %v1276_v44, 4 }
 0x4a4   :  { %2070 = vst [vmem:[#allocation1 + $0x3] ss:$9 sm:$0xff] %v1546_v1  ;;  %v1580_v1 = vperm.slane %v1276_v44, 5 }
 0x4a5   :  { %2071 = vst [vmem:[#allocation1 + $0x4] ss:$9 sm:$0xff] %v1547_v20  ;;  %v1581_v20 = vperm.slane %v1276_v44, 6 }
 0x4a6   :  { %2072 = vst [vmem:[#allocation1 + $0x5] ss:$9 sm:$0xff] %v1548_v6  ;;  %v1582_v6 = vperm.slane %v1276_v44, 7 }
 0x4a7   :  { %2073 = vst [vmem:[#allocation1 + $0x6] ss:$9 sm:$0xff] %v1549_v11  ;;  %v1403_v11 = vsel %vm1246_vm0, %v3957_v48, -inf  ;;  %v1282_v48 = vpop.xlane.xlu0 %1281 }
 0x4a8   :  { %2074 = vst [vmem:[#allocation1 + $0x7] ss:$9 sm:$0xff] %v1550_v56  ;;  %1404 = vmax.xlane.f32.xlu2 %v1403_v11  ;;  %v1583_v56 = vperm.slane %v1279_v52, 0  ;;  %v1592_v28 = vperm.slane %v1282_v48, 1 }
 0x4af   :  { %v4111_v49 = vld [vmem:[#allocation1] sm:$0xff] }
 0x4b0   :  { %2076 = vst [vmem:[#allocation1] ss:$9 sm:$0xff] %v1551_v41  ;;  %v1585_v41 = vperm.slane %v1279_v52, 2 }
 0x4b1   :  { %2077 = vst [vmem:[#allocation1 + $0x1] ss:$9 sm:$0xff] %v1552_v38  ;;  %v1586_v38 = vperm.slane %v1279_v52, 3 }
 0x4b2   :  { %2078 = vst [vmem:[#allocation1 + $0x2] ss:$9 sm:$0xff] %v1553_v40  ;;  %v1587_v40 = vperm.slane %v1279_v52, 4 }
 0x4b3   :  { %2079 = vst [vmem:[#allocation1 + $0x3] ss:$9 sm:$0xff] %v1554_v16  ;;  %v1588_v16 = vperm.slane %v1279_v52, 5 }
 0x4b4   :  { %2080 = vst [vmem:[#allocation1 + $0x4] ss:$9 sm:$0xff] %v1555_v25  ;;  %v1589_v25 = vperm.slane %v1279_v52, 6 }
 0x4b5   :  { %2081 = vst [vmem:[#allocation1 + $0x5] ss:$9 sm:$0xff] %v1556_v42  ;;  %v1590_v42 = vperm.slane %v1279_v52, 7 }
 0x4b6   :  { %2082 = vst [vmem:[#allocation1 + $0x6] ss:$9 sm:$0xff] %v1557_v50  ;;  %v1406_v50 = vsel %vm1246_vm0, %v3969_v46, -inf  ;;  %v1285_v46 = vpop.xlane.xlu1 %1284 }
 0x4b7   :  { %2083 = vst [vmem:[#allocation1 + $0x7] ss:$9 sm:$0xff] %v1558_v39  ;;  %1407 = vmax.xlane.f32.xlu0 %v1406_v50  ;;  %v1591_v39 = vperm.slane %v1282_v48, 0  ;;  %v1600_v0 = vperm.slane %v1285_v46, 1 }
 0x4be   :  { %v4115_v24 = vld [vmem:[#allocation1] sm:$0xff] }
 0x4bf   :  { %2085 = vst [vmem:[#allocation1] ss:$9 sm:$0xff] %v1559_v32  ;;  %v1593_v32 = vperm.slane %v1282_v48, 2 }
 0x4c0   :  { %2086 = vst [vmem:[#allocation1 + $0x1] ss:$9 sm:$0xff] %v1560_v27  ;;  %v1594_v27 = vperm.slane %v1282_v48, 3 }
 0x4c1   :  { %2087 = vst [vmem:[#allocation1 + $0x2] ss:$9 sm:$0xff] %v1561_v54  ;;  %v1595_v54 = vperm.slane %v1282_v48, 4 }
 0x4c2   :  { %2088 = vst [vmem:[#allocation1 + $0x3] ss:$9 sm:$0xff] %v1562_v36  ;;  %v1596_v36 = vperm.slane %v1282_v48, 5 }
 0x4c3   :  { %2089 = vst [vmem:[#allocation1 + $0x4] ss:$9 sm:$0xff] %v1563_v55  ;;  %v1597_v55 = vperm.slane %v1282_v48, 6 }
 0x4c4   :  { %2090 = vst [vmem:[#allocation1 + $0x5] ss:$9 sm:$0xff] %v1564_v51  ;;  %v1598_v51 = vperm.slane %v1282_v48, 7 }
 0x4c5   :  { %2091 = vst [vmem:[#allocation1 + $0x6] ss:$9 sm:$0xff] %v1565_v14  ;;  %v1409_v14 = vsel %vm1246_vm0, %v3981_v19, -inf  ;;  %v1288_v19 = vpop.xlane.xlu2 %1287 }
 0x4c6   :  { %2092 = vst [vmem:[#allocation1 + $0x7] ss:$9 sm:$0xff] %v1566_v62  ;;  %1410 = vmax.xlane.f32.xlu1 %v1409_v14  ;;  %v1599_v62 = vperm.slane %v1285_v46, 0  ;;  %v1608_v35 = vperm.slane %v1288_v19, 1 }
 0x4cd   :  { %v4119_v22 = vld [vmem:[#allocation1] sm:$0xff] }
 0x4ce   :  { %2094 = vst [vmem:[#allocation1] ss:$9 sm:$0xff] %v1567_v18  ;;  %v1601_v18 = vperm.slane %v1285_v46, 2 }
 0x4cf   :  { %2095 = vst [vmem:[#allocation1 + $0x1] ss:$9 sm:$0xff] %v1568_v23  ;;  %v1602_v23 = vperm.slane %v1285_v46, 3 }
 0x4d0   :  { %2096 = vst [vmem:[#allocation1 + $0x2] ss:$9 sm:$0xff] %v1569_v7  ;;  %v1603_v7 = vperm.slane %v1285_v46, 4 }
 0x4d1   :  { %2097 = vst [vmem:[#allocation1 + $0x3] ss:$9 sm:$0xff] %v1570_v2  ;;  %v1604_v2 = vperm.slane %v1285_v46, 5 }
 0x4d2   :  { %2098 = vst [vmem:[#allocation1 + $0x4] ss:$9 sm:$0xff] %v1571_v30  ;;  %v1605_v30 = vperm.slane %v1285_v46, 6 }
 0x4d3   :  { %2099 = vst [vmem:[#allocation1 + $0x5] ss:$9 sm:$0xff] %v1572_v60  ;;  %v1606_v60 = vperm.slane %v1285_v46, 7 }
 0x4d4   :  { %2100 = vst [vmem:[#allocation1 + $0x6] ss:$9 sm:$0xff] %v1573_v58  ;;  %v1412_v58 = vsel %vm1246_vm0, %v3993_v45, -inf  ;;  %v1291_v45 = vpop.xlane.xlu0 %1290 }
 0x4d5   :  { %2101 = vst [vmem:[#allocation1 + $0x7] ss:$9 sm:$0xff] %v1574_v4  ;;  %1413 = vmax.xlane.f32.xlu2 %v1412_v58  ;;  %v1607_v4 = vperm.slane %v1288_v19, 0  ;;  %v1616_v11 = vperm.slane %v1291_v45, 1 }
 0x4dc   :  { %v4123_v47 = vld [vmem:[#allocation1] sm:$0xff] }
 0x4dd   :  { %2103 = vst [vmem:[#allocation1] ss:$9 sm:$0xff] %v1575_v43  ;;  %v1609_v43 = vperm.slane %v1288_v19, 2 }
 0x4de   :  { %2104 = vst [vmem:[#allocation1 + $0x1] ss:$9 sm:$0xff] %v1576_v9  ;;  %v1610_v9 = vperm.slane %v1288_v19, 3 }
 0x4df   :  { %2105 = vst [vmem:[#allocation1 + $0x2] ss:$9 sm:$0xff] %v1577_v26  ;;  %v1611_v26 = vperm.slane %v1288_v19, 4 }
 0x4e0   :  { %2106 = vst [vmem:[#allocation1 + $0x3] ss:$9 sm:$0xff] %v1578_v8  ;;  %v1612_v8 = vperm.slane %v1288_v19, 5 }
 0x4e1   :  { %2107 = vst [vmem:[#allocation1 + $0x4] ss:$9 sm:$0xff] %v1579_v61  ;;  %v1613_v61 = vperm.slane %v1288_v19, 6 }
 0x4e2   :  { %2108 = vst [vmem:[#allocation1 + $0x5] ss:$9 sm:$0xff] %v1580_v1  ;;  %v1614_v1 = vperm.slane %v1288_v19, 7 }
 0x4e3   :  { %2109 = vst [vmem:[#allocation1 + $0x6] ss:$9 sm:$0xff] %v1581_v20  ;;  %v1415_v20 = vsel %vm1246_vm0, %v4005_v53, -inf  ;;  %v1294_v53 = vpop.xlane.xlu1 %1293 }
 0x4e4   :  { %2110 = vst [vmem:[#allocation1 + $0x7] ss:$9 sm:$0xff] %v1582_v6  ;;  %1416 = vmax.xlane.f32.xlu0 %v1415_v20  ;;  %v1615_v6 = vperm.slane %v1291_v45, 0  ;;  %v1624_v50 = vperm.slane %v1294_v53, 1 }
 0x4eb   :  { %v4127_v17 = vld [vmem:[#allocation1] sm:$0xff] }
 0x4ec   :  { %2112 = vst [vmem:[#allocation1] ss:$9 sm:$0xff] %v1583_v56  ;;  %v1617_v56 = vperm.slane %v1291_v45, 2 }
 0x4ed   :  { %2113 = vst [vmem:[#allocation1 + $0x1] ss:$9 sm:$0xff] %v1584_v13  ;;  %v1618_v13 = vperm.slane %v1291_v45, 3 }
 0x4ee   :  { %2114 = vst [vmem:[#allocation1 + $0x2] ss:$9 sm:$0xff] %v1585_v41  ;;  %v1619_v41 = vperm.slane %v1291_v45, 4 }
 0x4ef   :  { %2115 = vst [vmem:[#allocation1 + $0x3] ss:$9 sm:$0xff] %v1586_v38  ;;  %v1620_v38 = vperm.slane %v1291_v45, 5 }
 0x4f0   :  { %2116 = vst [vmem:[#allocation1 + $0x4] ss:$9 sm:$0xff] %v1587_v40  ;;  %v1621_v40 = vperm.slane %v1291_v45, 6 }
 0x4f1   :  { %2117 = vst [vmem:[#allocation1 + $0x5] ss:$9 sm:$0xff] %v1588_v16  ;;  %v1622_v16 = vperm.slane %v1291_v45, 7 }
 0x4f2   :  { %2118 = vst [vmem:[#allocation1 + $0x6] ss:$9 sm:$0xff] %v1589_v25  ;;  %v1418_v25 = vsel %vm1246_vm0, %v4017_v63, -inf  ;;  %v1297_v63 = vpop.xlane.xlu2 %1296 }
 0x4f3   :  { %2119 = vst [vmem:[#allocation1 + $0x7] ss:$9 sm:$0xff] %v1590_v42  ;;  %1419 = vmax.xlane.f32.xlu1 %v1418_v25  ;;  %v1623_v42 = vperm.slane %v1294_v53, 0  ;;  %v1632_v14 = vperm.slane %v1297_v63, 1 }
 0x4fa   :  { %v4131_v31 = vld [vmem:[#allocation1] sm:$0xff] }
 0x4fb   :  { %2121 = vst [vmem:[#allocation1] ss:$9 sm:$0xff] %v1591_v39  ;;  %v1625_v39 = vperm.slane %v1294_v53, 2 }
 0x4fc   :  { %2122 = vst [vmem:[#allocation1 + $0x1] ss:$9 sm:$0xff] %v1592_v28  ;;  %v1626_v28 = vperm.slane %v1294_v53, 3 }
 0x4fd   :  { %2123 = vst [vmem:[#allocation1 + $0x2] ss:$9 sm:$0xff] %v1593_v32  ;;  %v1627_v32 = vperm.slane %v1294_v53, 4 }
 0x4fe   :  { %2124 = vst [vmem:[#allocation1 + $0x3] ss:$9 sm:$0xff] %v1594_v27  ;;  %v1628_v27 = vperm.slane %v1294_v53, 5 }
 0x4ff   :  { %2125 = vst [vmem:[#allocation1 + $0x4] ss:$9 sm:$0xff] %v1595_v54  ;;  %v1629_v54 = vperm.slane %v1294_v53, 6 }
 0x500   :  { %2126 = vst [vmem:[#allocation1 + $0x5] ss:$9 sm:$0xff] %v1596_v36  ;;  %v1630_v36 = vperm.slane %v1294_v53, 7  ;;  %v1436_v53 = vsel %vm1246_vm0, %v4087_v3, -inf }
 0x501   :  { %2127 = vst [vmem:[#allocation1 + $0x6] ss:$9 sm:$0xff] %v1597_v55  ;;  %v1421_v55 = vsel %vm1246_vm0, %v4029_v10, -inf  ;;  %v1300_v10 = vpop.xlane.xlu0 %1299 }
 0x502   :  { %2128 = vst [vmem:[#allocation1 + $0x7] ss:$9 sm:$0xff] %v1598_v51  ;;  %1422 = vmax.xlane.f32.xlu2 %v1421_v55  ;;  %v1631_v51 = vperm.slane %v1297_v63, 0  ;;  %v1640_v58 = vperm.slane %v1300_v10, 1 }
 0x509   :  { %v4135_v37 = vld [vmem:[#allocation1] sm:$0xff]  ;;  %v1309_v3 = vpop.xlane.xlu0 %1308 }
 0x50a   :  { %2130 = vst [vmem:[#allocation1] ss:$9 sm:$0xff] %v1599_v62  ;;  %v1633_v62 = vperm.slane %v1297_v63, 2 }
 0x50b   :  { %2131 = vst [vmem:[#allocation1 + $0x1] ss:$9 sm:$0xff] %v1600_v0  ;;  %v1634_v0 = vperm.slane %v1297_v63, 3 }
 0x50c   :  { %2132 = vst [vmem:[#allocation1 + $0x2] ss:$9 sm:$0xff] %v1601_v18  ;;  %v1635_v18 = vperm.slane %v1297_v63, 4 }
 0x50d   :  { %2133 = vst [vmem:[#allocation1 + $0x3] ss:$9 sm:$0xff] %v1602_v23  ;;  %v1636_v23 = vperm.slane %v1297_v63, 5 }
 0x50e   :  { %2134 = vst [vmem:[#allocation1 + $0x4] ss:$9 sm:$0xff] %v1603_v7  ;;  %v1637_v7 = vperm.slane %v1297_v63, 6 }
 0x50f   :  { %2135 = vst [vmem:[#allocation1 + $0x5] ss:$9 sm:$0xff] %v1604_v2  ;;  %v1638_v2 = vperm.slane %v1297_v63, 7  ;;  %v1663_v63 = vperm.slane %v1309_v3, 0 }
 0x510   :  { %2136 = vst [vmem:[#allocation1 + $0x6] ss:$9 sm:$0xff] %v1605_v30  ;;  %v1424_v30 = vsel %vm1246_vm0, %v4041_v59, -inf  ;;  %v1303_v59 = vpop.xlane.xlu1 %1302 }
 0x511   :  { %2137 = vst [vmem:[#allocation1 + $0x7] ss:$9 sm:$0xff] %v1606_v60  ;;  %1425 = vmax.xlane.f32.xlu0 %v1424_v30  ;;  %v1639_v60 = vperm.slane %v1300_v10, 0  ;;  %v1647_v45 = vperm.slane %v1303_v59, 0 }
 0x518   :  { %v4139_v44 = vld [vmem:[#allocation1] sm:$0xff] }
 0x519   :  { %2139 = vst [vmem:[#allocation1] ss:$9 sm:$0xff] %v1607_v4  ;;  %v1641_v4 = vperm.slane %v1300_v10, 2 }
 0x51a   :  { %2140 = vst [vmem:[#allocation1 + $0x1] ss:$9 sm:$0xff] %v1608_v35  ;;  %v1642_v35 = vperm.slane %v1300_v10, 3 }
 0x51b   :  { %2141 = vst [vmem:[#allocation1 + $0x2] ss:$9 sm:$0xff] %v1609_v43  ;;  %v1643_v43 = vperm.slane %v1300_v10, 4 }
 0x51c   :  { %2142 = vst [vmem:[#allocation1 + $0x3] ss:$9 sm:$0xff] %v1610_v9  ;;  %v1644_v9 = vperm.slane %v1300_v10, 5 }
 0x51d   :  { %2143 = vst [vmem:[#allocation1 + $0x4] ss:$9 sm:$0xff] %v1611_v26  ;;  %v1645_v26 = vperm.slane %v1300_v10, 6 }
 0x51e   :  { %2144 = vst [vmem:[#allocation1 + $0x5] ss:$9 sm:$0xff] %v1612_v8  ;;  %v1427_v8 = vsel %vm1246_vm0, %v4053_v15, -inf  ;;  %v1652_v15 = vperm.slane %v1303_v59, 5 }
 0x51f   :  { %2145 = vst [vmem:[#allocation1 + $0x6] ss:$9 sm:$0xff] %v1613_v61  ;;  %v1646_v61 = vperm.slane %v1300_v10, 7  ;;  %1428 = vmax.xlane.f32.xlu1 %v1427_v8 }
 0x520   :  { %2146 = vst [vmem:[#allocation1 + $0x7] ss:$9 sm:$0xff] %v1614_v1  ;;  %v1430_v1 = vsel %vm1246_vm0, %v4065_v29, -inf  ;;  %v1433_v29 = vsel %vm1246_vm0, %v4077_v21, -inf  ;;  %vm2949_vm0 = vcmask 1040384  }
 0x521   :  { %1431 = vmax.xlane.f32.xlu2 %v1430_v1  ;;  %1434 = vmax.xlane.f32.xlu0 %v1433_v29 }
 0x527   :  { %v4143_v52 = vld [vmem:[#allocation1] sm:$0xff]  ;;  %1437 = vmax.xlane.f32.xlu1 %v1436_v53 }
 0x528   :  { %2148 = vst [vmem:[#allocation1] ss:$9 sm:$0xff] %v1615_v6  ;;  %v1648_v6 = vperm.slane %v1303_v59, 1 }
 0x529   :  { %2149 = vst [vmem:[#allocation1 + $0x1] ss:$9 sm:$0xff] %v1616_v11  ;;  %v1649_v11 = vperm.slane %v1303_v59, 2 }
 0x52a   :  { %2150 = vst [vmem:[#allocation1 + $0x2] ss:$9 sm:$0xff] %v1617_v56  ;;  %v1650_v56 = vperm.slane %v1303_v59, 3 }
 0x52b   :  { %2151 = vst [vmem:[#allocation1 + $0x3] ss:$9 sm:$0xff] %v1618_v13  ;;  %v1651_v13 = vperm.slane %v1303_v59, 4 }
 0x52c   :  { %2152 = vst [vmem:[#allocation1 + $0x4] ss:$9 sm:$0xff] %v1619_v41  ;;  %v1653_v41 = vperm.slane %v1303_v59, 6 }
 0x52d   :  { %2153 = vst [vmem:[#allocation1 + $0x5] ss:$9 sm:$0xff] %v1620_v38  ;;  %v1654_v38 = vperm.slane %v1303_v59, 7 }
 0x52e   :  { %2154 = vst [vmem:[#allocation1 + $0x6] ss:$9 sm:$0xff] %v1621_v40  ;;  %v1306_v40 = vpop.xlane.xlu2 %1305 }
 0x52f   :  { %2155 = vst [vmem:[#allocation1 + $0x7] ss:$9 sm:$0xff] %v1622_v16  ;;  %v1655_v16 = vperm.slane %v1306_v40, 0  ;;  %v1661_v21 = vperm.slane %v1306_v40, 6 }
 0x536   :  { %v4147_v48 = vld [vmem:[#allocation1] sm:$0xff] }
 0x537   :  { %2157 = vst [vmem:[#allocation1] ss:$9 sm:$0xff] %v1623_v42  ;;  %v1656_v42 = vperm.slane %v1306_v40, 1 }
 0x538   :  { %2158 = vst [vmem:[#allocation1 + $0x1] ss:$9 sm:$0xff] %v1624_v50  ;;  %v1657_v50 = vperm.slane %v1306_v40, 2 }
 0x539   :  { %2159 = vst [vmem:[#allocation1 + $0x2] ss:$9 sm:$0xff] %v1625_v39  ;;  %v1658_v39 = vperm.slane %v1306_v40, 3 }
 0x53a   :  { %2160 = vst [vmem:[#allocation1 + $0x3] ss:$9 sm:$0xff] %v1626_v28  ;;  %v1659_v28 = vperm.slane %v1306_v40, 4 }
 0x53b   :  { %2161 = vst [vmem:[#allocation1 + $0x4] ss:$9 sm:$0xff] %v1627_v32  ;;  %v1660_v32 = vperm.slane %v1306_v40, 5 }
 0x53c   :  { %2162 = vst [vmem:[#allocation1 + $0x5] ss:$9 sm:$0xff] %v1628_v27  ;;  %v1662_v27 = vperm.slane %v1306_v40, 7 }
 0x53d   :  { %2163 = vst [vmem:[#allocation1 + $0x6] ss:$9 sm:$0xff] %v1629_v54  ;;  %v3099_v54 = vmov 0  }
 0x53e   :  { %2164 = vst [vmem:[#allocation1 + $0x7] ss:$9 sm:$0xff] %v1630_v36  ;;  %3012 = vset.pattern.permute.xlu2 %v3099_v54  ;;  %3013 = vset.pattern.permute.xlu0 %v3099_v54  ;;  %v4171_v36 = vpop.xlane.xlu2 %1314 }
 0x53f   :  { %2599 = vperm.xlu2 %3012, %v4091_v34   ;;  %3014 = vset.pattern.permute.xlu1 %v3099_v54  ;;  %v1668_v34 = vperm.slane %v1309_v3, 5 }
 0x540   :  { %2602 = vperm.xlu0 %3013, %v4095_v12   ;;  %v1669_v12 = vperm.slane %v1309_v3, 6  ;;  %2605 = vperm.xlu1 %3014, %v4099_v33  }
 0x545   :  { %v4151_v46 = vld [vmem:[#allocation1] sm:$0xff] }
 0x546   :  { %2166 = vst [vmem:[#allocation1] ss:$9 sm:$0xff] %v1631_v51  ;;  %v1664_v51 = vperm.slane %v1309_v3, 1 }
 0x547   :  { %2167 = vst [vmem:[#allocation1 + $0x1] ss:$9 sm:$0xff] %v1632_v14  ;;  %v1665_v14 = vperm.slane %v1309_v3, 2  ;;  %2608 = vperm.xlu2 %3012, %v4103_v5  }
 0x548   :  { %2168 = vst [vmem:[#allocation1 + $0x2] ss:$9 sm:$0xff] %v1633_v62  ;;  %v1666_v62 = vperm.slane %v1309_v3, 3  ;;  %2623 = vperm.xlu0 %3013, %v4123_v47   ;;  %2611 = vperm.xlu1 %3014, %v4107_v57  }
 0x549   :  { %2169 = vst [vmem:[#allocation1 + $0x3] ss:$9 sm:$0xff] %v1634_v0  ;;  %v4176_v0 = vpop.xlane.xlu0 %1317 }
 0x54a   :  { %2170 = vst [vmem:[#allocation1 + $0x4] ss:$9 sm:$0xff] %v1635_v18  ;;  %v1667_v18 = vperm.slane %v1309_v3, 4  ;;  %v1688_v29 = vperm.slane %v4176_v0, 1  ;;  %v1689_v40 = vperm.slane %v4176_v0, 2  ;;  %v1690_v53 = vperm.slane %v4176_v0, 3 }
 0x54b   :  { %2171 = vst [vmem:[#allocation1 + $0x5] ss:$9 sm:$0xff] %v1636_v23  ;;  %v1312_v23 = vpop.xlane.xlu1 %1311 }
 0x54c   :  { %2172 = vst [vmem:[#allocation1 + $0x6] ss:$9 sm:$0xff] %v1637_v7  ;;  %v1670_v7 = vperm.slane %v1309_v3, 7  ;;  %v1671_v30 = vperm.slane %v1312_v23, 0  ;;  %v1676_v33 = vperm.slane %v1312_v23, 5 }
 0x54d   :  { %2173 = vst [vmem:[#allocation1 + $0x7] ss:$9 sm:$0xff] %v1638_v2  ;;  %v4179_v2 = vpop.xlane.xlu2 %1323 }
 0x54f   :  { %2614 = vperm.xlu2 %3012, %v4111_v49   ;;  %v1675_v49 = vperm.slane %v1312_v23, 4 }
 0x550   :  { %2632 = vperm.xlu0 %3013, %v4135_v37   ;;  %v1677_v37 = vperm.slane %v1312_v23, 6  ;;  %2617 = vperm.xlu1 %3014, %v4115_v24   ;;  %v1683_v24 = vperm.slane %v4171_v36, 4 }
 0x551   :  { %v4182_v5 = vpop.xlane.xlu0 %1326 }
 0x553   :  { %v4185_v10 = vpop.xlane.xlu1 %1320 }
 0x554   :  { %v4155_v19 = vld [vmem:[#allocation1] sm:$0xff]  ;;  %v1696_v3 = vperm.slane %v4185_v10, 1 }
 0x555   :  { %2175 = vst [vmem:[#allocation1] ss:$9 sm:$0xff] %v1639_v60  ;;  %v4188_v60 = vpop.xlane.xlu2 %1332 }
 0x556   :  { %2176 = vst [vmem:[#allocation1 + $0x1] ss:$9 sm:$0xff] %v1640_v58  ;;  %v1672_v58 = vperm.slane %v1312_v23, 1 }
 0x557   :  { %2177 = vst [vmem:[#allocation1 + $0x2] ss:$9 sm:$0xff] %v1641_v4  ;;  %v1673_v4 = vperm.slane %v1312_v23, 2  ;;  %2620 = vperm.xlu2 %3012, %v4119_v22  }
 0x558   :  { %2178 = vst [vmem:[#allocation1 + $0x3] ss:$9 sm:$0xff] %v1642_v35  ;;  %v1674_v35 = vperm.slane %v1312_v23, 3  ;;  %2641 = vperm.xlu0 %3013, %v4147_v48   ;;  %v1680_v48 = vperm.slane %v4171_v36, 1  ;;  %2626 = vperm.xlu1 %3014, %v4127_v17   ;;  %v1687_v17 = vperm.slane %v4176_v0, 0 }
 0x559   :  { %2179 = vst [vmem:[#allocation1 + $0x4] ss:$9 sm:$0xff] %v1643_v43  ;;  %v4191_v43 = vpop.xlane.xlu0 %1335 }
 0x55a   :  { %2180 = vst [vmem:[#allocation1 + $0x5] ss:$9 sm:$0xff] %v1644_v9 }
 0x55b   :  { %2181 = vst [vmem:[#allocation1 + $0x6] ss:$9 sm:$0xff] %v1645_v26  ;;  %v4194_v9 = vpop.xlane.xlu1 %1329  ;;  %v1678_v26 = vperm.slane %v1312_v23, 7  ;;  %v1703_v23 = vperm.slane %v4179_v2, 0 }
 0x55c   :  { %2182 = vst [vmem:[#allocation1 + $0x7] ss:$9 sm:$0xff] %v1646_v61  ;;  %v1679_v61 = vperm.slane %v4171_v36, 0 }
 0x55d   :  { %v4197_v8 = vpop.xlane.xlu2 %1341 }
 0x55f   :  { %2629 = vperm.xlu2 %3012, %v4131_v31   ;;  %v1682_v31 = vperm.slane %v4171_v36, 3 }
 0x560   :  { %2635 = vperm.xlu1 %3014, %v4139_v44   ;;  %v1692_v44 = vperm.slane %v4176_v0, 5 }
 0x561   :  { %v4200_v22 = vpop.xlane.xlu0 %1344 }
 0x563   :  { %v4161_v20 = vld [vmem:[#allocation1] sm:$0xff]  ;;  %v4203_v57 = vpop.xlane.xlu1 %1338 }
 0x564   :  { %2184 = vst [vmem:[#allocation1] ss:$9 sm:$0xff] %v1647_v45  ;;  %2650 = vperm.xlu0 %3013, %v4161_v20   ;;  %v1681_v45 = vperm.slane %v4171_v36, 2 }
 0x565   :  { %2185 = vst [vmem:[#allocation1 + $0x1] ss:$9 sm:$0xff] %v1648_v6  ;;  %v4210_v1 = vpop.xlane.xlu2 %1350  ;;  %v1684_v6 = vperm.slane %v4171_v36, 5 }
 0x566   :  { %2186 = vst [vmem:[#allocation1 + $0x2] ss:$9 sm:$0xff] %v1649_v11  ;;  %v1685_v11 = vperm.slane %v4171_v36, 6 }
 0x567   :  { %2187 = vst [vmem:[#allocation1 + $0x3] ss:$9 sm:$0xff] %v1650_v56  ;;  %2638 = vperm.xlu2 %3012, %v4143_v52   ;;  %v1686_v56 = vperm.slane %v4171_v36, 7  ;;  %v1697_v36 = vperm.slane %v4185_v10, 2 }
 0x568   :  { %2188 = vst [vmem:[#allocation1 + $0x4] ss:$9 sm:$0xff] %v1651_v13  ;;  %2644 = vperm.xlu1 %3014, %v4151_v46  }
 0x569   :  { %2189 = vst [vmem:[#allocation1 + $0x5] ss:$9 sm:$0xff] %v1652_v15  ;;  %v4217_v20 = vpop.xlane.xlu0 %1353 }
 0x56a   :  { %2190 = vst [vmem:[#allocation1 + $0x6] ss:$9 sm:$0xff] %v1653_v41 }
 0x56b   :  { %2191 = vst [vmem:[#allocation1 + $0x7] ss:$9 sm:$0xff] %v1654_v38  ;;  %v4222_v13 = vpop.xlane.xlu1 %1347 }
 0x56d   :  { %v4224_v15 = vpop.xlane.xlu2 %1359 }
 0x56f   :  { %2647 = vperm.xlu2 %3012, %v4155_v19   ;;  %v1691_v19 = vperm.slane %v4176_v0, 4 }
 0x571   :  { %v4227_v52 = vpop.xlane.xlu0 %1362 }
 0x572   :  { %v4167_v25 = vld [vmem:[#allocation1] sm:$0xff] }
 0x573   :  { %2193 = vst [vmem:[#allocation1] ss:$9 sm:$0xff] %v1655_v16  ;;  %v4231_v41 = vpop.xlane.xlu1 %1356  ;;  %2653 = vperm.xlu1 %3014, %v4167_v25   ;;  %v1700_v25 = vperm.slane %v4185_v10, 5 }
 0x574   :  { %2194 = vst [vmem:[#allocation1 + $0x1] ss:$9 sm:$0xff] %v1656_v42  ;;  %v1693_v42 = vperm.slane %v4176_v0, 6 }
 0x575   :  { %2195 = vst [vmem:[#allocation1 + $0x2] ss:$9 sm:$0xff] %v1657_v50  ;;  %v4235_v16 = vpop.xlane.xlu2 %1368 }
 0x576   :  { %2196 = vst [vmem:[#allocation1 + $0x3] ss:$9 sm:$0xff] %v1658_v39  ;;  %v1694_v39 = vperm.slane %v4176_v0, 7 }
 0x577   :  { %2197 = vst [vmem:[#allocation1 + $0x4] ss:$9 sm:$0xff] %v1659_v28 }
 0x578   :  { %2198 = vst [vmem:[#allocation1 + $0x5] ss:$9 sm:$0xff] %v1660_v32 }
 0x579   :  { %2199 = vst [vmem:[#allocation1 + $0x6] ss:$9 sm:$0xff] %v1661_v21  ;;  %v4242_v50 = vpop.xlane.xlu0 %1371 }
 0x57a   :  { %2200 = vst [vmem:[#allocation1 + $0x7] ss:$9 sm:$0xff] %v1662_v27  ;;  %v1695_v27 = vperm.slane %v4185_v10, 0 }
 0x57b   :  { %v4246_v28 = vpop.xlane.xlu1 %1365 }
 0x57d   :  { %v4248_v32 = vpop.xlane.xlu2 %1377 }
 0x581   :  { %v4173_v55 = vld [vmem:[#allocation1] sm:$0xff]  ;;  %v4250_v21 = vpop.xlane.xlu0 %1380 }
 0x582   :  { %2202 = vst [vmem:[#allocation1] ss:$9 sm:$0xff] %v1663_v63  ;;  %2656 = vperm.xlu2 %3012, %v4173_v55   ;;  %v1698_v63 = vperm.slane %v4185_v10, 3 }
 0x583   :  { %2203 = vst [vmem:[#allocation1 + $0x1] ss:$9 sm:$0xff] %v1664_v51  ;;  %v4255_v46 = vpop.xlane.xlu1 %1374  ;;  %v1699_v51 = vperm.slane %v4185_v10, 4 }
 0x584   :  { %2204 = vst [vmem:[#allocation1 + $0x2] ss:$9 sm:$0xff] %v1665_v14  ;;  %v1701_v14 = vperm.slane %v4185_v10, 6 }
 0x585   :  { %2205 = vst [vmem:[#allocation1 + $0x3] ss:$9 sm:$0xff] %v1666_v62  ;;  %v4259_v55 = vpop.xlane.xlu2 %1386  ;;  %v1702_v62 = vperm.slane %v4185_v10, 7  ;;  %v1705_v10 = vperm.slane %v4179_v2, 2 }
 0x586   :  { %2206 = vst [vmem:[#allocation1 + $0x4] ss:$9 sm:$0xff] %v1667_v18 }
 0x587   :  { %2207 = vst [vmem:[#allocation1 + $0x5] ss:$9 sm:$0xff] %v1668_v34 }
 0x588   :  { %2208 = vst [vmem:[#allocation1 + $0x6] ss:$9 sm:$0xff] %v1669_v12 }
 0x589   :  { %2209 = vst [vmem:[#allocation1 + $0x7] ss:$9 sm:$0xff] %v1670_v7  ;;  %v4265_v0 = vpop.xlane.xlu0 %1389 }
 0x58b   :  { %v4268_v18 = vpop.xlane.xlu1 %1383 }
 0x58d   :  { %v4270_v34 = vpop.xlane.xlu2 %1395 }
 0x590   :  { %v2210_v47 = vld [vmem:[#allocation1] sm:$0xff] }
 0x591   :  { %2211 = vst [vmem:[#allocation1] ss:$9 sm:$0xff] %v1671_v30  ;;  %2659 = vperm.xlu0 %3013, %v2210_v47   ;;  %v4273_v12 = vpop.xlane.xlu0 %1398  ;;  %v1704_v30 = vperm.slane %v4179_v2, 1 }
 0x592   :  { %2212 = vst [vmem:[#allocation1 + $0x1] ss:$9 sm:$0xff] %v1672_v58  ;;  %v1706_v58 = vperm.slane %v4179_v2, 3 }
 0x593   :  { %2213 = vst [vmem:[#allocation1 + $0x2] ss:$9 sm:$0xff] %v1673_v4  ;;  %v4277_v47 = vpop.xlane.xlu1 %1392  ;;  %v1707_v4 = vperm.slane %v4179_v2, 4 }
 0x594   :  { %2214 = vst [vmem:[#allocation1 + $0x3] ss:$9 sm:$0xff] %v1674_v35 }
 0x595   :  { %2215 = vst [vmem:[#allocation1 + $0x4] ss:$9 sm:$0xff] %v1675_v49  ;;  %v4281_v35 = vpop.xlane.xlu2 %1404  ;;  %v1708_v49 = vperm.slane %v4179_v2, 5 }
 0x596   :  { %2216 = vst [vmem:[#allocation1 + $0x5] ss:$9 sm:$0xff] %v1676_v33  ;;  %v1709_v33 = vperm.slane %v4179_v2, 6 }
 0x597   :  { %2217 = vst [vmem:[#allocation1 + $0x6] ss:$9 sm:$0xff] %v1677_v37  ;;  %v1710_v37 = vperm.slane %v4179_v2, 7  ;;  %v1714_v2 = vperm.slane %v4182_v5, 3 }
 0x598   :  { %2218 = vst [vmem:[#allocation1 + $0x7] ss:$9 sm:$0xff] %v1678_v26 }
 0x599   :  { %v4286_v26 = vpop.xlane.xlu0 %1407 }
 0x59f   :  { %v4207_v59 = vld [vmem:[#allocation1] sm:$0xff] }
 0x5a0   :  { %2220 = vst [vmem:[#allocation1] ss:$9 sm:$0xff] %v1679_v61  ;;  %2662 = vperm.xlu1 %3014, %v4207_v59   ;;  %v4288_v61 = vpop.xlane.xlu1 %1401  ;;  %v4290_v59 = vpop.xlane.xlu2 %1413 }
 0x5a1   :  { %2221 = vst [vmem:[#allocation1 + $0x1] ss:$9 sm:$0xff] %v1680_v48  ;;  %v1711_v48 = vperm.slane %v4182_v5, 0 }
 0x5a2   :  { %2222 = vst [vmem:[#allocation1 + $0x2] ss:$9 sm:$0xff] %v1681_v45 }
 0x5a3   :  { %2223 = vst [vmem:[#allocation1 + $0x3] ss:$9 sm:$0xff] %v1682_v31  ;;  %v1712_v31 = vperm.slane %v4182_v5, 1 }
 0x5a4   :  { %2224 = vst [vmem:[#allocation1 + $0x4] ss:$9 sm:$0xff] %v1683_v24  ;;  %v4294_v24 = vpop.xlane.xlu0 %1416 }
 0x5a5   :  { %2225 = vst [vmem:[#allocation1 + $0x5] ss:$9 sm:$0xff] %v1684_v6  ;;  %v1713_v6 = vperm.slane %v4182_v5, 2 }
 0x5a6   :  { %2226 = vst [vmem:[#allocation1 + $0x6] ss:$9 sm:$0xff] %v1685_v11 }
 0x5a7   :  { %2227 = vst [vmem:[#allocation1 + $0x7] ss:$9 sm:$0xff] %v1686_v56  ;;  %v1715_v56 = vperm.slane %v4182_v5, 4 }
 0x5a8   :  { %v4298_v11 = vpop.xlane.xlu1 %1410 }
 0x5ae   :  { %v2228_v38 = vld [vmem:[#allocation1] sm:$0xff] }
 0x5af   :  { %2229 = vst [vmem:[#allocation1] ss:$9 sm:$0xff] %v1687_v17  ;;  %2665 = vperm.xlu2 %3012, %v2228_v38   ;;  %v1716_v17 = vperm.slane %v4182_v5, 5  ;;  %v4302_v38 = vpop.xlane.xlu2 %1422 }
 0x5b0   :  { %2230 = vst [vmem:[#allocation1 + $0x1] ss:$9 sm:$0xff] %v1688_v29  ;;  %v1717_v29 = vperm.slane %v4182_v5, 6 }
 0x5b1   :  { %2231 = vst [vmem:[#allocation1 + $0x2] ss:$9 sm:$0xff] %v1689_v40  ;;  %v1718_v40 = vperm.slane %v4182_v5, 7  ;;  %v1722_v5 = vperm.slane %v4194_v9, 3 }
 0x5b2   :  { %2232 = vst [vmem:[#allocation1 + $0x3] ss:$9 sm:$0xff] %v1690_v53  ;;  %v4306_v53 = vpop.xlane.xlu0 %1425 }
 0x5b3   :  { %2233 = vst [vmem:[#allocation1 + $0x4] ss:$9 sm:$0xff] %v1691_v19  ;;  %v4308_v19 = vpop.xlane.xlu1 %1419 }
 0x5b4   :  { %2234 = vst [vmem:[#allocation1 + $0x5] ss:$9 sm:$0xff] %v1692_v44 }
 0x5b5   :  { %2235 = vst [vmem:[#allocation1 + $0x6] ss:$9 sm:$0xff] %v1693_v42  ;;  %v1719_v42 = vperm.slane %v4194_v9, 0 }
 0x5b6   :  { %2236 = vst [vmem:[#allocation1 + $0x7] ss:$9 sm:$0xff] %v1694_v39 }
 0x5b7   :  { %v4310_v44 = vpop.xlane.xlu2 %1431 }
 0x5bd   :  { %v2237_v54 = vld [vmem:[#allocation1] sm:$0xff] }
 0x5be   :  { %2238 = vst [vmem:[#allocation1] ss:$9 sm:$0xff] %v1695_v27  ;;  %2668 = vperm.xlu0 %3013, %v2237_v54   ;;  %v1720_v27 = vperm.slane %v4194_v9, 1  ;;  %v1721_v54 = vperm.slane %v4194_v9, 2 }
 0x5bf   :  { %2239 = vst [vmem:[#allocation1 + $0x1] ss:$9 sm:$0xff] %v1696_v3  ;;  %v4315_v3 = vpop.xlane.xlu0 %1434 }
 0x5c0   :  { %2240 = vst [vmem:[#allocation1 + $0x2] ss:$9 sm:$0xff] %v1697_v36  ;;  %v2790_v36 = vlaneseq }
 0x5c1   :  { %2241 = vst [vmem:[#allocation1 + $0x3] ss:$9 sm:$0xff] %v1698_v63  ;;  %v1723_v63 = vperm.slane %v4194_v9, 4 }
 0x5c2   :  { %2242 = vst [vmem:[#allocation1 + $0x4] ss:$9 sm:$0xff] %v1699_v51  ;;  %v4319_v51 = vpop.xlane.xlu1 %1428 }
 0x5c3   :  { %2243 = vst [vmem:[#allocation1 + $0x5] ss:$9 sm:$0xff] %v1700_v25  ;;  %v1724_v25 = vperm.slane %v4194_v9, 5 }
 0x5c4   :  { %2244 = vst [vmem:[#allocation1 + $0x6] ss:$9 sm:$0xff] %v1701_v14  ;;  %v1725_v14 = vperm.slane %v4194_v9, 6 }
 0x5c5   :  { %2245 = vst [vmem:[#allocation1 + $0x7] ss:$9 sm:$0xff] %v1702_v62  ;;  %v1726_v62 = vperm.slane %v4194_v9, 7 }
 0x5cc   :  { %v2246_v7 = vld [vmem:[#allocation1] sm:$0xff] }
 0x5cd   :  { %2247 = vst [vmem:[#allocation1] ss:$9 sm:$0xff] %v1703_v23  ;;  %2671 = vperm.xlu1 %3014, %v2246_v7   ;;  %v4325_v23 = vand.u32 127, %v2790_v36  ;;  %v2600_v7 = vpop.permute.xlu2 %2599 }
 0x5ce   :  { %2248 = vst [vmem:[#allocation1 + $0x1] ss:$9 sm:$0xff] %v1704_v30 }
 0x5cf   :  { %2249 = vst [vmem:[#allocation1 + $0x2] ss:$9 sm:$0xff] %v1705_v10  ;;  %v4328_v30 = vadd.s32 4294967288, %v4325_v23  ;;  %v2603_v10 = vpop.permute.xlu0 %2602 }
 0x5d0   :  { %2250 = vst [vmem:[#allocation1 + $0x3] ss:$9 sm:$0xff] %v1706_v58  ;;  %v2792_v58 = vperm.slane %v2600_v7, %v4325_v23  ;;  %v1737_v7 = vperm.slane %v4191_v43, 2 }
 0x5d1   :  { %2251 = vst [vmem:[#allocation1 + $0x4] ss:$9 sm:$0xff] %v1707_v4  ;;  %v2794_v4 = vperm.slane %v2603_v10, %v4328_v30  ;;  %v1738_v10 = vperm.slane %v4191_v43, 3 }
 0x5d2   :  { %2252 = vst [vmem:[#allocation1 + $0x5] ss:$9 sm:$0xff] %v1708_v49  ;;  %v4332_v49 = vpop.xlane.xlu1 %1437 }
 0x5d3   :  { %2253 = vst [vmem:[#allocation1 + $0x6] ss:$9 sm:$0xff] %v1709_v33  ;;  %v2796_v9 = vsel %vm2795_vm1, %v2794_v4, %v2792_v58  ;;  %v1727_v33 = vperm.slane %v4188_v60, 0  ;;  %v4361_v4 = vadd.s32 4294967264, %v4325_v23 }
 0x5d4   :  { %2254 = vst [vmem:[#allocation1 + $0x7] ss:$9 sm:$0xff] %v1710_v37 }
 0x5db   :  { %v2255_v45 = vld [vmem:[#allocation1] sm:$0xff] }
 0x5dc   :  { %2256 = vst [vmem:[#allocation1] ss:$9 sm:$0xff] %v1711_v48  ;;  %2674 = vperm.xlu2 %3012, %v2255_v45   ;;  %v1728_v48 = vperm.slane %v4188_v60, 1  ;;  %v1729_v45 = vperm.slane %v4188_v60, 2 }
 0x5dd   :  { %2257 = vst [vmem:[#allocation1 + $0x1] ss:$9 sm:$0xff] %v1712_v31  ;;  %v1730_v31 = vperm.slane %v4188_v60, 3 }
 0x5de   :  { %2258 = vst [vmem:[#allocation1 + $0x2] ss:$9 sm:$0xff] %v1713_v6  ;;  %v4340_v6 = vadd.s32 4294967272, %v4325_v23 }
 0x5df   :  { %2259 = vst [vmem:[#allocation1 + $0x3] ss:$9 sm:$0xff] %v1714_v2  ;;  %v1731_v2 = vperm.slane %v4188_v60, 4 }
 0x5e0   :  { %2260 = vst [vmem:[#allocation1 + $0x4] ss:$9 sm:$0xff] %v1715_v56  ;;  %v2609_v56 = vpop.permute.xlu2 %2608 }
 0x5e1   :  { %2261 = vst [vmem:[#allocation1 + $0x5] ss:$9 sm:$0xff] %v1716_v17  ;;  %v4344_v17 = vadd.s32 4294967280, %v4325_v23 }
 0x5e2   :  { %2262 = vst [vmem:[#allocation1 + $0x6] ss:$9 sm:$0xff] %v1717_v29  ;;  %v1732_v29 = vperm.slane %v4188_v60, 5 }
 0x5e3   :  { %2263 = vst [vmem:[#allocation1 + $0x7] ss:$9 sm:$0xff] %v1718_v40  ;;  %v2606_v40 = vpop.permute.xlu1 %2605 }
 0x5e8   :  { %v2615_v58 = vpop.permute.xlu2 %2614 }
 0x5ea   :  { %v2264_v39 = vld [vmem:[#allocation1] sm:$0xff] }
 0x5eb   :  { %2265 = vst [vmem:[#allocation1] ss:$9 sm:$0xff] %v1719_v42  ;;  %2677 = vperm.xlu0 %3013, %v2264_v39   ;;  %v1733_v42 = vperm.slane %v4188_v60, 6  ;;  %v2798_v39 = vperm.slane %v2606_v40, %v4344_v17  ;;  %v1743_v40 = vperm.slane %v4203_v57, 0 }
 0x5ec   :  { %2266 = vst [vmem:[#allocation1 + $0x1] ss:$9 sm:$0xff] %v1720_v27  ;;  %v1734_v27 = vperm.slane %v4188_v60, 7  ;;  %v4357_v60 = vadd.s32 4294967256, %v4325_v23 }
 0x5ed   :  { %2267 = vst [vmem:[#allocation1 + $0x2] ss:$9 sm:$0xff] %v1721_v54  ;;  %v2802_v54 = vperm.slane %v2609_v56, %v4340_v6 }
 0x5ee   :  { %2268 = vst [vmem:[#allocation1 + $0x3] ss:$9 sm:$0xff] %v1722_v5  ;;  %v2800_v5 = vsel %vm2799_vm2, %v2798_v39, %v2796_v9  ;;  %v1739_v9 = vperm.slane %v4191_v43, 4  ;;  %v1744_v39 = vperm.slane %v4203_v57, 1 }
 0x5ef   :  { %2269 = vst [vmem:[#allocation1 + $0x4] ss:$9 sm:$0xff] %v1723_v63  ;;  %v2804_v63 = vsel %vm2803_vm3, %v2802_v54, %v2800_v5  ;;  %v1746_v54 = vperm.slane %v4203_v57, 3  ;;  %v1747_v5 = vperm.slane %v4203_v57, 4 }
 0x5f0   :  { %2270 = vst [vmem:[#allocation1 + $0x5] ss:$9 sm:$0xff] %v1724_v25  ;;  %v1735_v25 = vperm.slane %v4191_v43, 0 }
 0x5f1   :  { %2271 = vst [vmem:[#allocation1 + $0x6] ss:$9 sm:$0xff] %v1725_v14 }
 0x5f2   :  { %2272 = vst [vmem:[#allocation1 + $0x7] ss:$9 sm:$0xff] %v1726_v62  ;;  %v1736_v62 = vperm.slane %v4191_v43, 1 }
 0x5f9   :  { %v2273_v37 = vld [vmem:[#allocation1] sm:$0xff] }
 0x5fa   :  { %2274 = vst [vmem:[#allocation1] ss:$9 sm:$0xff] %v1727_v33  ;;  %2680 = vperm.xlu1 %3014, %v2273_v37   ;;  %v2612_v33 = vpop.permute.xlu1 %2611  ;;  %v1740_v37 = vperm.slane %v4191_v43, 5 }
 0x5fb   :  { %2275 = vst [vmem:[#allocation1 + $0x1] ss:$9 sm:$0xff] %v1728_v48  ;;  %v2806_v48 = vperm.slane %v2612_v33, %v4361_v4 }
 0x5fc   :  { %2276 = vst [vmem:[#allocation1 + $0x2] ss:$9 sm:$0xff] %v1729_v45  ;;  %v1741_v45 = vperm.slane %v4191_v43, 6 }
 0x5fd   :  { %2277 = vst [vmem:[#allocation1 + $0x3] ss:$9 sm:$0xff] %v1730_v31  ;;  %v2810_v31 = vperm.slane %v2615_v58, %v4357_v60  ;;  %v2808_v56 = vsel %vm2807_vm4, %v2806_v48, %v2804_v63  ;;  %v2621_v63 = vpop.permute.xlu2 %2620  ;;  %v1750_v58 = vperm.slane %v4203_v57, 7  ;;  %v1751_v48 = vperm.slane %v4197_v8, 0 }
 0x5fe   :  { %2278 = vst [vmem:[#allocation1 + $0x4] ss:$9 sm:$0xff] %v1731_v2  ;;  %v1742_v2 = vperm.slane %v4191_v43, 7  ;;  %v4376_v43 = vadd.s32 4294967240, %v4325_v23 }
 0x5ff   :  { %2279 = vst [vmem:[#allocation1 + $0x5] ss:$9 sm:$0xff] %v1732_v29  ;;  %v2812_v29 = vsel %vm2811_vm5, %v2810_v31, %v2808_v56  ;;  %v1752_v31 = vperm.slane %v4197_v8, 1  ;;  %v1755_v56 = vperm.slane %v4197_v8, 4 }
 0x600   :  { %2280 = vst [vmem:[#allocation1 + $0x6] ss:$9 sm:$0xff] %v1733_v42 }
 0x601   :  { %2281 = vst [vmem:[#allocation1 + $0x7] ss:$9 sm:$0xff] %v1734_v27  ;;  %v1745_v27 = vperm.slane %v4203_v57, 2 }
 0x608   :  { %v2282_v14 = vld [vmem:[#allocation1] sm:$0xff] }
 0x609   :  { %2283 = vst [vmem:[#allocation1] ss:$9 sm:$0xff] %v1735_v25  ;;  %2683 = vperm.xlu2 %3012, %v2282_v14   ;;  %v4380_v25 = vadd.s32 4294967248, %v4325_v23  ;;  %v1748_v14 = vperm.slane %v4203_v57, 5 }
 0x60a   :  { %2284 = vst [vmem:[#allocation1 + $0x1] ss:$9 sm:$0xff] %v1736_v62  ;;  %v2618_v62 = vpop.permute.xlu1 %2617 }
 0x60b   :  { %2285 = vst [vmem:[#allocation1 + $0x2] ss:$9 sm:$0xff] %v1737_v7  ;;  %v1749_v7 = vperm.slane %v4203_v57, 6  ;;  %v1754_v57 = vperm.slane %v4197_v8, 3 }
 0x60c   :  { %2286 = vst [vmem:[#allocation1 + $0x3] ss:$9 sm:$0xff] %v1738_v10  ;;  %v2814_v10 = vperm.slane %v2618_v62, %v4380_v25  ;;  %v4406_v62 = vadd.s32 4294967224, %v4325_v23 }
 0x60d   :  { %2287 = vst [vmem:[#allocation1 + $0x4] ss:$9 sm:$0xff] %v1739_v9  ;;  %v2818_v9 = vperm.slane %v2621_v63, %v4376_v43  ;;  %v4403_v63 = vadd.s32 4294967216, %v4325_v23 }
 0x60e   :  { %2288 = vst [vmem:[#allocation1 + $0x5] ss:$9 sm:$0xff] %v1740_v37  ;;  %v2816_v33 = vsel %vm2815_vm6, %v2814_v10, %v2812_v29  ;;  %v1756_v29 = vperm.slane %v4197_v8, 5  ;;  %v1759_v10 = vperm.slane %v4200_v22, 0 }
 0x60f   :  { %2289 = vst [vmem:[#allocation1 + $0x6] ss:$9 sm:$0xff] %v1741_v45  ;;  %v2820_v37 = vsel %vm2819_vm7, %v2818_v9, %v2816_v33  ;;  %v1760_v9 = vperm.slane %v4200_v22, 1 }
 0x610   :  { %2290 = vst [vmem:[#allocation1 + $0x7] ss:$9 sm:$0xff] %v1742_v2  ;;  %v1753_v2 = vperm.slane %v4197_v8, 2 }
 0x617   :  { %v2291_v42 = vld [vmem:[#allocation1] sm:$0xff] }
 0x618   :  { %2292 = vst [vmem:[#allocation1] ss:$9 sm:$0xff] %v1743_v40  ;;  %2686 = vperm.xlu0 %3013, %v2291_v42   ;;  %v4396_v40 = vadd.s32 4294967232, %v4325_v23  ;;  %v1757_v42 = vperm.slane %v4197_v8, 6 }
 0x619   :  { %2293 = vst [vmem:[#allocation1 + $0x1] ss:$9 sm:$0xff] %v1744_v39  ;;  %v2624_v39 = vpop.permute.xlu0 %2623 }
 0x61a   :  { %2294 = vst [vmem:[#allocation1 + $0x2] ss:$9 sm:$0xff] %v1745_v27  ;;  %v1758_v27 = vperm.slane %v4197_v8, 7 }
 0x61b   :  { %2295 = vst [vmem:[#allocation1 + $0x3] ss:$9 sm:$0xff] %v1746_v54  ;;  %v2822_v54 = vperm.slane %v2624_v39, %v4396_v40  ;;  %v1767_v39 = vperm.slane %v4222_v13, 0 }
 0x61c   :  { %2296 = vst [vmem:[#allocation1 + $0x4] ss:$9 sm:$0xff] %v1747_v5 }
 0x61d   :  { %2297 = vst [vmem:[#allocation1 + $0x5] ss:$9 sm:$0xff] %v1748_v14  ;;  %v2824_v5 = vsel %vm2823_vm8, %v2822_v54, %v2820_v37  ;;  %v2630_v14 = vpop.permute.xlu2 %2629  ;;  %v1761_v37 = vperm.slane %v4200_v22, 2 }
 0x61e   :  { %2298 = vst [vmem:[#allocation1 + $0x6] ss:$9 sm:$0xff] %v1749_v7  ;;  %v2627_v7 = vpop.permute.xlu1 %2626  ;;  %v2830_v33 = vperm.slane %v2630_v14, %v4403_v63 }
 0x61f   :  { %2299 = vst [vmem:[#allocation1 + $0x7] ss:$9 sm:$0xff] %v1750_v58  ;;  %v2826_v8 = vperm.slane %v2627_v7, %v4406_v62  ;;  %v1769_v7 = vperm.slane %v4222_v13, 2 }
 0x626   :  { %v2300_v45 = vld [vmem:[#allocation1] sm:$0xff] }
 0x627   :  { %2301 = vst [vmem:[#allocation1] ss:$9 sm:$0xff] %v1751_v48  ;;  %2689 = vperm.xlu1 %3014, %v2300_v45   ;;  %v2828_v48 = vsel %vm2827_vm9, %v2826_v8, %v2824_v5  ;;  %v1762_v45 = vperm.slane %v4200_v22, 3  ;;  %v1768_v5 = vperm.slane %v4222_v13, 1  ;;  %v1771_v8 = vperm.slane %v4222_v13, 4 }
 0x628   :  { %2302 = vst [vmem:[#allocation1 + $0x1] ss:$9 sm:$0xff] %v1752_v31  ;;  %v2832_v31 = vsel %vm2831_vm10, %v2830_v33, %v2828_v48  ;;  %v4433_v33 = vadd.s32 4294967192, %v4325_v23  ;;  %v2639_v48 = vpop.permute.xlu2 %2638 }
 0x629   :  { %2303 = vst [vmem:[#allocation1 + $0x2] ss:$9 sm:$0xff] %v1753_v2  ;;  %v1763_v2 = vperm.slane %v4200_v22, 4 }
 0x62a   :  { %2304 = vst [vmem:[#allocation1 + $0x3] ss:$9 sm:$0xff] %v1754_v57  ;;  %v1764_v57 = vperm.slane %v4200_v22, 5 }
 0x62b   :  { %2305 = vst [vmem:[#allocation1 + $0x4] ss:$9 sm:$0xff] %v1755_v56  ;;  %v1765_v56 = vperm.slane %v4200_v22, 6 }
 0x62c   :  { %2306 = vst [vmem:[#allocation1 + $0x5] ss:$9 sm:$0xff] %v1756_v29  ;;  %v1766_v29 = vperm.slane %v4200_v22, 7  ;;  %v1770_v22 = vperm.slane %v4222_v13, 3 }
 0x62d   :  { %2307 = vst [vmem:[#allocation1 + $0x6] ss:$9 sm:$0xff] %v1757_v42  ;;  %v4421_v42 = vadd.s32 4294967208, %v4325_v23 }
 0x62e   :  { %2308 = vst [vmem:[#allocation1 + $0x7] ss:$9 sm:$0xff] %v1758_v27  ;;  %v2633_v27 = vpop.permute.xlu0 %2632 }
 0x62f   :  { %v2834_v14 = vperm.slane %v2633_v27, %v4421_v42  ;;  %v1776_v27 = vperm.slane %v4210_v1, 1 }
 0x635   :  { %v2309_v58 = vld [vmem:[#allocation1] sm:$0xff] }
 0x636   :  { %2310 = vst [vmem:[#allocation1] ss:$9 sm:$0xff] %v1759_v10  ;;  %2692 = vperm.xlu2 %3012, %v2309_v58   ;;  %v2836_v10 = vsel %vm2835_vm11, %v2834_v14, %v2832_v31  ;;  %v1772_v58 = vperm.slane %v4222_v13, 5  ;;  %v2636_v31 = vpop.permute.xlu1 %2635  ;;  %v1779_v14 = vperm.slane %v4210_v1, 4 }
 0x637   :  { %2311 = vst [vmem:[#allocation1 + $0x1] ss:$9 sm:$0xff] %v1760_v9  ;;  %v1773_v9 = vperm.slane %v4222_v13, 6 }
 0x638   :  { %2312 = vst [vmem:[#allocation1 + $0x2] ss:$9 sm:$0xff] %v1761_v37  ;;  %v1774_v37 = vperm.slane %v4222_v13, 7  ;;  %v1775_v13 = vperm.slane %v4210_v1, 0 }
 0x639   :  { %2313 = vst [vmem:[#allocation1 + $0x3] ss:$9 sm:$0xff] %v1762_v45  ;;  %v4437_v45 = vadd.s32 4294967200, %v4325_v23 }
 0x63a   :  { %2314 = vst [vmem:[#allocation1 + $0x4] ss:$9 sm:$0xff] %v1763_v2 }
 0x63b   :  { %2315 = vst [vmem:[#allocation1 + $0x5] ss:$9 sm:$0xff] %v1764_v57  ;;  %v2838_v2 = vperm.slane %v2636_v31, %v4437_v45  ;;  %v2842_v57 = vperm.slane %v2639_v48, %v4433_v33  ;;  %v1783_v48 = vperm.slane %v4217_v20, 0 }
 0x63c   :  { %2316 = vst [vmem:[#allocation1 + $0x6] ss:$9 sm:$0xff] %v1765_v56 }
 0x63d   :  { %2317 = vst [vmem:[#allocation1 + $0x7] ss:$9 sm:$0xff] %v1766_v29  ;;  %v2840_v56 = vsel %vm2839_vm12, %v2838_v2, %v2836_v10  ;;  %v1782_v10 = vperm.slane %v4210_v1, 7  ;;  %v1784_v2 = vperm.slane %v4217_v20, 1 }
 0x63e   :  { %v2844_v29 = vsel %vm2843_vm13, %v2842_v57, %v2840_v56  ;;  %v4459_v57 = vadd.s32 4294967176, %v4325_v23  ;;  %v2645_v56 = vpop.permute.xlu1 %2644 }
 0x644   :  { %v2318_v54 = vld [vmem:[#allocation1] sm:$0xff] }
 0x645   :  { %2319 = vst [vmem:[#allocation1] ss:$9 sm:$0xff] %v1767_v39  ;;  %2695 = vperm.xlu0 %3013, %v2318_v54   ;;  %v1777_v54 = vperm.slane %v4210_v1, 2 }
 0x646   :  { %2320 = vst [vmem:[#allocation1 + $0x1] ss:$9 sm:$0xff] %v1768_v5  ;;  %v1778_v5 = vperm.slane %v4210_v1, 3 }
 0x647   :  { %2321 = vst [vmem:[#allocation1 + $0x2] ss:$9 sm:$0xff] %v1769_v7  ;;  %v1780_v7 = vperm.slane %v4210_v1, 5 }
 0x648   :  { %2322 = vst [vmem:[#allocation1 + $0x3] ss:$9 sm:$0xff] %v1770_v22  ;;  %v1781_v22 = vperm.slane %v4210_v1, 6  ;;  %v1785_v1 = vperm.slane %v4217_v20, 2 }
 0x649   :  { %2323 = vst [vmem:[#allocation1 + $0x4] ss:$9 sm:$0xff] %v1771_v8  ;;  %v4452_v8 = vadd.s32 4294967184, %v4325_v23 }
 0x64a   :  { %2324 = vst [vmem:[#allocation1 + $0x5] ss:$9 sm:$0xff] %v1772_v58  ;;  %v2642_v58 = vpop.permute.xlu0 %2641 }
 0x64b   :  { %2325 = vst [vmem:[#allocation1 + $0x6] ss:$9 sm:$0xff] %v1773_v9  ;;  %v2846_v9 = vperm.slane %v2642_v58, %v4452_v8  ;;  %v2648_v58 = vpop.permute.xlu2 %2647 }
 0x64c   :  { %2326 = vst [vmem:[#allocation1 + $0x7] ss:$9 sm:$0xff] %v1774_v37 }
 0x64d   :  { %v2848_v37 = vsel %vm2847_vm14, %v2846_v9, %v2844_v29  ;;  %v1787_v29 = vperm.slane %v4217_v20, 4  ;;  %v1793_v9 = vperm.slane %v4231_v41, 2 }
 0x653   :  { %v2327_v39 = vld [vmem:[#allocation1] sm:$0xff] }
 0x654   :  { %2328 = vst [vmem:[#allocation1] ss:$9 sm:$0xff] %v1775_v13  ;;  %2698 = vperm.xlu1 %3014, %v2327_v39   ;;  %v1786_v13 = vperm.slane %v4217_v20, 3  ;;  %v2850_v39 = vperm.slane %v2645_v56, %v4459_v57  ;;  %v1797_v56 = vperm.slane %v4231_v41, 6 }
 0x655   :  { %2329 = vst [vmem:[#allocation1 + $0x1] ss:$9 sm:$0xff] %v1776_v27  ;;  %v1788_v27 = vperm.slane %v4217_v20, 5 }
 0x656   :  { %2330 = vst [vmem:[#allocation1 + $0x2] ss:$9 sm:$0xff] %v1777_v54  ;;  %v4467_v54 = vsel %vm2851_vm15, %v2850_v39, %v2848_v37  ;;  %v1794_v37 = vperm.slane %v4231_v41, 3  ;;  %v1798_v39 = vperm.slane %v4231_v41, 7 }
 0x657   :  { %2331 = vst [vmem:[#allocation1 + $0x3] ss:$9 sm:$0xff] %v1778_v5  ;;  %v1789_v5 = vperm.slane %v4217_v20, 6 }
 0x658   :  { %2332 = vst [vmem:[#allocation1 + $0x4] ss:$9 sm:$0xff] %v1779_v14  ;;  %v1790_v14 = vperm.slane %v4217_v20, 7  ;;  %v2853_v20 = vperm.slane %v2648_v58, %v4325_v23 }
 0x659   :  { %2333 = vst [vmem:[#allocation1 + $0x5] ss:$9 sm:$0xff] %v1780_v7  ;;  %v1791_v7 = vperm.slane %v4231_v41, 0 }
 0x65a   :  { %2334 = vst [vmem:[#allocation1 + $0x6] ss:$9 sm:$0xff] %v1781_v22 }
 0x65b   :  { %2335 = vst [vmem:[#allocation1 + $0x7] ss:$9 sm:$0xff] %v1782_v10  ;;  %v1792_v10 = vperm.slane %v4231_v41, 1 }
 0x662   :  { %v2336_v31 = vld [vmem:[#allocation1] sm:$0xff] }
 0x663   :  { %2337 = vst [vmem:[#allocation1] ss:$9 sm:$0xff] %v1783_v48  ;;  %2701 = vperm.xlu2 %3012, %v2336_v31   ;;  %v2651_v48 = vpop.permute.xlu0 %2650  ;;  %v1795_v31 = vperm.slane %v4231_v41, 4 }
 0x664   :  { %2338 = vst [vmem:[#allocation1 + $0x1] ss:$9 sm:$0xff] %v1784_v2  ;;  %v2854_v2 = vperm.slane %v2651_v48, %v4328_v30  ;;  %v1803_v48 = vperm.slane %v4224_v15, 4 }
 0x665   :  { %2339 = vst [vmem:[#allocation1 + $0x2] ss:$9 sm:$0xff] %v1785_v1  ;;  %v1796_v1 = vperm.slane %v4231_v41, 5  ;;  %v1801_v41 = vperm.slane %v4224_v15, 2 }
 0x666   :  { %2340 = vst [vmem:[#allocation1 + $0x3] ss:$9 sm:$0xff] %v1786_v13  ;;  %v2855_v13 = vsel %vm2795_vm1, %v2854_v2, %v2853_v20  ;;  %v1805_v20 = vperm.slane %v4224_v15, 6  ;;  %v1806_v2 = vperm.slane %v4224_v15, 7 }
 0x667   :  { %2341 = vst [vmem:[#allocation1 + $0x4] ss:$9 sm:$0xff] %v1787_v29  ;;  %v2657_v29 = vpop.permute.xlu2 %2656 }
 0x668   :  { %2342 = vst [vmem:[#allocation1 + $0x5] ss:$9 sm:$0xff] %v1788_v27  ;;  %v2654_v27 = vpop.permute.xlu1 %2653 }
 0x669   :  { %2343 = vst [vmem:[#allocation1 + $0x6] ss:$9 sm:$0xff] %v1789_v5  ;;  %v2856_v5 = vperm.slane %v2654_v27, %v4344_v17  ;;  %v1808_v27 = vperm.slane %v4227_v52, 1 }
 0x66a   :  { %2344 = vst [vmem:[#allocation1 + $0x7] ss:$9 sm:$0xff] %v1790_v14  ;;  %v2858_v14 = vperm.slane %v2657_v29, %v4340_v6 }
 0x671   :  { %v2345_v22 = vld [vmem:[#allocation1] sm:$0xff] }
 0x672   :  { %2346 = vst [vmem:[#allocation1] ss:$9 sm:$0xff] %v1791_v7  ;;  %2704 = vperm.xlu0 %3013, %v2345_v22   ;;  %v2857_v7 = vsel %vm2799_vm2, %v2856_v5, %v2855_v13  ;;  %v1799_v22 = vperm.slane %v4224_v15, 0  ;;  %v1807_v13 = vperm.slane %v4227_v52, 0  ;;  %v1809_v5 = vperm.slane %v4227_v52, 2 }
 0x673   :  { %2347 = vst [vmem:[#allocation1 + $0x1] ss:$9 sm:$0xff] %v1792_v10  ;;  %v2859_v10 = vsel %vm2803_vm3, %v2858_v14, %v2857_v7  ;;  %v1810_v14 = vperm.slane %v4227_v52, 3  ;;  %v2666_v7 = vpop.permute.xlu2 %2665 }
 0x674   :  { %2348 = vst [vmem:[#allocation1 + $0x2] ss:$9 sm:$0xff] %v1793_v9  ;;  %v1800_v9 = vperm.slane %v4224_v15, 1 }
 0x675   :  { %2349 = vst [vmem:[#allocation1 + $0x3] ss:$9 sm:$0xff] %v1794_v37  ;;  %v1802_v37 = vperm.slane %v4224_v15, 3 }
 0x676   :  { %2350 = vst [vmem:[#allocation1 + $0x4] ss:$9 sm:$0xff] %v1795_v31  ;;  %v1804_v31 = vperm.slane %v4224_v15, 5  ;;  %v1811_v15 = vperm.slane %v4227_v52, 4 }
 0x677   :  { %2351 = vst [vmem:[#allocation1 + $0x5] ss:$9 sm:$0xff] %v1796_v1  ;;  %v2660_v1 = vpop.permute.xlu0 %2659 }
 0x678   :  { %2352 = vst [vmem:[#allocation1 + $0x6] ss:$9 sm:$0xff] %v1797_v56  ;;  %v2860_v56 = vperm.slane %v2660_v1, %v4361_v4  ;;  %v1816_v1 = vperm.slane %v4246_v28, 1 }
 0x679   :  { %2353 = vst [vmem:[#allocation1 + $0x7] ss:$9 sm:$0xff] %v1798_v39 }
 0x67a   :  { %v2861_v39 = vsel %vm2807_vm4, %v2860_v56, %v2859_v10  ;;  %v1813_v10 = vperm.slane %v4227_v52, 6  ;;  %v1817_v56 = vperm.slane %v4246_v28, 2 }
 0x680   :  { %v2354_v58 = vld [vmem:[#allocation1] sm:$0xff] }
 0x681   :  { %2355 = vst [vmem:[#allocation1] ss:$9 sm:$0xff] %v1799_v22  ;;  %2707 = vperm.xlu1 %3014, %v2354_v58   ;;  %v1812_v22 = vperm.slane %v4227_v52, 5  ;;  %v2663_v58 = vpop.permute.xlu1 %2662 }
 0x682   :  { %2356 = vst [vmem:[#allocation1 + $0x1] ss:$9 sm:$0xff] %v1800_v9  ;;  %v2862_v9 = vperm.slane %v2663_v58, %v4357_v60  ;;  %v1823_v58 = vperm.slane %v4235_v16, 0 }
 0x683   :  { %2357 = vst [vmem:[#allocation1 + $0x2] ss:$9 sm:$0xff] %v1801_v41  ;;  %v1814_v41 = vperm.slane %v4227_v52, 7  ;;  %v1818_v52 = vperm.slane %v4246_v28, 3 }
 0x684   :  { %2358 = vst [vmem:[#allocation1 + $0x3] ss:$9 sm:$0xff] %v1802_v37  ;;  %v2864_v37 = vperm.slane %v2666_v7, %v4380_v25  ;;  %v2675_v7 = vpop.permute.xlu2 %2674 }
 0x685   :  { %2359 = vst [vmem:[#allocation1 + $0x4] ss:$9 sm:$0xff] %v1803_v48  ;;  %v2863_v48 = vsel %vm2811_vm5, %v2862_v9, %v2861_v39  ;;  %v1820_v39 = vperm.slane %v4246_v28, 5 }
 0x686   :  { %2360 = vst [vmem:[#allocation1 + $0x5] ss:$9 sm:$0xff] %v1804_v31  ;;  %v2865_v31 = vsel %vm2815_vm6, %v2864_v37, %v2863_v48  ;;  %v2870_v37 = vperm.slane %v2675_v7, %v4406_v62  ;;  %v1835_v7 = vperm.slane %v4242_v50, 4 }
 0x687   :  { %2361 = vst [vmem:[#allocation1 + $0x6] ss:$9 sm:$0xff] %v1805_v20  ;;  %v1815_v20 = vperm.slane %v4246_v28, 0 }
 0x688   :  { %2362 = vst [vmem:[#allocation1 + $0x7] ss:$9 sm:$0xff] %v1806_v2 }
 0x68f   :  { %v2363_v29 = vld [vmem:[#allocation1] sm:$0xff] }
 0x690   :  { %2364 = vst [vmem:[#allocation1] ss:$9 sm:$0xff] %v1807_v13  ;;  %2710 = vperm.xlu2 %3012, %v2363_v29   ;;  %v1819_v13 = vperm.slane %v4246_v28, 4  ;;  %v1821_v29 = vperm.slane %v4246_v28, 6 }
 0x691   :  { %2365 = vst [vmem:[#allocation1 + $0x1] ss:$9 sm:$0xff] %v1808_v27  ;;  %v2669_v27 = vpop.permute.xlu0 %2668 }
 0x692   :  { %2366 = vst [vmem:[#allocation1 + $0x2] ss:$9 sm:$0xff] %v1809_v5  ;;  %v1822_v5 = vperm.slane %v4246_v28, 7  ;;  %v1825_v28 = vperm.slane %v4235_v16, 2 }
 0x693   :  { %2367 = vst [vmem:[#allocation1 + $0x3] ss:$9 sm:$0xff] %v1810_v14  ;;  %v2866_v14 = vperm.slane %v2669_v27, %v4376_v43  ;;  %v1832_v27 = vperm.slane %v4242_v50, 1 }
 0x694   :  { %2368 = vst [vmem:[#allocation1 + $0x4] ss:$9 sm:$0xff] %v1811_v15 }
 0x695   :  { %2369 = vst [vmem:[#allocation1 + $0x5] ss:$9 sm:$0xff] %v1812_v22  ;;  %v2867_v15 = vsel %vm2819_vm7, %v2866_v14, %v2865_v31  ;;  %v2672_v22 = vpop.permute.xlu1 %2671  ;;  %v1833_v14 = vperm.slane %v4242_v50, 2 }
 0x696   :  { %2370 = vst [vmem:[#allocation1 + $0x6] ss:$9 sm:$0xff] %v1813_v10  ;;  %v2868_v10 = vperm.slane %v2672_v22, %v4396_v40  ;;  %v1836_v22 = vperm.slane %v4242_v50, 5 }
 0x697   :  { %2371 = vst [vmem:[#allocation1 + $0x7] ss:$9 sm:$0xff] %v1814_v41  ;;  %v1824_v41 = vperm.slane %v4235_v16, 1 }
 0x698   :  { %v2869_v48 = vsel %vm2823_vm8, %v2868_v10, %v2867_v15  ;;  %v1834_v15 = vperm.slane %v4242_v50, 3  ;;  %v1838_v10 = vperm.slane %v4242_v50, 7 }
 0x699   :  { %v2871_v31 = vsel %vm2827_vm9, %v2870_v37, %v2869_v48 }
 0x69e   :  { %v2372_v2 = vld [vmem:[#allocation1] sm:$0xff] }
 0x69f   :  { %2373 = vst [vmem:[#allocation1] ss:$9 sm:$0xff] %v1815_v20  ;;  %2713 = vperm.xlu0 %3013, %v2372_v2   ;;  %v1826_v20 = vperm.slane %v4235_v16, 3  ;;  %v1827_v2 = vperm.slane %v4235_v16, 4 }
 0x6a0   :  { %2374 = vst [vmem:[#allocation1 + $0x1] ss:$9 sm:$0xff] %v1816_v1  ;;  %v1828_v1 = vperm.slane %v4235_v16, 5 }
 0x6a1   :  { %2375 = vst [vmem:[#allocation1 + $0x2] ss:$9 sm:$0xff] %v1817_v56  ;;  %v1829_v56 = vperm.slane %v4235_v16, 6 }
 0x6a2   :  { %2376 = vst [vmem:[#allocation1 + $0x3] ss:$9 sm:$0xff] %v1818_v52  ;;  %v1830_v52 = vperm.slane %v4235_v16, 7 }
 0x6a3   :  { %2377 = vst [vmem:[#allocation1 + $0x4] ss:$9 sm:$0xff] %v1819_v13  ;;  %v1831_v13 = vperm.slane %v4242_v50, 0 }
 0x6a4   :  { %2378 = vst [vmem:[#allocation1 + $0x5] ss:$9 sm:$0xff] %v1820_v39  ;;  %v2678_v39 = vpop.permute.xlu0 %2677 }
 0x6a5   :  { %2379 = vst [vmem:[#allocation1 + $0x6] ss:$9 sm:$0xff] %v1821_v29 }
 0x6a6   :  { %2380 = vst [vmem:[#allocation1 + $0x7] ss:$9 sm:$0xff] %v1822_v5  ;;  %v2872_v5 = vperm.slane %v2678_v39, %v4403_v63  ;;  %v1845_v39 = vperm.slane %v4255_v46, 6 }
 0x6a8   :  { %v2873_v16 = vsel %vm2831_vm10, %v2872_v5, %v2871_v31  ;;  %v1839_v31 = vperm.slane %v4255_v46, 0 }
 0x6ad   :  { %v2381_v9 = vld [vmem:[#allocation1] sm:$0xff] }
 0x6ae   :  { %2382 = vst [vmem:[#allocation1] ss:$9 sm:$0xff] %v1823_v58  ;;  %2716 = vperm.xlu1 %3014, %v2381_v9   ;;  %v1837_v58 = vperm.slane %v4242_v50, 6  ;;  %v2684_v9 = vpop.permute.xlu2 %2683  ;;  %v1841_v50 = vperm.slane %v4255_v46, 2 }
 0x6af   :  { %2383 = vst [vmem:[#allocation1 + $0x1] ss:$9 sm:$0xff] %v1824_v41  ;;  %v2681_v41 = vpop.permute.xlu1 %2680 }
 0x6b0   :  { %2384 = vst [vmem:[#allocation1 + $0x2] ss:$9 sm:$0xff] %v1825_v28  ;;  %v2874_v37 = vperm.slane %v2681_v41, %v4421_v42  ;;  %v2876_v28 = vperm.slane %v2684_v9, %v4437_v45  ;;  %v1853_v9 = vperm.slane %v4248_v32, 6 }
 0x6b1   :  { %2385 = vst [vmem:[#allocation1 + $0x3] ss:$9 sm:$0xff] %v1826_v20 }
 0x6b2   :  { %2386 = vst [vmem:[#allocation1 + $0x4] ss:$9 sm:$0xff] %v1827_v2  ;;  %v2875_v48 = vsel %vm2835_vm11, %v2874_v37, %v2873_v16  ;;  %v1854_v37 = vperm.slane %v4248_v32, 7 }
 0x6b3   :  { %2387 = vst [vmem:[#allocation1 + $0x5] ss:$9 sm:$0xff] %v1828_v1  ;;  %v2877_v20 = vsel %vm2839_vm12, %v2876_v28, %v2875_v48  ;;  %v1840_v1 = vperm.slane %v4255_v46, 1 }
 0x6b4   :  { %2388 = vst [vmem:[#allocation1 + $0x6] ss:$9 sm:$0xff] %v1829_v56  ;;  %v1842_v56 = vperm.slane %v4255_v46, 3 }
 0x6b5   :  { %2389 = vst [vmem:[#allocation1 + $0x7] ss:$9 sm:$0xff] %v1830_v52  ;;  %v1843_v52 = vperm.slane %v4255_v46, 4 }
 0x6b6   :  { %v2693_v41 = vpop.permute.xlu2 %2692 }
 0x6b7   :  { %v2690_v28 = vpop.permute.xlu1 %2689 }
 0x6b8   :  { %v2880_v48 = vperm.slane %v2690_v28, %v4452_v8  ;;  %v1874_v28 = vperm.slane %v4259_v55, 3 }
 0x6bc   :  { %v2390_v29 = vld [vmem:[#allocation1] sm:$0xff] }
 0x6bd   :  { %2391 = vst [vmem:[#allocation1] ss:$9 sm:$0xff] %v1831_v13  ;;  %2719 = vperm.xlu2 %3012, %v2390_v29   ;;  %v1844_v13 = vperm.slane %v4255_v46, 5  ;;  %v1846_v29 = vperm.slane %v4255_v46, 7  ;;  %v1851_v46 = vperm.slane %v4248_v32, 4 }
 0x6be   :  { %2392 = vst [vmem:[#allocation1 + $0x1] ss:$9 sm:$0xff] %v1832_v27  ;;  %v2687_v27 = vpop.permute.xlu0 %2686 }
 0x6bf   :  { %2393 = vst [vmem:[#allocation1 + $0x2] ss:$9 sm:$0xff] %v1833_v14  ;;  %v2878_v5 = vperm.slane %v2687_v27, %v4433_v33  ;;  %v1862_v27 = vperm.slane %v4250_v21, 7 }
 0x6c0   :  { %2394 = vst [vmem:[#allocation1 + $0x3] ss:$9 sm:$0xff] %v1834_v15  ;;  %v1847_v15 = vperm.slane %v4248_v32, 0 }
 0x6c1   :  { %2395 = vst [vmem:[#allocation1 + $0x4] ss:$9 sm:$0xff] %v1835_v7  ;;  %v2879_v14 = vsel %vm2843_vm13, %v2878_v5, %v2877_v20  ;;  %v1848_v7 = vperm.slane %v4248_v32, 1  ;;  %v2882_v20 = vperm.slane %v2693_v41, %v4459_v57  ;;  %v1863_v5 = vperm.slane %v4268_v18, 0 }
 0x6c2   :  { %2396 = vst [vmem:[#allocation1 + $0x5] ss:$9 sm:$0xff] %v1836_v22  ;;  %v1849_v22 = vperm.slane %v4248_v32, 2 }
 0x6c3   :  { %2397 = vst [vmem:[#allocation1 + $0x6] ss:$9 sm:$0xff] %v1837_v58  ;;  %v1850_v58 = vperm.slane %v4248_v32, 3 }
 0x6c4   :  { %2398 = vst [vmem:[#allocation1 + $0x7] ss:$9 sm:$0xff] %v1838_v10  ;;  %v1852_v10 = vperm.slane %v4248_v32, 5  ;;  %v1857_v32 = vperm.slane %v4250_v21, 2 }
 0x6cb   :  { %v2399_v2 = vld [vmem:[#allocation1] sm:$0xff] }
 0x6cc   :  { %2400 = vst [vmem:[#allocation1] ss:$9 sm:$0xff] %v1839_v31  ;;  %2722 = vperm.xlu0 %3013, %v2399_v2   ;;  %v2881_v31 = vsel %vm2847_vm14, %v2880_v48, %v2879_v14  ;;  %v1864_v14 = vperm.slane %v4268_v18, 1  ;;  %v1875_v48 = vperm.slane %v4259_v55, 4 }
 0x6cd   :  { %2401 = vst [vmem:[#allocation1 + $0x1] ss:$9 sm:$0xff] %v1840_v1  ;;  %v4566_v2 = vsel %vm2851_vm15, %v2882_v20, %v2881_v31  ;;  %v1855_v1 = vperm.slane %v4250_v21, 0  ;;  %v2696_v20 = vpop.permute.xlu0 %2695  ;;  %v1877_v31 = vperm.slane %v4259_v55, 6 }
 0x6ce   :  { %2402 = vst [vmem:[#allocation1 + $0x2] ss:$9 sm:$0xff] %v1841_v50 }
 0x6cf   :  { %2403 = vst [vmem:[#allocation1 + $0x3] ss:$9 sm:$0xff] %v1842_v56  ;;  %v1856_v56 = vperm.slane %v4250_v21, 1 }
 0x6d0   :  { %2404 = vst [vmem:[#allocation1 + $0x4] ss:$9 sm:$0xff] %v1843_v52  ;;  %v1858_v52 = vperm.slane %v4250_v21, 3 }
 0x6d1   :  { %2405 = vst [vmem:[#allocation1 + $0x5] ss:$9 sm:$0xff] %v1844_v13  ;;  %v1859_v13 = vperm.slane %v4250_v21, 4 }
 0x6d2   :  { %2406 = vst [vmem:[#allocation1 + $0x6] ss:$9 sm:$0xff] %v1845_v39  ;;  %v1860_v39 = vperm.slane %v4250_v21, 5 }
 0x6d3   :  { %2407 = vst [vmem:[#allocation1 + $0x7] ss:$9 sm:$0xff] %v1846_v29  ;;  %v1861_v29 = vperm.slane %v4250_v21, 6  ;;  %v1868_v21 = vperm.slane %v4268_v18, 5 }
 0x6da   :  { %v2408_v16 = vld [vmem:[#allocation1] sm:$0xff] }
 0x6db   :  { %2409 = vst [vmem:[#allocation1] ss:$9 sm:$0xff] %v1847_v15  ;;  %2725 = vperm.xlu1 %3014, %v2408_v16   ;;  %v1865_v16 = vperm.slane %v4268_v18, 2 }
 0x6dc   :  { %2410 = vst [vmem:[#allocation1 + $0x1] ss:$9 sm:$0xff] %v1848_v7  ;;  %v1866_v7 = vperm.slane %v4268_v18, 3 }
 0x6dd   :  { %2411 = vst [vmem:[#allocation1 + $0x2] ss:$9 sm:$0xff] %v1849_v22  ;;  %v1867_v22 = vperm.slane %v4268_v18, 4 }
 0x6de   :  { %2412 = vst [vmem:[#allocation1 + $0x3] ss:$9 sm:$0xff] %v1850_v58  ;;  %v1869_v58 = vperm.slane %v4268_v18, 6 }
 0x6df   :  { %2413 = vst [vmem:[#allocation1 + $0x4] ss:$9 sm:$0xff] %v1851_v46  ;;  %v1870_v46 = vperm.slane %v4268_v18, 7  ;;  %v1876_v18 = vperm.slane %v4259_v55, 5 }
 0x6e0   :  { %2414 = vst [vmem:[#allocation1 + $0x5] ss:$9 sm:$0xff] %v1852_v10  ;;  %v1871_v10 = vperm.slane %v4259_v55, 0 }
 0x6e1   :  { %2415 = vst [vmem:[#allocation1 + $0x6] ss:$9 sm:$0xff] %v1853_v9  ;;  %v1872_v9 = vperm.slane %v4259_v55, 1 }
 0x6e2   :  { %2416 = vst [vmem:[#allocation1 + $0x7] ss:$9 sm:$0xff] %v1854_v37  ;;  %v1873_v37 = vperm.slane %v4259_v55, 2 }
 0x6e9   :  { %v2417_v50 = vld [vmem:[#allocation1] sm:$0xff] }
 0x6ea   :  { %2418 = vst [vmem:[#allocation1] ss:$9 sm:$0xff] %v1855_v1  ;;  %2728 = vperm.xlu2 %3012, %v2417_v50   ;;  %v1878_v1 = vperm.slane %v4259_v55, 7  ;;  %v2699_v50 = vpop.permute.xlu1 %2698  ;;  %v1882_v55 = vperm.slane %v4265_v0, 3 }
 0x6eb   :  { %2419 = vst [vmem:[#allocation1 + $0x1] ss:$9 sm:$0xff] %v1856_v56  ;;  %v2884_v56 = vperm.slane %v2696_v20, %v4325_v23  ;;  %v1898_v20 = vperm.slane %v4270_v34, 3 }
 0x6ec   :  { %2420 = vst [vmem:[#allocation1 + $0x2] ss:$9 sm:$0xff] %v1857_v32  ;;  %v2885_v32 = vperm.slane %v2699_v50, %v4328_v30  ;;  %v1902_v50 = vperm.slane %v4270_v34, 7 }
 0x6ed   :  { %2421 = vst [vmem:[#allocation1 + $0x3] ss:$9 sm:$0xff] %v1858_v52 }
 0x6ee   :  { %2422 = vst [vmem:[#allocation1 + $0x4] ss:$9 sm:$0xff] %v1859_v13  ;;  %v4595_v52 = vsel %vm2795_vm1, %v2885_v32, %v2884_v56  ;;  %v1879_v13 = vperm.slane %v4265_v0, 0  ;;  %v1903_v56 = vperm.slane %v4273_v12, 0  ;;  %v1904_v32 = vperm.slane %v4273_v12, 1 }
 0x6ef   :  { %2423 = vst [vmem:[#allocation1 + $0x5] ss:$9 sm:$0xff] %v1860_v39  ;;  %v1880_v39 = vperm.slane %v4265_v0, 1 }
 0x6f0   :  { %2424 = vst [vmem:[#allocation1 + $0x6] ss:$9 sm:$0xff] %v1861_v29 }
 0x6f1   :  { %2425 = vst [vmem:[#allocation1 + $0x7] ss:$9 sm:$0xff] %v1862_v27  ;;  %v1881_v27 = vperm.slane %v4265_v0, 2 }
 0x6f8   :  { %v2426_v15 = vld [vmem:[#allocation1] sm:$0xff] }
 0x6f9   :  { %2731 = vperm.xlu0 %3013, %v2426_v15   ;;  %2427 = vst [vmem:[#allocation1] ss:$9 sm:$0xff] %v1863_v5  ;;  %v1883_v5 = vperm.slane %v4265_v0, 4  ;;  %v1885_v15 = vperm.slane %v4265_v0, 6 }
 0x6fa   :  { %2428 = vst [vmem:[#allocation1 + $0x1] ss:$9 sm:$0xff] %v1864_v14  ;;  %v1884_v14 = vperm.slane %v4265_v0, 5 }
 0x6fb   :  { %2429 = vst [vmem:[#allocation1 + $0x2] ss:$9 sm:$0xff] %v1865_v16  ;;  %v1886_v16 = vperm.slane %v4265_v0, 7  ;;  %v1892_v0 = vperm.slane %v4277_v47, 5 }
 0x6fc   :  { %2430 = vst [vmem:[#allocation1 + $0x3] ss:$9 sm:$0xff] %v1866_v7  ;;  %v1887_v7 = vperm.slane %v4277_v47, 0 }
 0x6fd   :  { %2431 = vst [vmem:[#allocation1 + $0x4] ss:$9 sm:$0xff] %v1867_v22  ;;  %v1888_v22 = vperm.slane %v4277_v47, 1 }
 0x6fe   :  { %2432 = vst [vmem:[#allocation1 + $0x5] ss:$9 sm:$0xff] %v1868_v21 }
 0x6ff   :  { %2433 = vst [vmem:[#allocation1 + $0x6] ss:$9 sm:$0xff] %v1869_v58  ;;  %v1889_v58 = vperm.slane %v4277_v47, 2 }
 0x700   :  { %2434 = vst [vmem:[#allocation1 + $0x7] ss:$9 sm:$0xff] %v1870_v46  ;;  %v1890_v46 = vperm.slane %v4277_v47, 3 }
 0x707   :  { %v2435_v41 = vld [vmem:[#allocation1] sm:$0xff] }
 0x708   :  { %2734 = vperm.xlu1 %3014, %v2435_v41   ;;  %2436 = vst [vmem:[#allocation1] ss:$9 sm:$0xff] %v1871_v10  ;;  %v1891_v10 = vperm.slane %v4277_v47, 4  ;;  %v1894_v41 = vperm.slane %v4277_v47, 7 }
 0x709   :  { %2437 = vst [vmem:[#allocation1 + $0x1] ss:$9 sm:$0xff] %v1872_v9  ;;  %v1893_v9 = vperm.slane %v4277_v47, 6  ;;  %v1900_v47 = vperm.slane %v4270_v34, 5 }
 0x70a   :  { %2438 = vst [vmem:[#allocation1 + $0x2] ss:$9 sm:$0xff] %v1873_v37  ;;  %v1895_v37 = vperm.slane %v4270_v34, 0 }
 0x70b   :  { %2439 = vst [vmem:[#allocation1 + $0x3] ss:$9 sm:$0xff] %v1874_v28  ;;  %v1896_v28 = vperm.slane %v4270_v34, 1 }
 0x70c   :  { %2440 = vst [vmem:[#allocation1 + $0x4] ss:$9 sm:$0xff] %v1875_v48 }
 0x70d   :  { %2441 = vst [vmem:[#allocation1 + $0x5] ss:$9 sm:$0xff] %v1876_v18  ;;  %v1897_v18 = vperm.slane %v4270_v34, 2 }
 0x70e   :  { %2442 = vst [vmem:[#allocation1 + $0x6] ss:$9 sm:$0xff] %v1877_v31  ;;  %v1899_v31 = vperm.slane %v4270_v34, 4 }
 0x70f   :  { %2443 = vst [vmem:[#allocation1 + $0x7] ss:$9 sm:$0xff] %v1878_v1  ;;  %v1901_v1 = vperm.slane %v4270_v34, 6  ;;  %v1908_v34 = vperm.slane %v4273_v12, 5 }
 0x716   :  { %v2444_v29 = vld [vmem:[#allocation1] sm:$0xff] }
 0x717   :  { %2737 = vperm.xlu2 %3012, %v2444_v29   ;;  %2445 = vst [vmem:[#allocation1] ss:$9 sm:$0xff] %v1879_v13  ;;  %v1906_v29 = vperm.slane %v4273_v12, 3 }
 0x718   :  { %2446 = vst [vmem:[#allocation1 + $0x1] ss:$9 sm:$0xff] %v1880_v39  ;;  %v1905_v39 = vperm.slane %v4273_v12, 2 }
 0x719   :  { %2447 = vst [vmem:[#allocation1 + $0x2] ss:$9 sm:$0xff] %v1881_v27  ;;  %v1907_v27 = vperm.slane %v4273_v12, 4 }
 0x71a   :  { %2448 = vst [vmem:[#allocation1 + $0x3] ss:$9 sm:$0xff] %v1882_v55  ;;  %v1909_v55 = vperm.slane %v4273_v12, 6 }
 0x71b   :  { %2449 = vst [vmem:[#allocation1 + $0x4] ss:$9 sm:$0xff] %v1883_v5  ;;  %v1910_v5 = vperm.slane %v4273_v12, 7  ;;  %v1916_v12 = vperm.slane %v4288_v61, 5 }
 0x71c   :  { %2450 = vst [vmem:[#allocation1 + $0x5] ss:$9 sm:$0xff] %v1884_v14  ;;  %v1911_v14 = vperm.slane %v4288_v61, 0 }
 0x71d   :  { %2451 = vst [vmem:[#allocation1 + $0x6] ss:$9 sm:$0xff] %v1885_v15  ;;  %v1912_v15 = vperm.slane %v4288_v61, 1 }
 0x71e   :  { %2452 = vst [vmem:[#allocation1 + $0x7] ss:$9 sm:$0xff] %v1886_v16 }
 0x725   :  { %v2453_v21 = vld [vmem:[#allocation1] sm:$0xff] }
 0x726   :  { %2740 = vperm.xlu0 %3013, %v2453_v21   ;;  %2454 = vst [vmem:[#allocation1] ss:$9 sm:$0xff] %v1887_v7  ;;  %v1913_v7 = vperm.slane %v4288_v61, 2  ;;  %v1915_v21 = vperm.slane %v4288_v61, 4 }
 0x727   :  { %2455 = vst [vmem:[#allocation1 + $0x1] ss:$9 sm:$0xff] %v1888_v22  ;;  %v1914_v22 = vperm.slane %v4288_v61, 3 }
 0x728   :  { %2456 = vst [vmem:[#allocation1 + $0x2] ss:$9 sm:$0xff] %v1889_v58  ;;  %v1917_v58 = vperm.slane %v4288_v61, 6 }
 0x729   :  { %2457 = vst [vmem:[#allocation1 + $0x3] ss:$9 sm:$0xff] %v1890_v46  ;;  %v1918_v46 = vperm.slane %v4288_v61, 7  ;;  %v1924_v61 = vperm.slane %v4281_v35, 5 }
 0x72a   :  { %2458 = vst [vmem:[#allocation1 + $0x4] ss:$9 sm:$0xff] %v1891_v10  ;;  %v1919_v10 = vperm.slane %v4281_v35, 0 }
 0x72b   :  { %2459 = vst [vmem:[#allocation1 + $0x5] ss:$9 sm:$0xff] %v1892_v0  ;;  %v1920_v0 = vperm.slane %v4281_v35, 1 }
 0x72c   :  { %2460 = vst [vmem:[#allocation1 + $0x6] ss:$9 sm:$0xff] %v1893_v9 }
 0x72d   :  { %2461 = vst [vmem:[#allocation1 + $0x7] ss:$9 sm:$0xff] %v1894_v41  ;;  %v1921_v41 = vperm.slane %v4281_v35, 2 }
 0x734   :  { %v2462_v48 = vld [vmem:[#allocation1] sm:$0xff] }
 0x735   :  { %2743 = vperm.xlu1 %3014, %v2462_v48   ;;  %2463 = vst [vmem:[#allocation1] ss:$9 sm:$0xff] %v1895_v37  ;;  %v1922_v37 = vperm.slane %v4281_v35, 3  ;;  %v1923_v48 = vperm.slane %v4281_v35, 4 }
 0x736   :  { %2464 = vst [vmem:[#allocation1 + $0x1] ss:$9 sm:$0xff] %v1896_v28  ;;  %v2946_v28 = vrot.slane %v4566_v2, 7  ;;  %v1927_v2 = vperm.slane %v4286_v26, 0 }
 0x737   :  { %2465 = vst [vmem:[#allocation1 + $0x2] ss:$9 sm:$0xff] %v1897_v18  ;;  %v1925_v18 = vperm.slane %v4281_v35, 6 }
 0x738   :  { %2466 = vst [vmem:[#allocation1 + $0x3] ss:$9 sm:$0xff] %v1898_v20  ;;  %v1926_v20 = vperm.slane %v4281_v35, 7  ;;  %v1931_v35 = vperm.slane %v4286_v26, 4 }
 0x739   :  { %2467 = vst [vmem:[#allocation1 + $0x4] ss:$9 sm:$0xff] %v1899_v31  ;;  %v4647_v31 = vsel %vm2949_vm0, %v4467_v54, %v2946_v28  ;;  %v1932_v54 = vperm.slane %v4286_v26, 5  ;;  %v1954_v28 = vperm.slane %v4294_v24, 3 }
 0x73a   :  { %2468 = vst [vmem:[#allocation1 + $0x5] ss:$9 sm:$0xff] %v1900_v47  ;;  %v1928_v47 = vperm.slane %v4286_v26, 1 }
 0x73b   :  { %2469 = vst [vmem:[#allocation1 + $0x6] ss:$9 sm:$0xff] %v1901_v1 }
 0x73c   :  { %2470 = vst [vmem:[#allocation1 + $0x7] ss:$9 sm:$0xff] %v1902_v50  ;;  %v1929_v50 = vperm.slane %v4286_v26, 2 }
 0x743   :  { %v2471_v13 = vld [vmem:[#allocation1] sm:$0xff] }
 0x744   :  { %2746 = vperm.xlu2 %3012, %v2471_v13   ;;  %2472 = vst [vmem:[#allocation1] ss:$9 sm:$0xff] %v1903_v56  ;;  %v1930_v56 = vperm.slane %v4286_v26, 3  ;;  %v1934_v13 = vperm.slane %v4286_v26, 7 }
 0x745   :  { %2473 = vst [vmem:[#allocation1 + $0x1] ss:$9 sm:$0xff] %v1904_v32  ;;  %v1933_v32 = vperm.slane %v4286_v26, 6  ;;  %v1940_v26 = vperm.slane %v4298_v11, 5 }
 0x746   :  { %2474 = vst [vmem:[#allocation1 + $0x2] ss:$9 sm:$0xff] %v1905_v39  ;;  %v1935_v39 = vperm.slane %v4298_v11, 0 }
 0x747   :  { %2475 = vst [vmem:[#allocation1 + $0x3] ss:$9 sm:$0xff] %v1906_v29  ;;  %v1936_v29 = vperm.slane %v4298_v11, 1 }
 0x748   :  { %2476 = vst [vmem:[#allocation1 + $0x4] ss:$9 sm:$0xff] %v1907_v27 }
 0x749   :  { %2477 = vst [vmem:[#allocation1 + $0x5] ss:$9 sm:$0xff] %v1908_v34  ;;  %v1937_v34 = vperm.slane %v4298_v11, 2 }
 0x74a   :  { %2478 = vst [vmem:[#allocation1 + $0x6] ss:$9 sm:$0xff] %v1909_v55  ;;  %v1938_v55 = vperm.slane %v4298_v11, 3 }
 0x74b   :  { %2479 = vst [vmem:[#allocation1 + $0x7] ss:$9 sm:$0xff] %v1910_v5  ;;  %v1939_v5 = vperm.slane %v4298_v11, 4 }
 0x752   :  { %v2480_v16 = vld [vmem:[#allocation1] sm:$0xff] }
 0x753   :  { %2749 = vperm.xlu0 %3013, %v2480_v16   ;;  %2481 = vst [vmem:[#allocation1] ss:$9 sm:$0xff] %v1911_v14  ;;  %v1941_v14 = vperm.slane %v4298_v11, 6  ;;  %v1943_v16 = vperm.slane %v4290_v59, 0 }
 0x754   :  { %2482 = vst [vmem:[#allocation1 + $0x1] ss:$9 sm:$0xff] %v1912_v15  ;;  %v1942_v15 = vperm.slane %v4298_v11, 7  ;;  %v1948_v11 = vperm.slane %v4290_v59, 5 }
 0x755   :  { %2483 = vst [vmem:[#allocation1 + $0x2] ss:$9 sm:$0xff] %v1913_v7  ;;  %v1944_v7 = vperm.slane %v4290_v59, 1 }
 0x756   :  { %2484 = vst [vmem:[#allocation1 + $0x3] ss:$9 sm:$0xff] %v1914_v22 }
 0x757   :  { %2485 = vst [vmem:[#allocation1 + $0x4] ss:$9 sm:$0xff] %v1915_v21  ;;  %v1945_v21 = vperm.slane %v4290_v59, 2 }
 0x758   :  { %2486 = vst [vmem:[#allocation1 + $0x5] ss:$9 sm:$0xff] %v1916_v12  ;;  %v1946_v12 = vperm.slane %v4290_v59, 3 }
 0x759   :  { %2487 = vst [vmem:[#allocation1 + $0x6] ss:$9 sm:$0xff] %v1917_v58  ;;  %v1947_v58 = vperm.slane %v4290_v59, 4 }
 0x75a   :  { %2488 = vst [vmem:[#allocation1 + $0x7] ss:$9 sm:$0xff] %v1918_v46  ;;  %v1949_v46 = vperm.slane %v4290_v59, 6 }
 0x761   :  { %v2489_v9 = vld [vmem:[#allocation1] sm:$0xff] }
 0x762   :  { %2752 = vperm.xlu1 %3014, %v2489_v9   ;;  %2490 = vst [vmem:[#allocation1] ss:$9 sm:$0xff] %v1919_v10  ;;  %v1950_v10 = vperm.slane %v4290_v59, 7  ;;  %v1952_v9 = vperm.slane %v4294_v24, 1  ;;  %v1956_v59 = vperm.slane %v4294_v24, 5 }
 0x763   :  { %2491 = vst [vmem:[#allocation1 + $0x1] ss:$9 sm:$0xff] %v1920_v0  ;;  %v1951_v0 = vperm.slane %v4294_v24, 0 }
 0x764   :  { %2492 = vst [vmem:[#allocation1 + $0x2] ss:$9 sm:$0xff] %v1921_v41 }
 0x765   :  { %2493 = vst [vmem:[#allocation1 + $0x3] ss:$9 sm:$0xff] %v1922_v37  ;;  %v1953_v37 = vperm.slane %v4294_v24, 2 }
 0x766   :  { %2494 = vst [vmem:[#allocation1 + $0x4] ss:$9 sm:$0xff] %v1923_v48  ;;  %v1955_v48 = vperm.slane %v4294_v24, 4 }
 0x767   :  { %2495 = vst [vmem:[#allocation1 + $0x5] ss:$9 sm:$0xff] %v1924_v61  ;;  %v1957_v61 = vperm.slane %v4294_v24, 6 }
 0x768   :  { %2496 = vst [vmem:[#allocation1 + $0x6] ss:$9 sm:$0xff] %v1925_v18  ;;  %v1958_v18 = vperm.slane %v4294_v24, 7  ;;  %v1964_v24 = vperm.slane %v4308_v19, 5 }
 0x769   :  { %2497 = vst [vmem:[#allocation1 + $0x7] ss:$9 sm:$0xff] %v1926_v20  ;;  %v1959_v20 = vperm.slane %v4308_v19, 0 }
 0x770   :  { %v2498_v1 = vld [vmem:[#allocation1] sm:$0xff] }
 0x771   :  { %2755 = vperm.xlu2 %3012, %v2498_v1   ;;  %2499 = vst [vmem:[#allocation1] ss:$9 sm:$0xff] %v1927_v2  ;;  %v1960_v2 = vperm.slane %v4308_v19, 1  ;;  %v1961_v1 = vperm.slane %v4308_v19, 2 }
 0x772   :  { %2500 = vst [vmem:[#allocation1 + $0x1] ss:$9 sm:$0xff] %v1928_v47 }
 0x773   :  { %2501 = vst [vmem:[#allocation1 + $0x2] ss:$9 sm:$0xff] %v1929_v50  ;;  %v1962_v50 = vperm.slane %v4308_v19, 3 }
 0x774   :  { %2502 = vst [vmem:[#allocation1 + $0x3] ss:$9 sm:$0xff] %v1930_v56  ;;  %v1963_v56 = vperm.slane %v4308_v19, 4 }
 0x775   :  { %2503 = vst [vmem:[#allocation1 + $0x4] ss:$9 sm:$0xff] %v1931_v35  ;;  %v1965_v35 = vperm.slane %v4308_v19, 6 }
 0x776   :  { %2504 = vst [vmem:[#allocation1 + $0x5] ss:$9 sm:$0xff] %v1932_v54  ;;  %v1966_v54 = vperm.slane %v4308_v19, 7  ;;  %v1972_v19 = vperm.slane %v4302_v38, 5 }
 0x777   :  { %2505 = vst [vmem:[#allocation1 + $0x6] ss:$9 sm:$0xff] %v1933_v32  ;;  %v1967_v32 = vperm.slane %v4302_v38, 0 }
 0x778   :  { %2506 = vst [vmem:[#allocation1 + $0x7] ss:$9 sm:$0xff] %v1934_v13  ;;  %v1968_v13 = vperm.slane %v4302_v38, 1 }
 0x77f   :  { %v2507_v27 = vld [vmem:[#allocation1] sm:$0xff] }
 0x780   :  { %2758 = vperm.xlu0 %3013, %v2507_v27   ;;  %2508 = vst [vmem:[#allocation1] ss:$9 sm:$0xff] %v1935_v39  ;;  %v1970_v27 = vperm.slane %v4302_v38, 3 }
 0x781   :  { %2509 = vst [vmem:[#allocation1 + $0x1] ss:$9 sm:$0xff] %v1936_v29  ;;  %v1969_v29 = vperm.slane %v4302_v38, 2 }
 0x782   :  { %2510 = vst [vmem:[#allocation1 + $0x2] ss:$9 sm:$0xff] %v1937_v34  ;;  %v1971_v34 = vperm.slane %v4302_v38, 4 }
 0x783   :  { %2511 = vst [vmem:[#allocation1 + $0x3] ss:$9 sm:$0xff] %v1938_v55  ;;  %v1973_v55 = vperm.slane %v4302_v38, 6 }
 0x784   :  { %2512 = vst [vmem:[#allocation1 + $0x4] ss:$9 sm:$0xff] %v1939_v5  ;;  %v1974_v5 = vperm.slane %v4302_v38, 7  ;;  %v1980_v38 = vperm.slane %v4306_v53, 5 }
 0x785   :  { %2513 = vst [vmem:[#allocation1 + $0x5] ss:$9 sm:$0xff] %v1940_v26  ;;  %v1975_v26 = vperm.slane %v4306_v53, 0 }
 0x786   :  { %2514 = vst [vmem:[#allocation1 + $0x6] ss:$9 sm:$0xff] %v1941_v14  ;;  %v1976_v14 = vperm.slane %v4306_v53, 1 }
 0x787   :  { %2515 = vst [vmem:[#allocation1 + $0x7] ss:$9 sm:$0xff] %v1942_v15 }
 0x78e   :  { %v2516_v22 = vld [vmem:[#allocation1] sm:$0xff] }
 0x78f   :  { %2761 = vperm.xlu1 %3014, %v2516_v22   ;;  %2517 = vst [vmem:[#allocation1] ss:$9 sm:$0xff] %v1943_v16  ;;  %v1977_v16 = vperm.slane %v4306_v53, 2  ;;  %v1979_v22 = vperm.slane %v4306_v53, 4 }
 0x790   :  { %2518 = vst [vmem:[#allocation1 + $0x1] ss:$9 sm:$0xff] %v1944_v7  ;;  %v1978_v7 = vperm.slane %v4306_v53, 3 }
 0x791   :  { %2519 = vst [vmem:[#allocation1 + $0x2] ss:$9 sm:$0xff] %v1945_v21  ;;  %v1981_v21 = vperm.slane %v4306_v53, 6 }
 0x792   :  { %2520 = vst [vmem:[#allocation1 + $0x3] ss:$9 sm:$0xff] %v1946_v12  ;;  %v1982_v12 = vperm.slane %v4306_v53, 7  ;;  %v1988_v53 = vperm.slane %v4319_v51, 5 }
 0x793   :  { %2521 = vst [vmem:[#allocation1 + $0x4] ss:$9 sm:$0xff] %v1947_v58  ;;  %v1983_v58 = vperm.slane %v4319_v51, 0 }
 0x794   :  { %2522 = vst [vmem:[#allocation1 + $0x5] ss:$9 sm:$0xff] %v1948_v11  ;;  %v1984_v11 = vperm.slane %v4319_v51, 1 }
 0x795   :  { %2523 = vst [vmem:[#allocation1 + $0x6] ss:$9 sm:$0xff] %v1949_v46 }
 0x796   :  { %2524 = vst [vmem:[#allocation1 + $0x7] ss:$9 sm:$0xff] %v1950_v10  ;;  %v1985_v10 = vperm.slane %v4319_v51, 2 }
 0x79d   :  { %v2525_v41 = vld [vmem:[#allocation1] sm:$0xff] }
 0x79e   :  { %2764 = vperm.xlu2 %3012, %v2525_v41   ;;  %2526 = vst [vmem:[#allocation1] ss:$9 sm:$0xff] %v1951_v0  ;;  %v1986_v0 = vperm.slane %v4319_v51, 3  ;;  %v1989_v41 = vperm.slane %v4319_v51, 6 }
 0x79f   :  { %2527 = vst [vmem:[#allocation1 + $0x1] ss:$9 sm:$0xff] %v1952_v9  ;;  %v1987_v9 = vperm.slane %v4319_v51, 4 }
 0x7a0   :  { %2528 = vst [vmem:[#allocation1 + $0x2] ss:$9 sm:$0xff] %v1953_v37  ;;  %v1990_v37 = vperm.slane %v4319_v51, 7  ;;  %v1996_v51 = vperm.slane %v4310_v44, 5 }
 0x7a1   :  { %2529 = vst [vmem:[#allocation1 + $0x3] ss:$9 sm:$0xff] %v1954_v28  ;;  %v1991_v28 = vperm.slane %v4310_v44, 0 }
 0x7a2   :  { %2530 = vst [vmem:[#allocation1 + $0x4] ss:$9 sm:$0xff] %v1955_v48  ;;  %v1992_v48 = vperm.slane %v4310_v44, 1 }
 0x7a3   :  { %2531 = vst [vmem:[#allocation1 + $0x5] ss:$9 sm:$0xff] %v1956_v59 }
 0x7a4   :  { %2532 = vst [vmem:[#allocation1 + $0x6] ss:$9 sm:$0xff] %v1957_v61  ;;  %v1993_v61 = vperm.slane %v4310_v44, 2 }
 0x7a5   :  { %2533 = vst [vmem:[#allocation1 + $0x7] ss:$9 sm:$0xff] %v1958_v18  ;;  %v1994_v18 = vperm.slane %v4310_v44, 3 }
 0x7ac   :  { %v2534_v47 = vld [vmem:[#allocation1] sm:$0xff] }
 0x7ad   :  { %2767 = vperm.xlu0 %3013, %v2534_v47   ;;  %2535 = vst [vmem:[#allocation1] ss:$9 sm:$0xff] %v1959_v20  ;;  %v1995_v20 = vperm.slane %v4310_v44, 4  ;;  %v1998_v47 = vperm.slane %v4310_v44, 7 }
 0x7ae   :  { %2536 = vst [vmem:[#allocation1 + $0x1] ss:$9 sm:$0xff] %v1960_v2  ;;  %v1997_v2 = vperm.slane %v4310_v44, 6  ;;  %v2004_v44 = vperm.slane %v4315_v3, 5 }
 0x7af   :  { %2537 = vst [vmem:[#allocation1 + $0x2] ss:$9 sm:$0xff] %v1961_v1  ;;  %v1999_v1 = vperm.slane %v4315_v3, 0 }
 0x7b0   :  { %2538 = vst [vmem:[#allocation1 + $0x3] ss:$9 sm:$0xff] %v1962_v50  ;;  %v2000_v50 = vperm.slane %v4315_v3, 1 }
 0x7b1   :  { %2539 = vst [vmem:[#allocation1 + $0x4] ss:$9 sm:$0xff] %v1963_v56 }
 0x7b2   :  { %2540 = vst [vmem:[#allocation1 + $0x5] ss:$9 sm:$0xff] %v1964_v24  ;;  %v2001_v24 = vperm.slane %v4315_v3, 2 }
 0x7b3   :  { %2541 = vst [vmem:[#allocation1 + $0x6] ss:$9 sm:$0xff] %v1965_v35  ;;  %v2002_v35 = vperm.slane %v4315_v3, 3 }
 0x7b4   :  { %2542 = vst [vmem:[#allocation1 + $0x7] ss:$9 sm:$0xff] %v1966_v54  ;;  %v2003_v54 = vperm.slane %v4315_v3, 4 }
 0x7bb   :  { %v2543_v39 = vld [vmem:[#allocation1] sm:$0xff] }
 0x7bc   :  { %2770 = vperm.xlu1 %3014, %v2543_v39   ;;  %2544 = vst [vmem:[#allocation1] ss:$9 sm:$0xff] %v1967_v32  ;;  %v2005_v32 = vperm.slane %v4315_v3, 6  ;;  %v2007_v39 = vperm.slane %v4332_v49, 0 }
 0x7bd   :  { %2545 = vst [vmem:[#allocation1 + $0x1] ss:$9 sm:$0xff] %v1968_v13  ;;  %v2006_v13 = vperm.slane %v4315_v3, 7  ;;  %v2012_v3 = vperm.slane %v4332_v49, 5 }
 0x7be   :  { %2546 = vst [vmem:[#allocation1 + $0x2] ss:$9 sm:$0xff] %v1969_v29  ;;  %v2008_v29 = vperm.slane %v4332_v49, 1 }
 0x7bf   :  { %2547 = vst [vmem:[#allocation1 + $0x3] ss:$9 sm:$0xff] %v1970_v27 }
 0x7c0   :  { %2548 = vst [vmem:[#allocation1 + $0x4] ss:$9 sm:$0xff] %v1971_v34  ;;  %v2009_v34 = vperm.slane %v4332_v49, 2 }
 0x7c1   :  { %2549 = vst [vmem:[#allocation1 + $0x5] ss:$9 sm:$0xff] %v1972_v19  ;;  %v2010_v19 = vperm.slane %v4332_v49, 3 }
 0x7c2   :  { %2550 = vst [vmem:[#allocation1 + $0x6] ss:$9 sm:$0xff] %v1973_v55  ;;  %v2011_v55 = vperm.slane %v4332_v49, 4 }
 0x7c3   :  { %2551 = vst [vmem:[#allocation1 + $0x7] ss:$9 sm:$0xff] %v1974_v5  ;;  %v2013_v5 = vperm.slane %v4332_v49, 6 }
 0x7ca   :  { %v2552_v15 = vld [vmem:[#allocation1] sm:$0xff] }
 0x7cb   :  { %2773 = vperm.xlu2 %3012, %v2552_v15   ;;  %2553 = vst [vmem:[#allocation1] ss:$9 sm:$0xff] %v1975_v26  ;;  %v2014_v26 = vperm.slane %v4332_v49, 7  ;;  %v2705_v15 = vpop.permute.xlu0 %2704 }
 0x7cc   :  { %2554 = vst [vmem:[#allocation1 + $0x1] ss:$9 sm:$0xff] %v1976_v14 }
 0x7cd   :  { %2555 = vst [vmem:[#allocation1 + $0x2] ss:$9 sm:$0xff] %v1977_v16  ;;  %v2702_v16 = vpop.permute.xlu2 %2701 }
 0x7ce   :  { %2556 = vst [vmem:[#allocation1 + $0x3] ss:$9 sm:$0xff] %v1978_v7  ;;  %v2708_v7 = vpop.permute.xlu1 %2707 }
 0x7cf   :  { %2557 = vst [vmem:[#allocation1 + $0x4] ss:$9 sm:$0xff] %v1979_v22 }
 0x7d0   :  { %2558 = vst [vmem:[#allocation1 + $0x5] ss:$9 sm:$0xff] %v1980_v38 }
 0x7d1   :  { %2559 = vst [vmem:[#allocation1 + $0x6] ss:$9 sm:$0xff] %v1981_v21 }
 0x7d2   :  { %2560 = vst [vmem:[#allocation1 + $0x7] ss:$9 sm:$0xff] %v1982_v12 }
 0x7d3   :  { %v2714_v22 = vpop.permute.xlu0 %2713 }
 0x7d5   :  { %v2711_v38 = vpop.permute.xlu2 %2710 }
 0x7d6   :  { %v2717_v21 = vpop.permute.xlu1 %2716 }
 0x7d9   :  { %v2561_v46 = vld [vmem:[#allocation1] sm:$0xff] }
 0x7da   :  { %2776 = vperm.xlu0 %3013, %v2561_v46   ;;  %2562 = vst [vmem:[#allocation1] ss:$9 sm:$0xff] %v1983_v58 }
 0x7db   :  { %2563 = vst [vmem:[#allocation1 + $0x1] ss:$9 sm:$0xff] %v1984_v11  ;;  %v2723_v12 = vpop.permute.xlu0 %2722 }
 0x7dc   :  { %2564 = vst [vmem:[#allocation1 + $0x2] ss:$9 sm:$0xff] %v1985_v10 }
 0x7dd   :  { %2565 = vst [vmem:[#allocation1 + $0x3] ss:$9 sm:$0xff] %v1986_v0  ;;  %v2720_v58 = vpop.permute.xlu2 %2719 }
 0x7de   :  { %2566 = vst [vmem:[#allocation1 + $0x4] ss:$9 sm:$0xff] %v1987_v9  ;;  %v2726_v11 = vpop.permute.xlu1 %2725 }
 0x7df   :  { %2567 = vst [vmem:[#allocation1 + $0x5] ss:$9 sm:$0xff] %v1988_v53 }
 0x7e0   :  { %2568 = vst [vmem:[#allocation1 + $0x6] ss:$9 sm:$0xff] %v1989_v41 }
 0x7e1   :  { %2569 = vst [vmem:[#allocation1 + $0x7] ss:$9 sm:$0xff] %v1990_v37 }
 0x7e3   :  { %v4737_v46 = vpop.permute.xlu0 %2731 }
 0x7e5   :  { %v2729_v10 = vpop.permute.xlu2 %2728 }
 0x7e6   :  { %v4739_v0 = vpop.permute.xlu1 %2734 }
 0x7e8   :  { %v2570_v59 = vld [vmem:[#allocation1] sm:$0xff] }
 0x7e9   :  { %2779 = vperm.xlu1 %3014, %v2570_v59   ;;  %2571 = vst [vmem:[#allocation1] ss:$9 sm:$0xff] %v1991_v28 }
 0x7ea   :  { %2572 = vst [vmem:[#allocation1 + $0x1] ss:$9 sm:$0xff] %v1992_v48 }
 0x7eb   :  { %2573 = vst [vmem:[#allocation1 + $0x2] ss:$9 sm:$0xff] %v1993_v61  ;;  %v4741_v49 = vpop.permute.xlu0 %2740 }
 0x7ec   :  { %2574 = vst [vmem:[#allocation1 + $0x3] ss:$9 sm:$0xff] %v1994_v18  ;;  %v2889_v18 = vperm.slane %v2705_v15, %v4340_v6  ;;  %v2903_v15 = vperm.slane %v2726_v11, %v4403_v63  ;;  %v2907_v11 = vperm.slane %v4737_v46, %v4437_v45 }
 0x7ed   :  { %2575 = vst [vmem:[#allocation1 + $0x4] ss:$9 sm:$0xff] %v1995_v20  ;;  %v4743_v9 = vpop.permute.xlu2 %2737 }
 0x7ee   :  { %2576 = vst [vmem:[#allocation1 + $0x5] ss:$9 sm:$0xff] %v1996_v51  ;;  %v2744_v53 = vpop.permute.xlu1 %2743  ;;  %v2887_v51 = vperm.slane %v2702_v16, %v4344_v17 }
 0x7ef   :  { %2577 = vst [vmem:[#allocation1 + $0x6] ss:$9 sm:$0xff] %v1997_v2  ;;  %v2915_v20 = vperm.slane %v2744_v53, %v4325_v23  ;;  %v2891_v2 = vperm.slane %v2708_v7, %v4361_v4 }
 0x7f0   :  { %2578 = vst [vmem:[#allocation1 + $0x7] ss:$9 sm:$0xff] %v1998_v47 }
 0x7f3   :  { %v2750_v41 = vpop.permute.xlu0 %2749 }
 0x7f4   :  { %v2918_v47 = vperm.slane %v2750_v41, %v4344_v17  ;;  %v2893_v17 = vperm.slane %v2711_v38, %v4357_v60 }
 0x7f5   :  { %v2747_v37 = vpop.permute.xlu2 %2746 }
 0x7f6   :  { %v2753_v28 = vpop.permute.xlu1 %2752 }
 0x7f7   :  { %v2579_v56 = vld [vmem:[#allocation1] sm:$0xff] }
 0x7f8   :  { %2782 = vperm.xlu2 %3012, %v2579_v56   ;;  %2580 = vst [vmem:[#allocation1] ss:$9 sm:$0xff] %v1999_v1  ;;  %v2916_v1 = vperm.slane %v2747_v37, %v4328_v30  ;;  %v2897_v30 = vperm.slane %v2717_v21, %v4376_v43 }
 0x7f9   :  { %2581 = vst [vmem:[#allocation1 + $0x1] ss:$9 sm:$0xff] %v2000_v50  ;;  %v2920_v50 = vperm.slane %v2753_v28, %v4340_v6 }
 0x7fa   :  { %2582 = vst [vmem:[#allocation1 + $0x2] ss:$9 sm:$0xff] %v2001_v24  ;;  %v2888_v24 = vsel %vm2799_vm2, %v2887_v51, %v4595_v52 }
 0x7fb   :  { %2583 = vst [vmem:[#allocation1 + $0x3] ss:$9 sm:$0xff] %v2002_v35  ;;  %v2759_v48 = vpop.permute.xlu0 %2758 }
 0x7fc   :  { %2584 = vst [vmem:[#allocation1 + $0x4] ss:$9 sm:$0xff] %v2003_v54  ;;  %v2890_v54 = vsel %vm2803_vm3, %v2889_v18, %v2888_v24 }
 0x7fd   :  { %2585 = vst [vmem:[#allocation1 + $0x5] ss:$9 sm:$0xff] %v2004_v44  ;;  %v2756_v59 = vpop.permute.xlu2 %2755  ;;  %v2917_v44 = vsel %vm2795_vm1, %v2916_v1, %v2915_v20  ;;  %v2892_v23 = vsel %vm2807_vm4, %v2891_v2, %v2890_v54  ;;  %vm2951_vm1 = vcmask 1042434  }
 0x7fe   :  { %2586 = vst [vmem:[#allocation1 + $0x6] ss:$9 sm:$0xff] %v2005_v32  ;;  %v2895_v32 = vperm.slane %v2714_v22, %v4380_v25 }
 0x7ff   :  { %2587 = vst [vmem:[#allocation1 + $0x7] ss:$9 sm:$0xff] %v2006_v13  ;;  %v2919_v13 = vsel %vm2799_vm2, %v2918_v47, %v2917_v44  ;;  %vm2953_vm2 = vcmask 1041408  }
 0x800   :  { %v2921_v6 = vsel %vm2803_vm3, %v2920_v50, %v2919_v13  ;;  %vm2958_vm3 = vcmp.lt.s32.totalorder %v2790_v36, 512 }
 0x801   :  { %v2762_v61 = vpop.permute.xlu1 %2761 }
 0x805   :  { %v2765_v35 = vpop.permute.xlu2 %2764 }
 0x806   :  { %v2588_v27 = vld [vmem:[#allocation1] sm:$0xff]  ;;  %v2928_v7 = vperm.slane %v2765_v35, %v4376_v43  ;;  %v2909_v43 = vperm.slane %v4739_v0, %v4433_v33  ;;  %v2913_v0 = vperm.slane %v4741_v49, %v4459_v57 }
 0x807   :  { %2785 = vperm.xlu0 %3013, %v2588_v27   ;;  %2589 = vst [vmem:[#allocation1] ss:$9 sm:$0xff] %v2007_v39  ;;  %v2924_v39 = vperm.slane %v2759_v48, %v4357_v60  ;;  %v2926_v27 = vperm.slane %v2762_v61, %v4380_v25  ;;  %v2899_v60 = vperm.slane %v2720_v58, %v4396_v40 }
 0x808   :  { %2590 = vst [vmem:[#allocation1 + $0x1] ss:$9 sm:$0xff] %v2008_v29  ;;  %v2922_v29 = vperm.slane %v2756_v59, %v4361_v4 }
 0x809   :  { %2591 = vst [vmem:[#allocation1 + $0x2] ss:$9 sm:$0xff] %v2009_v34  ;;  %v2894_v34 = vsel %vm2811_vm5, %v2893_v17, %v2892_v23 }
 0x80a   :  { %2592 = vst [vmem:[#allocation1 + $0x3] ss:$9 sm:$0xff] %v2010_v19  ;;  %v2896_v19 = vsel %vm2815_vm6, %v2895_v32, %v2894_v34 }
 0x80b   :  { %2593 = vst [vmem:[#allocation1 + $0x4] ss:$9 sm:$0xff] %v2011_v55  ;;  %v2923_v55 = vsel %vm2807_vm4, %v2922_v29, %v2921_v6 }
 0x80c   :  { %2594 = vst [vmem:[#allocation1 + $0x5] ss:$9 sm:$0xff] %v2012_v3  ;;  %v2898_v3 = vsel %vm2819_vm7, %v2897_v30, %v2896_v19 }
 0x80d   :  { %2595 = vst [vmem:[#allocation1 + $0x6] ss:$9 sm:$0xff] %v2013_v5  ;;  %v2901_v5 = vperm.slane %v2723_v12, %v4406_v62  ;;  %v2900_v38 = vsel %vm2823_vm8, %v2899_v60, %v2898_v3 }
 0x80e   :  { %2596 = vst [vmem:[#allocation1 + $0x7] ss:$9 sm:$0xff] %v2014_v26  ;;  %v2925_v26 = vsel %vm2811_vm5, %v2924_v39, %v2923_v55 }
 0x80f   :  { %v2927_v4 = vsel %vm2815_vm6, %v2926_v27, %v2925_v26  ;;  %v2902_v21 = vsel %vm2827_vm9, %v2901_v5, %v2900_v38 }
 0x810   :  { %v2929_v12 = vsel %vm2819_vm7, %v2928_v7, %v2927_v4  ;;  %v2904_v58 = vsel %vm2831_vm10, %v2903_v15, %v2902_v21 }
 0x815   :  { %v2597_v14 = vld [vmem:[#allocation1] sm:$0xff] }
 0x816   :  { %2788 = vperm.xlu1 %3014, %v2597_v14  }
 0x81f   :  { %v2768_v56 = vpop.permute.xlu0 %2767 }
 0x820   :  { %v2930_v16 = vperm.slane %v2768_v56, %v4396_v40  ;;  %v2905_v40 = vperm.slane %v2729_v10, %v4421_v42 }
 0x822   :  { %v2931_v41 = vsel %vm2823_vm8, %v2930_v16, %v2929_v12  ;;  %v2906_v59 = vsel %vm2835_vm11, %v2905_v40, %v2904_v58 }
 0x823   :  { %v2908_v46 = vsel %vm2839_vm12, %v2907_v11, %v2906_v59 }
 0x824   :  { %v2910_v10 = vsel %vm2843_vm13, %v2909_v43, %v2908_v46 }
 0x825   :  { %v2774_v25 = vpop.permute.xlu2 %2773 }
 0x826   :  { %v2934_v28 = vperm.slane %v2774_v25, %v4403_v63  ;;  %v2911_v63 = vperm.slane %v4743_v9, %v4452_v8 }
 0x828   :  { %v2912_v47 = vsel %vm2847_vm14, %v2911_v63, %v2910_v10 }
 0x829   :  { %v2914_v50 = vsel %vm2851_vm15, %v2913_v0, %v2912_v47 }
 0x82e   :  { %v2771_v52 = vpop.permute.xlu1 %2770 }
 0x82f   :  { %v2932_v22 = vperm.slane %v2771_v52, %v4406_v62 }
 0x831   :  { %v2933_v62 = vsel %vm2827_vm9, %v2932_v22, %v2931_v41 }
 0x832   :  { %v2935_v20 = vsel %vm2831_vm10, %v2934_v28, %v2933_v62 }
 0x84c   :  { %v2777_v14 = vpop.permute.xlu0 %2776 }
 0x84d   :  { %v2936_v37 = vperm.slane %v2777_v14, %v4421_v42 }
 0x84f   :  { %v2937_v51 = vsel %vm2835_vm11, %v2936_v37, %v2935_v20 }
 0x852   :  { %v2783_v18 = vpop.permute.xlu2 %2782 }
 0x853   :  { %v2940_v2 = vperm.slane %v2783_v18, %v4433_v33  ;;  %v2947_v33 = vrot.slane %v2914_v50, 6 }
 0x85b   :  { %v2780_v53 = vpop.permute.xlu1 %2779 }
 0x85c   :  { %v2938_v48 = vperm.slane %v2780_v53, %v4437_v45 }
 0x85e   :  { %v2939_v42 = vsel %vm2839_vm12, %v2938_v48, %v2937_v51 }
 0x85f   :  { %v2941_v56 = vsel %vm2843_vm13, %v2940_v2, %v2939_v42 }
 0x879   :  { %v2786_v61 = vpop.permute.xlu0 %2785 }
 0x87a   :  { %v2942_v45 = vperm.slane %v2786_v61, %v4452_v8 }
 0x87c   :  { %v2943_v24 = vsel %vm2847_vm14, %v2942_v45, %v2941_v56 }
 0x888   :  { %v2789_v1 = vpop.permute.xlu1 %2788 }
 0x889   :  { %v2944_v49 = vperm.slane %v2789_v1, %v4459_v57 }
 0x88b   :  { %v2945_v35 = vsel %vm2851_vm15, %v2944_v49, %v2943_v24 }
 0x88c   :  { %v2948_v8 = vrot.slane %v2945_v35, 5 }
 0x88e   :  { %v2952_v9 = vsel %vm2951_vm1, %v2947_v33, %v2948_v8 }
 0x88f   :  { %v2954_v57 = vsel %vm2953_vm2, %v4647_v31, %v2952_v9 }
 0x890   :  { %2960 = vst.msk [vmem:[#allocation5] sm:$0xf] %vm2958_vm3, %v2954_v57 }
 0x891   :  { %2971 = dma.vmem_to_hbm [thread:$0]  %s2967_s0, 64, %s2969_s15, [#allocation4]  }
 0x892   :  { %3065 = dma.done.wait [#allocation4], 64  }
 0x893   :  { %3066 = vsyncadd [#allocation4], 4294967232 }
 0x894   :  { %2976 = vsyncpa [#allocation3], 1 }
 0x895   :  { %2977 = vsyncpa [#allocation4], 1 }

</bundles_post_ra>
